<compile_context>
chip_gen: v5e
topology: v5e:2x2
jax: 0.10.0
libtpu: 0.0.40
codegen_flags: <defaults>
</compile_context>

<pallas_src>
import jax
import jax.numpy as jnp
from jax.experimental import pallas as pl
from jax.experimental.pallas import tpu as pltpu


def _make_bottleneck_kernel(b_tile, H, W, P, Cin, use_im2col):
    """Builds the kernel body for static tile/shape parameters."""

    def kernel(x_ref, w1_ref, s1_ref, b1_ref,
               w2_ref, s2_ref, b2_ref,
               w3_ref, s3_ref, b3_ref,
               o_ref, pad_ref, *col_scratch):
        M = b_tile * H * W

        # ---- conv1 (1x1) + bn1 + relu : bf16 MXU operands, f32 accumulate --
        x_bf = x_ref[...].reshape(M, Cin).astype(jnp.bfloat16)
        o1 = jnp.dot(x_bf, w1_ref[...], preferred_element_type=jnp.float32)
        o1 = jnp.maximum(o1 * s1_ref[...] + b1_ref[...], 0.0)
        o1 = o1.astype(jnp.bfloat16).reshape(b_tile, H, W, P)

        # ---- conv2 (3x3, stride=1, dilation=1, padding=1) + bn2 + relu -----
        # Zero only the 1-wide halo ring of the bf16 padded scratch once per
        # grid step (interior is fully overwritten per image below).
        zero_row = jnp.zeros((1, W + 2, P), jnp.bfloat16)
        zero_col = jnp.zeros((H + 2, 1, P), jnp.bfloat16)
        pad_ref[0:1, :, :] = zero_row
        pad_ref[H + 1:H + 2, :, :] = zero_row
        pad_ref[:, 0:1, :] = zero_col
        pad_ref[:, W + 1:W + 2, :] = zero_col

        o2_parts = []
        for b in range(b_tile):
            pad_ref[1:H + 1, 1:W + 1, :] = o1[b]

            if use_im2col:
                # Single K = 9*P matmul (only used when P >= 128: lane-aligned
                # column blocks, good 256-wide MXU occupancy).
                col_ref = col_scratch[0]
                for dx in range(3):
                    slab = pad_ref[:, dx:dx + W, :]          # (H+2, W, P)
                    for dy in range(3):
                        t = dy * 3 + dx
                        col_ref[:, :, t * P:(t + 1) * P] = slab[dy:dy + H]
                col = col_ref[...].reshape(H * W, 9 * P)
                w2 = w2_ref[...].reshape(9 * P, P)
                o2b = jnp.dot(col, w2, preferred_element_type=jnp.float32)
            else:
                # Nine accumulating dots on shifted views of the padded
                # scratch — no im2col materialization, no masked lane stores.
                o2b = jnp.zeros((H * W, P), jnp.float32)
                for dy in range(3):
                    for dx in range(3):
                        tap = pad_ref[dy:dy + H, dx:dx + W, :].reshape(H * W, P)
                        o2b = o2b + jnp.dot(tap, w2_ref[dy, dx],
                                            preferred_element_type=jnp.float32)
            o2_parts.append(o2b)

        o2 = o2_parts[0] if b_tile == 1 else jnp.concatenate(o2_parts, axis=0)
        o2 = jnp.maximum(o2 * s2_ref[...] + b2_ref[...], 0.0)

        # ---- conv3 (1x1) + bn3 ---------------------------------------------
        o3 = jnp.dot(o2.astype(jnp.bfloat16), w3_ref[...],
                     preferred_element_type=jnp.float32)
        o3 = o3 * s3_ref[...] + b3_ref[...]

        # ---- residual add + relu (re-read x; it is still resident in VMEM) -
        res = x_ref[...].reshape(M, Cin).astype(jnp.float32)
        out = jnp.maximum(o3 + res, 0.0)
        o_ref[...] = out.reshape(b_tile, H, W, Cin).astype(o_ref.dtype)

    return kernel


def _resident_spec(shape):
    # Constant index map -> fetched once, stays resident across grid steps.
    nd = len(shape)
    return pl.BlockSpec(tuple(shape), lambda n, _nd=nd: (0,) * _nd)


def _vmem_limit_bytes():
    # ~96 MiB on 128-MiB parts (v5e/v6e), ~48 MiB on 64-MiB parts (v7x).
    try:
        cap = pltpu.get_tpu_info().vmem_capacity_bytes
    except Exception:
        cap = 64 * 1024 * 1024
    return min((3 * cap) // 4, 100 * 1024 * 1024)


def bottleneck_forward_nhwc(x_nhwc, params, b_tile=1):
    """bf16-native entry point. x_nhwc: (N, H, W, Cin) bf16, Cin == 4*planes."""
    (w1, s1, b1, w2, s2, b2, w3, s3, b3) = params
    N, H, W, Cin = x_nhwc.shape
    P = w1.shape[1]
    assert Cin == 4 * P, "downsample=None requires inplanes == planes * 4"
    assert N % b_tile == 0

    use_im2col = P >= 128
    kernel = _make_bottleneck_kernel(b_tile, H, W, P, Cin, use_im2col)

    act_spec = pl.BlockSpec((b_tile, H, W, Cin), lambda n: (n, 0, 0, 0))

    scratch_shapes = [pltpu.VMEM((H + 2, W + 2, P), jnp.bfloat16)]  # padded o1
    if use_im2col:
        scratch_shapes.append(pltpu.VMEM((H, W, 9 * P), jnp.bfloat16))

    return pl.pallas_call(
        kernel,
        out_shape=jax.ShapeDtypeStruct((N, H, W, Cin), x_nhwc.dtype),
        grid=(N // b_tile,),
        in_specs=[
            act_spec,
            _resident_spec(w1.shape), _resident_spec(s1.shape), _resident_spec(b1.shape),
            _resident_spec(w2.shape), _resident_spec(s2.shape), _resident_spec(b2.shape),
            _resident_spec(w3.shape), _resident_spec(s3.shape), _resident_spec(b3.shape),
        ],
        out_specs=act_spec,
        scratch_shapes=scratch_shapes,
        compiler_params=pltpu.CompilerParams(
            dimension_semantics=("parallel",),        # megacore sharding on v7x
            vmem_limit_bytes=_vmem_limit_bytes(),
        ),
    )(x_nhwc, w1, s1, b1, w2, s2, b2, w3, s3, b3)


def bottleneck_forward(x_nchw, params, b_tile=1):
    """NCHW / f32 adapter matching the PyTorch module's calling convention.

    For multi-layer models keep activations NHWC bf16 end-to-end and call
    bottleneck_forward_nhwc directly to avoid the relayout + casts per block.
    """
    x_nhwc = jnp.transpose(x_nchw, (0, 2, 3, 1)).astype(jnp.bfloat16)
    out_nhwc = bottleneck_forward_nhwc(x_nhwc, params, b_tile=b_tile)
    return jnp.transpose(out_nhwc, (0, 3, 1, 2)).astype(x_nchw.dtype)


def make_params(key, inplanes, planes, eps=1e-5):
    """Deterministic synthetic parameters (shapes follow Bottleneck.__init__).

    Master conv weights are rounded through bf16 so the pure-JAX reference and
    the bf16 kernel see numerically identical weights.
    """
    ks = jax.random.split(key, 12)

    def q(w):  # bf16-quantize, keep f32 master for the reference
        return w.astype(jnp.bfloat16).astype(jnp.float32)

    # PyTorch-layout conv weights (OIHW).
    w1_t = q(0.1 * jax.random.normal(ks[0], (planes, inplanes, 1, 1), jnp.float32))
    w2_t = q(0.1 * jax.random.normal(ks[1], (planes, planes, 3, 3), jnp.float32))
    w3_t = q(0.1 * jax.random.normal(ks[2], (planes * 4, planes, 1, 1), jnp.float32))

    def bn_params(kg, kb, km, kv, c):
        gamma = 1.0 + 0.1 * jax.random.normal(kg, (c,), jnp.float32)
        beta = 0.1 * jax.random.normal(kb, (c,), jnp.float32)
        mean = 0.1 * jax.random.normal(km, (c,), jnp.float32)
        var = jnp.abs(jax.random.normal(kv, (c,), jnp.float32)) + 0.5
        scale = gamma / jnp.sqrt(var + eps)
        bias = beta - mean * scale
        return scale, bias

    s1, b1 = bn_params(ks[3], ks[4], ks[5], ks[6], planes)
    s2, b2 = bn_params(ks[7], ks[8], ks[9], ks[10], planes)
    k3 = jax.random.split(ks[11], 4)
    s3, b3 = bn_params(k3[0], k3[1], k3[2], k3[3], planes * 4)

    # Kernel-layout weights (bf16 MXU operands).
    w1 = w1_t[:, :, 0, 0].T.astype(jnp.bfloat16)                  # (Cin, P)
    w2 = jnp.transpose(w2_t, (2, 3, 1, 0)).astype(jnp.bfloat16)   # (3, 3, Pin, Pout)
    w3 = w3_t[:, :, 0, 0].T.astype(jnp.bfloat16)                  # (P, 4P)

    kernel_params = (w1, s1.reshape(1, -1), b1.reshape(1, -1),
                     w2, s2.reshape(1, -1), b2.reshape(1, -1),
                     w3, s3.reshape(1, -1), b3.reshape(1, -1))
    torch_layout = (w1_t, w2_t, w3_t, s1, b1, s2, b2, s3, b3)
    return kernel_params, torch_layout


def reference_forward(x, torch_layout):
    """Plain-JAX f32 reference with PyTorch conv semantics (NCHW / OIHW)."""
    w1_t, w2_t, w3_t, s1, b1, s2, b2, s3, b3 = torch_layout

    def conv(x, w, padding=0):
        return jax.lax.conv_general_dilated(
            x, w, window_strides=(1, 1),
            padding=[(padding, padding)] * 2,
            rhs_dilation=(1, 1),
            dimension_numbers=('NCHW', 'OIHW', 'NCHW'))

    def bn(x, s, b):
        return x * s[None, :, None, None] + b[None, :, None, None]

    out = jnp.maximum(bn(conv(x, w1_t), s1, b1), 0.0)
    out = jnp.maximum(bn(conv(out, w2_t, padding=1), s2, b2), 0.0)
    out = bn(conv(out, w3_t), s3, b3)
    return jnp.maximum(out + x, 0.0)


if __name__ == "__main__":
    key = jax.random.PRNGKey(0)
    k_x, k_p = jax.random.split(key)

    # Lane-friendly small shapes: Cin = 128 fills the 128-lane vregs; planes=32
    # exercises the small-P (9 accumulated dots) conv2 path.  N=2 gives an
    # even parallel grid so both v7x TensorCores have work.
    planes = 32
    inplanes = planes * 4        # 128 (required for downsample=None residual)
    N, H, W = 2, 16, 16

    x = jax.random.normal(k_x, (N, inplanes, H, W), jnp.float32)
    kernel_params, torch_layout = make_params(k_p, inplanes, planes)

    out = bottleneck_forward(x, kernel_params, b_tile=1)
    out = jax.block_until_ready(out)

    # Reference sees the same bf16-quantized input the kernel consumes.
    x_q = x.astype(jnp.bfloat16).astype(jnp.float32)
    ref = reference_forward(x_q, torch_layout)
    assert out.shape == ref.shape == (N, inplanes, H, W)
    # bf16 activations/weights in the kernel vs f32 reference -> relaxed tol.
    assert jnp.allclose(out.astype(jnp.float32), ref, rtol=5e-2, atol=1e-1), \
        "mismatch vs. reference"

    # TODO(synk): stride>1 / dilation>1 / downsample branch not implemented
    # (default constructor args only); for N<2 on v7x add a second parallel
    # grid axis over H-row tiles (with halo overlap) to keep both TCs busy.
    print("KERNEL_OK")
</pallas_src>

<mosaic_0001>
module attributes {stable_mosaic.version = 11 : i64} {
  func.func @kernel(%arg0: i32, %arg1: memref<1x16x16x128xbf16, #tpu.memory_space<vmem>>, %arg2: memref<128x32xbf16, #tpu.memory_space<vmem>>, %arg3: memref<1x32xf32, #tpu.memory_space<vmem>>, %arg4: memref<1x32xf32, #tpu.memory_space<vmem>>, %arg5: memref<3x3x32x32xbf16, #tpu.memory_space<vmem>>, %arg6: memref<1x32xf32, #tpu.memory_space<vmem>>, %arg7: memref<1x32xf32, #tpu.memory_space<vmem>>, %arg8: memref<32x128xbf16, #tpu.memory_space<vmem>>, %arg9: memref<1x128xf32, #tpu.memory_space<vmem>>, %arg10: memref<1x128xf32, #tpu.memory_space<vmem>>, %arg11: memref<1x16x16x128xbf16, #tpu.memory_space<vmem>>, %arg12: memref<18x18x32xbf16, #tpu.memory_space<vmem>>) attributes {dimension_semantics = [#tpu.dimension_semantics<parallel>], iteration_bounds = array<i64: 2>, scalar_prefetch = 0 : i64, scratch_operands = 1 : i64, tpu.core_type = #tpu.core_type<tc>, window_params = [{transform_indices = @transform_0, window_bounds = array<i64: 1, 16, 16, 128>}, {pipeline_mode = #tpu.pipeline_mode<synchronous>, transform_indices = @transform_1, window_bounds = array<i64: 128, 32>}, {pipeline_mode = #tpu.pipeline_mode<synchronous>, transform_indices = @transform_2, window_bounds = array<i64: 1, 32>}, {pipeline_mode = #tpu.pipeline_mode<synchronous>, transform_indices = @transform_3, window_bounds = array<i64: 1, 32>}, {pipeline_mode = #tpu.pipeline_mode<synchronous>, transform_indices = @transform_4, window_bounds = array<i64: 3, 3, 32, 32>}, {pipeline_mode = #tpu.pipeline_mode<synchronous>, transform_indices = @transform_5, window_bounds = array<i64: 1, 32>}, {pipeline_mode = #tpu.pipeline_mode<synchronous>, transform_indices = @transform_6, window_bounds = array<i64: 1, 32>}, {pipeline_mode = #tpu.pipeline_mode<synchronous>, transform_indices = @transform_7, window_bounds = array<i64: 32, 128>}, {pipeline_mode = #tpu.pipeline_mode<synchronous>, transform_indices = @transform_8, window_bounds = array<i64: 1, 128>}, {pipeline_mode = #tpu.pipeline_mode<synchronous>, transform_indices = @transform_9, window_bounds = array<i64: 1, 128>}, {transform_indices = @transform_10, window_bounds = array<i64: 1, 16, 16, 128>}]} {
    %c0 = arith.constant 0 : index
    %c0_0 = arith.constant 0 : index
    %c0_1 = arith.constant 0 : index
    %c0_2 = arith.constant 0 : index
    %0 = vector.load %arg1[%c0, %c0_0, %c0_1, %c0_2] : memref<1x16x16x128xbf16, #tpu.memory_space<vmem>>, vector<1x16x16x128xbf16>
    %1 = vector.shape_cast %0 : vector<1x16x16x128xbf16> to vector<256x128xbf16>
    %c0_3 = arith.constant 0 : index
    %c0_4 = arith.constant 0 : index
    %2 = vector.load %arg2[%c0_3, %c0_4] : memref<128x32xbf16, #tpu.memory_space<vmem>>, vector<128x32xbf16>
    %cst = arith.constant dense<0.000000e+00> : vector<256x32xf32>
    %3 = tpu.matmul %1, %2, %cst {dimension_numbers = #tpu.dot_dimension_numbers<[1], [0], [0], [1], [0, 0, 1, 1], [], []>} : vector<256x128xbf16>, vector<128x32xbf16>, vector<256x32xf32> -> vector<256x32xf32>
    %c0_5 = arith.constant 0 : index
    %c0_6 = arith.constant 0 : index
    %4 = vector.load %arg3[%c0_5, %c0_6] : memref<1x32xf32, #tpu.memory_space<vmem>>, vector<1x32xf32>
    %5 = vector.broadcast %4 : vector<1x32xf32> to vector<256x32xf32>
    %6 = arith.mulf %3, %5 : vector<256x32xf32>
    %c0_7 = arith.constant 0 : index
    %c0_8 = arith.constant 0 : index
    %7 = vector.load %arg4[%c0_7, %c0_8] : memref<1x32xf32, #tpu.memory_space<vmem>>, vector<1x32xf32>
    %8 = vector.broadcast %7 : vector<1x32xf32> to vector<256x32xf32>
    %9 = arith.addf %6, %8 : vector<256x32xf32>
    %cst_9 = arith.constant 0.000000e+00 : f32
    %10 = vector.broadcast %cst_9 : f32 to vector<256x32xf32>
    %11 = arith.maximumf %9, %10 : vector<256x32xf32>
    %12 = arith.truncf %11 : vector<256x32xf32> to vector<256x32xbf16>
    %13 = vector.shape_cast %12 : vector<256x32xbf16> to vector<1x16x16x32xbf16>
    %cst_10 = arith.constant 0.000000e+00 : bf16
    %14 = vector.broadcast %cst_10 : bf16 to vector<1x18x32xbf16>
    %cst_11 = arith.constant 0.000000e+00 : bf16
    %15 = vector.broadcast %cst_11 : bf16 to vector<18x1x32xbf16>
    %c0_12 = arith.constant 0 : index
    %c0_13 = arith.constant 0 : index
    %c0_14 = arith.constant 0 : index
    %16 = vector.load %arg12[%c0_12, %c0_13, %c0_14] : memref<18x18x32xbf16, #tpu.memory_space<vmem>>, vector<1x18x32xbf16>
    tpu.vector_store %arg12[%c0_12, %c0_13, %c0_14], %14 {strides = array<i32>} : memref<18x18x32xbf16, #tpu.memory_space<vmem>>, vector<1x18x32xbf16>,
    %c17 = arith.constant 17 : index
    %c0_15 = arith.constant 0 : index
    %c0_16 = arith.constant 0 : index
    %17 = vector.load %arg12[%c17, %c0_15, %c0_16] : memref<18x18x32xbf16, #tpu.memory_space<vmem>>, vector<1x18x32xbf16>
    tpu.vector_store %arg12[%c17, %c0_15, %c0_16], %14 {strides = array<i32>} : memref<18x18x32xbf16, #tpu.memory_space<vmem>>, vector<1x18x32xbf16>,
    %c0_17 = arith.constant 0 : index
    %c0_18 = arith.constant 0 : index
    %c0_19 = arith.constant 0 : index
    %18 = vector.load %arg12[%c0_17, %c0_18, %c0_19] : memref<18x18x32xbf16, #tpu.memory_space<vmem>>, vector<18x1x32xbf16>
    tpu.vector_store %arg12[%c0_17, %c0_18, %c0_19], %15 {strides = array<i32>} : memref<18x18x32xbf16, #tpu.memory_space<vmem>>, vector<18x1x32xbf16>,
    %c0_20 = arith.constant 0 : index
    %c17_21 = arith.constant 17 : index
    %c0_22 = arith.constant 0 : index
    %19 = vector.load %arg12[%c0_20, %c17_21, %c0_22] : memref<18x18x32xbf16, #tpu.memory_space<vmem>>, vector<18x1x32xbf16>
    tpu.vector_store %arg12[%c0_20, %c17_21, %c0_22], %15 {strides = array<i32>} : memref<18x18x32xbf16, #tpu.memory_space<vmem>>, vector<18x1x32xbf16>,
    %20 = vector.shape_cast %13 : vector<1x16x16x32xbf16> to vector<16x16x32xbf16>
    %c1 = arith.constant 1 : index
    %c1_23 = arith.constant 1 : index
    %c0_24 = arith.constant 0 : index
    %21 = vector.load %arg12[%c1, %c1_23, %c0_24] : memref<18x18x32xbf16, #tpu.memory_space<vmem>>, vector<16x16x32xbf16>
    tpu.vector_store %arg12[%c1, %c1_23, %c0_24], %20 {strides = array<i32>} : memref<18x18x32xbf16, #tpu.memory_space<vmem>>, vector<16x16x32xbf16>,
    %cst_25 = arith.constant 0.000000e+00 : f32
    %22 = vector.broadcast %cst_25 : f32 to vector<256x32xf32>
    %c0_26 = arith.constant 0 : index
    %c0_27 = arith.constant 0 : index
    %c0_28 = arith.constant 0 : index
    %23 = vector.load %arg12[%c0_26, %c0_27, %c0_28] : memref<18x18x32xbf16, #tpu.memory_space<vmem>>, vector<16x16x32xbf16>
    %24 = vector.shape_cast %23 : vector<16x16x32xbf16> to vector<256x32xbf16>
    %c0_29 = arith.constant 0 : index
    %c0_30 = arith.constant 0 : index
    %c0_31 = arith.constant 0 : index
    %c0_32 = arith.constant 0 : index
    %25 = vector.load %arg5[%c0_29, %c0_30, %c0_31, %c0_32] : memref<3x3x32x32xbf16, #tpu.memory_space<vmem>>, vector<1x1x32x32xbf16>
    %26 = vector.shape_cast %25 : vector<1x1x32x32xbf16> to vector<32x32xbf16>
    %cst_33 = arith.constant dense<0.000000e+00> : vector<256x32xf32>
    %27 = tpu.matmul %24, %26, %cst_33 {dimension_numbers = #tpu.dot_dimension_numbers<[1], [0], [0], [1], [0, 0, 1, 1], [], []>} : vector<256x32xbf16>, vector<32x32xbf16>, vector<256x32xf32> -> vector<256x32xf32>
    %28 = arith.addf %22, %27 : vector<256x32xf32>
    %c0_34 = arith.constant 0 : index
    %c1_35 = arith.constant 1 : index
    %c0_36 = arith.constant 0 : index
    %29 = vector.load %arg12[%c0_34, %c1_35, %c0_36] : memref<18x18x32xbf16, #tpu.memory_space<vmem>>, vector<16x16x32xbf16>
    %30 = vector.shape_cast %29 : vector<16x16x32xbf16> to vector<256x32xbf16>
    %c0_37 = arith.constant 0 : index
    %c1_38 = arith.constant 1 : index
    %c0_39 = arith.constant 0 : index
    %c0_40 = arith.constant 0 : index
    %31 = vector.load %arg5[%c0_37, %c1_38, %c0_39, %c0_40] : memref<3x3x32x32xbf16, #tpu.memory_space<vmem>>, vector<1x1x32x32xbf16>
    %32 = vector.shape_cast %31 : vector<1x1x32x32xbf16> to vector<32x32xbf16>
    %cst_41 = arith.constant dense<0.000000e+00> : vector<256x32xf32>
    %33 = tpu.matmul %30, %32, %cst_41 {dimension_numbers = #tpu.dot_dimension_numbers<[1], [0], [0], [1], [0, 0, 1, 1], [], []>} : vector<256x32xbf16>, vector<32x32xbf16>, vector<256x32xf32> -> vector<256x32xf32>
    %34 = arith.addf %28, %33 : vector<256x32xf32>
    %c0_42 = arith.constant 0 : index
    %c2 = arith.constant 2 : index
    %c0_43 = arith.constant 0 : index
    %35 = vector.load %arg12[%c0_42, %c2, %c0_43] : memref<18x18x32xbf16, #tpu.memory_space<vmem>>, vector<16x16x32xbf16>
    %36 = vector.shape_cast %35 : vector<16x16x32xbf16> to vector<256x32xbf16>
    %c0_44 = arith.constant 0 : index
    %c2_45 = arith.constant 2 : index
    %c0_46 = arith.constant 0 : index
    %c0_47 = arith.constant 0 : index
    %37 = vector.load %arg5[%c0_44, %c2_45, %c0_46, %c0_47] : memref<3x3x32x32xbf16, #tpu.memory_space<vmem>>, vector<1x1x32x32xbf16>
    %38 = vector.shape_cast %37 : vector<1x1x32x32xbf16> to vector<32x32xbf16>
    %cst_48 = arith.constant dense<0.000000e+00> : vector<256x32xf32>
    %39 = tpu.matmul %36, %38, %cst_48 {dimension_numbers = #tpu.dot_dimension_numbers<[1], [0], [0], [1], [0, 0, 1, 1], [], []>} : vector<256x32xbf16>, vector<32x32xbf16>, vector<256x32xf32> -> vector<256x32xf32>
    %40 = arith.addf %34, %39 : vector<256x32xf32>
    %c1_49 = arith.constant 1 : index
    %c0_50 = arith.constant 0 : index
    %c0_51 = arith.constant 0 : index
    %41 = vector.load %arg12[%c1_49, %c0_50, %c0_51] : memref<18x18x32xbf16, #tpu.memory_space<vmem>>, vector<16x16x32xbf16>
    %42 = vector.shape_cast %41 : vector<16x16x32xbf16> to vector<256x32xbf16>
    %c1_52 = arith.constant 1 : index
    %c0_53 = arith.constant 0 : index
    %c0_54 = arith.constant 0 : index
    %c0_55 = arith.constant 0 : index
    %43 = vector.load %arg5[%c1_52, %c0_53, %c0_54, %c0_55] : memref<3x3x32x32xbf16, #tpu.memory_space<vmem>>, vector<1x1x32x32xbf16>
    %44 = vector.shape_cast %43 : vector<1x1x32x32xbf16> to vector<32x32xbf16>
    %cst_56 = arith.constant dense<0.000000e+00> : vector<256x32xf32>
    %45 = tpu.matmul %42, %44, %cst_56 {dimension_numbers = #tpu.dot_dimension_numbers<[1], [0], [0], [1], [0, 0, 1, 1], [], []>} : vector<256x32xbf16>, vector<32x32xbf16>, vector<256x32xf32> -> vector<256x32xf32>
    %46 = arith.addf %40, %45 : vector<256x32xf32>
    %c1_57 = arith.constant 1 : index
    %c1_58 = arith.constant 1 : index
    %c0_59 = arith.constant 0 : index
    %47 = vector.load %arg12[%c1_57, %c1_58, %c0_59] : memref<18x18x32xbf16, #tpu.memory_space<vmem>>, vector<16x16x32xbf16>
    %48 = vector.shape_cast %47 : vector<16x16x32xbf16> to vector<256x32xbf16>
    %c1_60 = arith.constant 1 : index
    %c1_61 = arith.constant 1 : index
    %c0_62 = arith.constant 0 : index
    %c0_63 = arith.constant 0 : index
    %49 = vector.load %arg5[%c1_60, %c1_61, %c0_62, %c0_63] : memref<3x3x32x32xbf16, #tpu.memory_space<vmem>>, vector<1x1x32x32xbf16>
    %50 = vector.shape_cast %49 : vector<1x1x32x32xbf16> to vector<32x32xbf16>
    %cst_64 = arith.constant dense<0.000000e+00> : vector<256x32xf32>
    %51 = tpu.matmul %48, %50, %cst_64 {dimension_numbers = #tpu.dot_dimension_numbers<[1], [0], [0], [1], [0, 0, 1, 1], [], []>} : vector<256x32xbf16>, vector<32x32xbf16>, vector<256x32xf32> -> vector<256x32xf32>
    %52 = arith.addf %46, %51 : vector<256x32xf32>
    %c1_65 = arith.constant 1 : index
    %c2_66 = arith.constant 2 : index
    %c0_67 = arith.constant 0 : index
    %53 = vector.load %arg12[%c1_65, %c2_66, %c0_67] : memref<18x18x32xbf16, #tpu.memory_space<vmem>>, vector<16x16x32xbf16>
    %54 = vector.shape_cast %53 : vector<16x16x32xbf16> to vector<256x32xbf16>
    %c1_68 = arith.constant 1 : index
    %c2_69 = arith.constant 2 : index
    %c0_70 = arith.constant 0 : index
    %c0_71 = arith.constant 0 : index
    %55 = vector.load %arg5[%c1_68, %c2_69, %c0_70, %c0_71] : memref<3x3x32x32xbf16, #tpu.memory_space<vmem>>, vector<1x1x32x32xbf16>
    %56 = vector.shape_cast %55 : vector<1x1x32x32xbf16> to vector<32x32xbf16>
    %cst_72 = arith.constant dense<0.000000e+00> : vector<256x32xf32>
    %57 = tpu.matmul %54, %56, %cst_72 {dimension_numbers = #tpu.dot_dimension_numbers<[1], [0], [0], [1], [0, 0, 1, 1], [], []>} : vector<256x32xbf16>, vector<32x32xbf16>, vector<256x32xf32> -> vector<256x32xf32>
    %58 = arith.addf %52, %57 : vector<256x32xf32>
    %c2_73 = arith.constant 2 : index
    %c0_74 = arith.constant 0 : index
    %c0_75 = arith.constant 0 : index
    %59 = vector.load %arg12[%c2_73, %c0_74, %c0_75] : memref<18x18x32xbf16, #tpu.memory_space<vmem>>, vector<16x16x32xbf16>
    %60 = vector.shape_cast %59 : vector<16x16x32xbf16> to vector<256x32xbf16>
    %c2_76 = arith.constant 2 : index
    %c0_77 = arith.constant 0 : index
    %c0_78 = arith.constant 0 : index
    %c0_79 = arith.constant 0 : index
    %61 = vector.load %arg5[%c2_76, %c0_77, %c0_78, %c0_79] : memref<3x3x32x32xbf16, #tpu.memory_space<vmem>>, vector<1x1x32x32xbf16>
    %62 = vector.shape_cast %61 : vector<1x1x32x32xbf16> to vector<32x32xbf16>
    %cst_80 = arith.constant dense<0.000000e+00> : vector<256x32xf32>
    %63 = tpu.matmul %60, %62, %cst_80 {dimension_numbers = #tpu.dot_dimension_numbers<[1], [0], [0], [1], [0, 0, 1, 1], [], []>} : vector<256x32xbf16>, vector<32x32xbf16>, vector<256x32xf32> -> vector<256x32xf32>
    %64 = arith.addf %58, %63 : vector<256x32xf32>
    %c2_81 = arith.constant 2 : index
    %c1_82 = arith.constant 1 : index
    %c0_83 = arith.constant 0 : index
    %65 = vector.load %arg12[%c2_81, %c1_82, %c0_83] : memref<18x18x32xbf16, #tpu.memory_space<vmem>>, vector<16x16x32xbf16>
    %66 = vector.shape_cast %65 : vector<16x16x32xbf16> to vector<256x32xbf16>
    %c2_84 = arith.constant 2 : index
    %c1_85 = arith.constant 1 : index
    %c0_86 = arith.constant 0 : index
    %c0_87 = arith.constant 0 : index
    %67 = vector.load %arg5[%c2_84, %c1_85, %c0_86, %c0_87] : memref<3x3x32x32xbf16, #tpu.memory_space<vmem>>, vector<1x1x32x32xbf16>
    %68 = vector.shape_cast %67 : vector<1x1x32x32xbf16> to vector<32x32xbf16>
    %cst_88 = arith.constant dense<0.000000e+00> : vector<256x32xf32>
    %69 = tpu.matmul %66, %68, %cst_88 {dimension_numbers = #tpu.dot_dimension_numbers<[1], [0], [0], [1], [0, 0, 1, 1], [], []>} : vector<256x32xbf16>, vector<32x32xbf16>, vector<256x32xf32> -> vector<256x32xf32>
    %70 = arith.addf %64, %69 : vector<256x32xf32>
    %c2_89 = arith.constant 2 : index
    %c2_90 = arith.constant 2 : index
    %c0_91 = arith.constant 0 : index
    %71 = vector.load %arg12[%c2_89, %c2_90, %c0_91] : memref<18x18x32xbf16, #tpu.memory_space<vmem>>, vector<16x16x32xbf16>
    %72 = vector.shape_cast %71 : vector<16x16x32xbf16> to vector<256x32xbf16>
    %c2_92 = arith.constant 2 : index
    %c2_93 = arith.constant 2 : index
    %c0_94 = arith.constant 0 : index
    %c0_95 = arith.constant 0 : index
    %73 = vector.load %arg5[%c2_92, %c2_93, %c0_94, %c0_95] : memref<3x3x32x32xbf16, #tpu.memory_space<vmem>>, vector<1x1x32x32xbf16>
    %74 = vector.shape_cast %73 : vector<1x1x32x32xbf16> to vector<32x32xbf16>
    %cst_96 = arith.constant dense<0.000000e+00> : vector<256x32xf32>
    %75 = tpu.matmul %72, %74, %cst_96 {dimension_numbers = #tpu.dot_dimension_numbers<[1], [0], [0], [1], [0, 0, 1, 1], [], []>} : vector<256x32xbf16>, vector<32x32xbf16>, vector<256x32xf32> -> vector<256x32xf32>
    %76 = arith.addf %70, %75 : vector<256x32xf32>
    %c0_97 = arith.constant 0 : index
    %c0_98 = arith.constant 0 : index
    %77 = vector.load %arg6[%c0_97, %c0_98] : memref<1x32xf32, #tpu.memory_space<vmem>>, vector<1x32xf32>
    %78 = vector.broadcast %77 : vector<1x32xf32> to vector<256x32xf32>
    %79 = arith.mulf %76, %78 : vector<256x32xf32>
    %c0_99 = arith.constant 0 : index
    %c0_100 = arith.constant 0 : index
    %80 = vector.load %arg7[%c0_99, %c0_100] : memref<1x32xf32, #tpu.memory_space<vmem>>, vector<1x32xf32>
    %81 = vector.broadcast %80 : vector<1x32xf32> to vector<256x32xf32>
    %82 = arith.addf %79, %81 : vector<256x32xf32>
    %cst_101 = arith.constant 0.000000e+00 : f32
    %83 = vector.broadcast %cst_101 : f32 to vector<256x32xf32>
    %84 = arith.maximumf %82, %83 : vector<256x32xf32>
    %85 = arith.truncf %84 : vector<256x32xf32> to vector<256x32xbf16>
    %c0_102 = arith.constant 0 : index
    %c0_103 = arith.constant 0 : index
    %86 = vector.load %arg8[%c0_102, %c0_103] : memref<32x128xbf16, #tpu.memory_space<vmem>>, vector<32x128xbf16>
    %cst_104 = arith.constant dense<0.000000e+00> : vector<256x128xf32>
    %87 = tpu.matmul %85, %86, %cst_104 {dimension_numbers = #tpu.dot_dimension_numbers<[1], [0], [0], [1], [0, 0, 1, 1], [], []>} : vector<256x32xbf16>, vector<32x128xbf16>, vector<256x128xf32> -> vector<256x128xf32>
    %c0_105 = arith.constant 0 : index
    %c0_106 = arith.constant 0 : index
    %88 = vector.load %arg9[%c0_105, %c0_106] : memref<1x128xf32, #tpu.memory_space<vmem>>, vector<1x128xf32>
    %89 = vector.broadcast %88 : vector<1x128xf32> to vector<256x128xf32>
    %90 = arith.mulf %87, %89 : vector<256x128xf32>
    %c0_107 = arith.constant 0 : index
    %c0_108 = arith.constant 0 : index
    %91 = vector.load %arg10[%c0_107, %c0_108] : memref<1x128xf32, #tpu.memory_space<vmem>>, vector<1x128xf32>
    %92 = vector.broadcast %91 : vector<1x128xf32> to vector<256x128xf32>
    %93 = arith.addf %90, %92 : vector<256x128xf32>
    %c0_109 = arith.constant 0 : index
    %c0_110 = arith.constant 0 : index
    %c0_111 = arith.constant 0 : index
    %c0_112 = arith.constant 0 : index
    %94 = vector.load %arg1[%c0_109, %c0_110, %c0_111, %c0_112] : memref<1x16x16x128xbf16, #tpu.memory_space<vmem>>, vector<1x16x16x128xbf16>
    %95 = vector.shape_cast %94 : vector<1x16x16x128xbf16> to vector<256x128xbf16>
    %96 = arith.extf %95 : vector<256x128xbf16> to vector<256x128xf32>
    %97 = arith.addf %93, %96 : vector<256x128xf32>
    %cst_113 = arith.constant 0.000000e+00 : f32
    %98 = vector.broadcast %cst_113 : f32 to vector<256x128xf32>
    %99 = arith.maximumf %97, %98 : vector<256x128xf32>
    %100 = vector.shape_cast %99 : vector<256x128xf32> to vector<1x16x16x128xf32>
    %101 = arith.truncf %100 : vector<1x16x16x128xf32> to vector<1x16x16x128xbf16>
    %c0_114 = arith.constant 0 : index
    %c0_115 = arith.constant 0 : index
    %c0_116 = arith.constant 0 : index
    %c0_117 = arith.constant 0 : index
    %102 = vector.load %arg11[%c0_114, %c0_115, %c0_116, %c0_117] : memref<1x16x16x128xbf16, #tpu.memory_space<vmem>>, vector<1x16x16x128xbf16>
    tpu.vector_store %arg11[%c0_114, %c0_115, %c0_116, %c0_117], %101 {strides = array<i32>} : memref<1x16x16x128xbf16, #tpu.memory_space<vmem>>, vector<1x16x16x128xbf16>,
    return
  }
  func.func @transform_0(%arg0: i32) -> (i32, i32, i32, i32) {
    %c0_i32 = arith.constant 0 : i32
    %c0_i32_0 = arith.constant 0 : i32
    %c0_i32_1 = arith.constant 0 : i32
    %c0_i32_2 = arith.constant 0 : i32
    return %arg0, %c0_i32, %c0_i32_0, %c0_i32_1 : i32, i32, i32, i32
  }
  func.func @transform_1(%arg0: i32) -> (i32, i32) {
    %c0_i32 = arith.constant 0 : i32
    %c0_i32_0 = arith.constant 0 : i32
    %c0_i32_1 = arith.constant 0 : i32
    return %c0_i32, %c0_i32_0 : i32, i32
  }
  func.func @transform_2(%arg0: i32) -> (i32, i32) {
    %c0_i32 = arith.constant 0 : i32
    %c0_i32_0 = arith.constant 0 : i32
    %c0_i32_1 = arith.constant 0 : i32
    return %c0_i32, %c0_i32_0 : i32, i32
  }
  func.func @transform_3(%arg0: i32) -> (i32, i32) {
    %c0_i32 = arith.constant 0 : i32
    %c0_i32_0 = arith.constant 0 : i32
    %c0_i32_1 = arith.constant 0 : i32
    return %c0_i32, %c0_i32_0 : i32, i32
  }
  func.func @transform_4(%arg0: i32) -> (i32, i32, i32, i32) {
    %c0_i32 = arith.constant 0 : i32
    %c0_i32_0 = arith.constant 0 : i32
    %c0_i32_1 = arith.constant 0 : i32
    %c0_i32_2 = arith.constant 0 : i32
    %c0_i32_3 = arith.constant 0 : i32
    return %c0_i32, %c0_i32_0, %c0_i32_1, %c0_i32_2 : i32, i32, i32, i32
  }
  func.func @transform_5(%arg0: i32) -> (i32, i32) {
    %c0_i32 = arith.constant 0 : i32
    %c0_i32_0 = arith.constant 0 : i32
    %c0_i32_1 = arith.constant 0 : i32
    return %c0_i32, %c0_i32_0 : i32, i32
  }
  func.func @transform_6(%arg0: i32) -> (i32, i32) {
    %c0_i32 = arith.constant 0 : i32
    %c0_i32_0 = arith.constant 0 : i32
    %c0_i32_1 = arith.constant 0 : i32
    return %c0_i32, %c0_i32_0 : i32, i32
  }
  func.func @transform_7(%arg0: i32) -> (i32, i32) {
    %c0_i32 = arith.constant 0 : i32
    %c0_i32_0 = arith.constant 0 : i32
    %c0_i32_1 = arith.constant 0 : i32
    return %c0_i32, %c0_i32_0 : i32, i32
  }
  func.func @transform_8(%arg0: i32) -> (i32, i32) {
    %c0_i32 = arith.constant 0 : i32
    %c0_i32_0 = arith.constant 0 : i32
    %c0_i32_1 = arith.constant 0 : i32
    return %c0_i32, %c0_i32_0 : i32, i32
  }
  func.func @transform_9(%arg0: i32) -> (i32, i32) {
    %c0_i32 = arith.constant 0 : i32
    %c0_i32_0 = arith.constant 0 : i32
    %c0_i32_1 = arith.constant 0 : i32
    return %c0_i32, %c0_i32_0 : i32, i32
  }
  func.func @transform_10(%arg0: i32) -> (i32, i32, i32, i32) {
    %c0_i32 = arith.constant 0 : i32
    %c0_i32_0 = arith.constant 0 : i32
    %c0_i32_1 = arith.constant 0 : i32
    %c0_i32_2 = arith.constant 0 : i32
    return %arg0, %c0_i32, %c0_i32_0, %c0_i32_1 : i32, i32, i32, i32
  }
}

</mosaic_0001>

<bundles_post_ra>
// kernel: tpu_custom_call.1
= control target key start
LH: loop header
LB: loop body
LE: loop exit
PB: predicated region body
PF: predicated region fallthrough
CT: control target
= control target key end

     0   :  { %s9010_s0 = inlined_call_operand.hbm [shape: bf16[2,16,16,128], index: 0, kind: input, shape index: {}]   ;;  %s9011_s1 = inlined_call_operand.vmem [shape: bf16[128,32], index: 1, kind: input, shape index: {}]   ;;  %s9012_s2 = inlined_call_operand.vmem [shape: f32[1,32], index: 2, kind: input, shape index: {}]   ;;  %s9013_s3 = inlined_call_operand.vmem [shape: f32[1,32], index: 3, kind: input, shape index: {}]   ;;  %s9014_s4 = inlined_call_operand.hbm [shape: bf16[3,3,32,32], index: 4, kind: input, shape index: {}]   ;;  %s9015_s5 = inlined_call_operand.vmem [shape: f32[1,32], index: 5, kind: input, shape index: {}]   ;;  %s9016_s6 = inlined_call_operand.vmem [shape: f32[1,32], index: 6, kind: input, shape index: {}]   ;;  %s9017_s7 = inlined_call_operand.vmem [shape: bf16[32,128], index: 7, kind: input, shape index: {}]   ;;  %s9018_s8 = inlined_call_operand.vmem [shape: f32[1,128], index: 8, kind: input, shape index: {}]   ;;  %s9019_s9 = inlined_call_operand.vmem [shape: f32[1,128], index: 9, kind: input, shape index: {}]   ;;  %s9020_s10 = inlined_call_operand.hbm [shape: bf16[2,16,16,128], index: 10, kind: output, shape index: {}]  }
   0x1   :  { %9026 = sst [smem:[#allocation34_spill]] %s9014_s4 }
   0x2   :  { %15 = vsyncpa [#allocation4], 0 }
   0x3   :  { %17 = vsyncpa [#allocation4 + $0x1], 0 }
   0x4   :  { %18 = vsyncpa [#allocation7], 0 }
   0x5   :  { %19 = vsyncpa [#allocation5], 0 }
   0x6   :  { %21 = vsyncpa [#allocation5 + $0x1], 0  ;;  %s7160_s13 = smov 0   ;;  %s7162_s14 = smov 0  }
   0x7   :  { %s7164_s15 = smov 0   ;;  %s7166_s16 = smov 0  }
   0x8 LB: > { %9027 = sst [smem:[#allocation12_spill]] %s7093_s15  ;;  %s7181_s17 = sadd.s32 4294967295, %s7097_s16   ;;  %s7097_s16 = sphi %s7166_s16, %s9094_s16   ;;  %s7093_s15 = sphi %s7164_s15, %s9091_s15   ;;  %s7089_s14 = sphi %s7162_s14, %s9093_s14   ;;  %s7085_s13 = sphi %s7160_s13, %s9092_s13  }
   0x9   : > { %s6027_s18 = sadd.s32 4294967294, %s7097_s16   ;;  %p47_p0 = scmp.ne.s32.totalorder %s7089_s14, %s7085_s13 }
   0xa   : > { %p48_p1 = scmp.eq.s32.totalorder %s7181_s17, 0  ;;  %p260_p2 = scmp.eq.s32.totalorder %s7181_s17, 1 }
   0xb   : > { %p266_p3 = scmp.eq.s32.totalorder %s6027_s18, 1  ;;  %p6028_p5 = scmp.ge.s32.totalorder %s7097_s16, 1 }
   0xc   : > { %p7190_p4 = por %p48_p1, %p47_p0  ;;  %p273_p7 = scmp.lt.s32.totalorder %s7097_s16, 3 }
   0xd   : > { %p7195_p6 = por %p266_p3, %p47_p0  ;;  %s9031_s4 = sld [smem:[#allocation34_spill]] }
   0xe   : > { %p7203_p8 = pnand %p6028_p5, %p273_p7  ;;  %s7099_s25 = smov [#allocation6]  }
   0xf   : > { %s9029_s20 = scalar_select %p7195_p6, 1, 0 }
  0x10   : > { %p6901_p9 = pneg %p7203_p8  ;;  %s295_s26 = sshll.u32 %s7099_s25, 4  ;;  %s296_s26 = int_to_ptr.vmem [resolvable:$true] %s295_s26 }
  0x11   : > { %9030 = sst [smem:[#allocation13_spill]] %s9029_s20  ;;  %s7213_s27 = sadd.s32 1, %s7097_s16  }
  0x12   : > { %p6902_p10 = pnand %p6901_p9, %p48_p1  ;;  %s9022_s28 = smov 64  }
  0x13   : > { %s293_s23 = sshll.u32 %s9031_s4, 4  ;;  %s9023_s29 = smov 4   ;;  %s294_s23 = int_to_ptr.hbm [resolvable:$true] %s293_s23 }
  0x14   : > { %6904 = dma.hbm_to_vmem [thread:$0]  (!%p6902_p10), %s294_s23, 2304, %s296_s26, [#allocation7], %s9022_s28, %s9022_s28, %s9023_s29  }
  0x15   : > { %s31_s30 = ssub.s32 %s7097_s16, %s7213_s27  ;;  %s34_s11 = sadd.s32 1, %s7093_s15 }
  0x16   : > { %p32_p12 = scmp.eq.s32.totalorder %s31_s30, 0  ;;  %p41_p13 = scmp.ne.s32.totalorder %s7093_s15, %s7089_s14 }
  0x17   : > { %p42_p0 = scmp.eq.s32.totalorder %s7097_s16, 0  ;;  %p6914_p5 = scmp.lt.s32.totalorder %s7097_s16, 2 }
  0x18   : > { %s7225_s12 = scalar_select %p32_p12, %s7093_s15, %s34_s11  }
  0x19   : > { %p7229_p3 = por %p260_p2, %p41_p13  ;;  %s324_s21 = sand.u32 1, %s7093_s15  }
  0x1a   : > { %9033 = sst [smem:[#allocation14_spill]] %s7225_s12  ;;  %s6619_s22 = sshll.u32 %s7097_s16, 7 }
  0x1b   : > { %p43_p7 = por %p42_p0, %p41_p13  ;;  %s6031_s25 = sshll.u32 %s324_s21, 7 }
  0x1c   : > { %s333_s23 = scalar_lea.hbm %s9010_s0, %s6619_s22  ;;  %s328_s30 = scalar_lea.vmem [#allocation3], %s6031_s25 }
  0x1d   : > { %s334_s26 = sshll.u32 %s333_s23, 4  ;;  %s336_s28 = sshll.u32 %s328_s30, 4  ;;  %s335_s26 = int_to_ptr.hbm [resolvable:$true] %s334_s26  ;;  %s337_s28 = int_to_ptr.vmem [resolvable:$true] %s336_s28 }
  0x1e   : > { %p7239_p9 = pnand %p6914_p5, %p43_p7  ;;  %s325_s29 = scalar_lea.sflag [#allocation4], %s324_s21 }
  0x1f   : > { %s6997_s12 = sshra.s32 %s335_s26, 4  ;;  %s7004_s22 = scalar_lea.hbm %s9010_s0, 256  ;;  %s6998_s12 = int_to_ptr.hbm [resolvable:$true] %s6997_s12 }
  0x20   : > { %s6999_s15 = scalar_lea.hbm %s6998_s12, 128  ;;  %p7001_p10 = pneg %p7239_p9 }
  0x21   : > { %p7000_p2 = scmp.ne.s32.totalorder %s6998_s12, %s6999_s15  ;;  %p7005_p0 = scmp.lt.s32.totalorder %s6998_s12, %s9010_s0 }
  0x22   : > { %p7006_p5 = scmp.lt.s32.totalorder %s7004_s22, %s6999_s15 }
  0x23   : > { %p7002_p12 = pnand %p7001_p10, %p7000_p2 }
  0x24   : > { %p7007_p7 = por %p7006_p5, %p7005_p0 }
  0x25   : > { %p7003_p13 = pneg %p7002_p12 }
  0x27   : > { %p7008_p11 = pnand %p7007_p7, %p7003_p13 }
  0x29   : > { %7011 = shalt.err (!%p7008_p11)
}
  0x2a   : > { %s9036_s21 = smov 4   ;;  %s9037_s30 = smov 64  }
  0x2b   : > { %6908 = dma.hbm_to_vmem [thread:$0]  (!%p7239_p9), %s335_s26, 2048, %s337_s28, %s325_s29, %s9037_s30, %s9037_s30, %s9036_s21  }
  0x2c   : > { %348 = sbr.rel (%p7203_p8) target bundleno = 1296 (0x510), region = 60 }
  0x31   : > { %s7259_s4 = sand.u32 1, %s7089_s14  }
  0x32   : > { %s6035_s15 = sshll.u32 %s7259_s4, 7  ;;  %s351_s12 = scalar_lea.sflag [#allocation4], %s7259_s4 }
  0x33   : > { %s7265_s20 = scalar_lea.vmem [#allocation3], %s6035_s15 }
  0x34   : > { %7072 = dma.done.wait (%p7190_p4), %s351_s12, 2048  }
  0x35   : > { %7074 = vsyncadd (%p7190_p4), %s351_s12, 4294965248 }
  0x36   : > { %7076 = dma.done.wait (%p48_p1), [#allocation7], 2304  }
  0x37   : > { %7078 = vsyncadd (%p48_p1), [#allocation7], 4294964992  ;;  %v6643_v0 = vld [vmem:[%s9011_s1 + $0x38] sm:$0xff]  ;;  %v6642_v1 = vld [vmem:[%s9011_s1 + $0x30] sm:$0xff]  ;;  %vm818_vm0 = vcmask 253952   ;;  %v9040_v18 = vmov 0 }
  0x38   : > { %590 = vmatpush.bf16.msra.mxu0 %v6643_v0  ;;  %v6641_v2 = vld [vmem:[%s9011_s1 + $0x28] sm:$0xff]  ;;  %v6640_v3 = vld [vmem:[%s9011_s1 + $0x20] sm:$0xff]  ;;  %v6639_v4 = vld [vmem:[%s9011_s1 + $0x18] sm:$0xff]  ;;  %vm825_vm1 = vsmask.f32 256  ;;  %vm815_vm5 = vcmask 257024  }
  0x39   : > { %v6638_v5 = vld [vmem:[%s9011_s1 + $0x10] sm:$0xff]  ;;  %v6637_v6 = vld [vmem:[%s9011_s1 + $0x8] sm:$0xff]  ;;  %v6636_v7 = vld [vmem:[%s9011_s1] sm:$0xff]  ;;  %vm881_vm3 = vsmask.f32 7938  ;;  %vm2293_vm9 = vcmask 1042432  }
  0x3a   : > { %v6620_v8 = vld [vmem:[%s7265_s20] sm:$0xff]  ;;  %v6621_v9 = vld [vmem:[%s7265_s20 + $0x8] sm:$0xff]  ;;  %v6622_v10 = vld [vmem:[%s7265_s20 + $0x10] sm:$0xff]  ;;  %vm937_vm7 = vsmask.f32 4368  ;;  %vm2294_vm10 = vcmask 1046532  }
  0x3b   : > { %v6623_v11 = vld [vmem:[%s7265_s20 + $0x18] sm:$0xff]  ;;  %v6624_v12 = vld [vmem:[%s7265_s20 + $0x20] sm:$0xff]  ;;  %v6625_v13 = vld [vmem:[%s7265_s20 + $0x28] sm:$0xff]  ;;  %vm1878_vm12 = vcmask 261120   ;;  %vm1426_vm13 = vsmask.f32 3328 }
  0x3c   : > { %591 = vmatpush.bf16.msra.mxu0 %v6642_v1  ;;  %v6626_v14 = vld [vmem:[%s7265_s20 + $0x30] sm:$0xff]  ;;  %vm7308_vm2 = vmand %vm818_vm0, %vm825_vm1  ;;  %v886_v19 = vld [vmem:[#allocation2 + $0x14] sm:$0x1]  ;;  %vm1427_vm14 = vsmask.f32 7440  ;;  %s8829_s19 = scalar_lea.vmem [#allocation8], %s6035_s15 }
  0x3d   : > { %v830_v16 = vld [vmem:[#allocation2 + $0xc] sm:$0x1]  ;;  %vm7316_vm4 = vmand %vm818_vm0, %vm881_vm3  ;;  %v6627_v21 = vld [vmem:[%s7265_s20 + $0x38] sm:$0xff]  ;;  %s6712_s23 = sshll.u32 %s7181_s17, 7  ;;  %s5929_s17 = scalar_lea.sflag [#allocation5], %s7259_s4 }
  0x3e   : > { %v831_v17 = vsel %vm7308_vm2, 0, %v830_v16  ;;  %v9041_v18 = vsel %vm7316_vm4, 4294967295, %v9040_v18  ;;  %v887_v20 = vsel %vm7316_vm4, 0, %v886_v19  ;;  %v833_v22 = vld [vmem:[#allocation2 + $0x18] sm:$0x1]  ;;  %vm7346_vm6 = vmand %vm815_vm5, %vm881_vm3  ;;  %v6629_v49 = vld [vmem:[%s7265_s20 + $0x48] sm:$0xff]  ;;  %s5940_s12 = scalar_lea.hbm %s9020_s10, %s6712_s23 }
  0x3f   : > { %832 = vst [vmem:[#allocation2 + $0xc] sm:$0x1] %v831_v17  ;;  %v834_v23 = vsel %vm7308_vm2, 0, %v833_v22  ;;  %v7328_v24 = vld [vmem:[%s9012_s2] ss:$0 sm:$0xff]  ;;  %v6628_v27 = vld [vmem:[%s7265_s20 + $0x40] sm:$0xff]  ;;  %vm7358_vm8 = vmor %vm825_vm1, %vm937_vm7 }
  0x40   : > { %592 = vmatpush.bf16.msra.mxu0 %v6641_v2  ;;  %9042 = vst [vmem:[#allocation15_spill] sm:$0xff] %v9041_v18  ;;  %v889_v25 = vld [vmem:[#allocation2 + $0x20] sm:$0x1]  ;;  %v836_v33 = vld [vmem:[#allocation2 + $0x24] sm:$0x1]  ;;  %vm7388_vm11 = vmor %vm2293_vm9, %vm2294_vm10  ;;  %s5943_s24 = sshll.u32 %s5940_s12, 4  ;;  %s5944_s24 = int_to_ptr.hbm [resolvable:$true] %s5943_s24 }
  0x41   : > { %888 = vst [vmem:[#allocation2 + $0x14] sm:$0x1] %v887_v20  ;;  %v7333_v26 = vld [vmem:[%s9013_s3] ss:$0 sm:$0xff]  ;;  %v890_v28 = vsel %vm7316_vm4, 0, %v889_v25  ;;  %v837_v35 = vsel %vm7308_vm2, 0, %v836_v33  ;;  %vm7465_vm15 = vmor %vm1426_vm13, %vm1427_vm14 }
  0x42   : > { %835 = vst [vmem:[#allocation2 + $0x18] sm:$0x1] %v834_v23  ;;  %v892_v46 = vld [vmem:[#allocation2 + $0x2c] sm:$0x1]  ;;  %v839_v63 = vld [vmem:[#allocation2 + $0x30] sm:$0x1] }
  0x43   : > { %891 = vst [vmem:[#allocation2 + $0x20] sm:$0x1] %v890_v28  ;;  %v893_v50 = vsel %vm7316_vm4, 0, %v892_v46  ;;  %v895_v16 = vld [vmem:[#allocation2 + $0x38] sm:$0x1]  ;;  %v6630_v20 = vld [vmem:[%s7265_s20 + $0x50] sm:$0xff] }
  0x44   : > { %593 = vmatpush.bf16.msra.mxu0 %v6640_v3  ;;  %838 = vst [vmem:[#allocation2 + $0x24] sm:$0x1] %v837_v35  ;;  %v840_v3 = vsel %vm7308_vm2, 0, %v839_v63  ;;  %s7041_s28 = sshra.s32 %s5944_s24, 4  ;;  %s7047_s11 = scalar_lea.hbm %s9020_s10, 256  ;;  %s7042_s28 = int_to_ptr.hbm [resolvable:$true] %s7041_s28 }
  0x45   : > { %894 = vst [vmem:[#allocation2 + $0x2c] sm:$0x1] %v893_v50  ;;  %s7043_s29 = scalar_lea.hbm %s7042_s28, 128  ;;  %p7048_p11 = scmp.lt.s32.totalorder %s7042_s28, %s9020_s10 }
  0x46   : > { %v1262_v43 = vld [vmem:[#allocation2 + $0xc] sm:$0xf]  ;;  %841 = vst [vmem:[#allocation2 + $0x30] sm:$0x1] %v840_v3  ;;  %p7044_p1 = scmp.ne.s32.totalorder %s7042_s28, %s7043_s29  ;;  %p7049_p9 = scmp.lt.s32.totalorder %s7047_s11, %s7043_s29 }
  0x48   : > { %594 = vmatpush.bf16.msra.mxu0 %v6639_v4  ;;  %v1266_v58 = vld [vmem:[#allocation2 + $0x14] sm:$0x1]  ;;  %p7045_p4 = pnand %p7044_p1, %p7229_p3  ;;  %p7050_p2 = por %p7049_p9, %p7048_p11 }
  0x4a   : > { %p7046_p8 = pneg %p7045_p4 }
  0x4c   : > { %595 = vmatpush.bf16.msra.mxu0 %v6638_v5  ;;  %p7051_p10 = pnand %p7050_p2, %p7046_p8 }
  0x50   : > { %596 = vmatpush.bf16.msra.mxu0 %v6637_v6 }
  0x54   : > { %597 = vmatpush.bf16.msra.mxu0 %v6636_v7  ;;  %v7370_v7 = vld [vmem:[#allocation6 + $0x8] sm:$0xff] }
  0x55   : > { %6889 = vmatpush.bf16.msra.mxu2 %v7370_v7 }
  0x57   : > { %598 = vmatmul.bf16.vlgmr.msra.gmra.mxu0 %v6620_v8 }
  0x67   : > { %603 = vmatmul.bf16.gmra.mxu0 %v6621_v9 }
  0x77   : > { %608 = vmatmul.bf16.gmra.mxu0 %v6622_v10 }
  0x87   : > { %613 = vmatmul.bf16.gmra.mxu0 %v6623_v11  ;;  %v1269_v11 = vld [vmem:[#allocation2 + $0x18] sm:$0xf] }
  0x97   : > { %618 = vmatmul.bf16.gmra.mxu0 %v6624_v12 }
  0xa7   : > { %623 = vmatmul.bf16.gmra.mxu0 %v6625_v13 }
  0xb7   : > { %628 = vmatmul.bf16.gmra.mxu0 %v6626_v14  ;;  %v7374_v14 = vld [vmem:[#allocation6] sm:$0xff] }
  0xb8   : > { %6890 = vmatpush.bf16.msra.mxu2 %v7374_v14 }
  0xc7   : > { %633 = vmatmul.bf16.gmra.mxu0 %v6627_v21  ;;  %v896_v21 = vsel %vm7316_vm4, 0, %v895_v16 }
  0xc8   : > { %897 = vst [vmem:[#allocation2 + $0x38] sm:$0x1] %v896_v21 }
  0xd4   : > { %v599_v29 = vpop.f32.mrf.mxu0 }
  0xd5   : > { %v683_v30 = vmul.f32 %v7328_v24, %v599_v29  ;;  %v7385_v29 = vld [vmem:[#allocation6 + $0x28] sm:$0xff] }
  0xd6   : > { %6891 = vmatpush.bf16.msra.mxu3 %v7385_v29 }
  0xd7   : > { %v719_v31 = vadd.f32 %v7333_v26, %v683_v30  ;;  %638 = vmatmul.bf16.gmra.mxu0 %v6628_v27 }
  0xd9   : > { %v751_v32 = vmax.f32 %v719_v31, 0.0 }
  0xdb   : > { %v783_v34 = vpack.c.bf16 %v751_v32, %v751_v32 }
  0xdc   : > { %v601_v36 = vpop.f32.mrf.mxu0 }
  0xdd   : > { %v940_v37 = vshrl.u32 %v783_v34, 16  ;;  %v684_v38 = vmul.f32 %v7328_v24, %v601_v36  ;;  %v943_v40 = vshll.u32 %v783_v34, 16  ;;  %v1273_v36 = vld [vmem:[#allocation2 + $0x20] sm:$0x1] }
  0xdf   : > { %v942_v39 = vrot.slane %v940_v37, 7  ;;  %v720_v41 = vadd.f32 %v7333_v26, %v684_v38 }
  0xe1   : > { %v945_v44 = vor.u32 %v943_v40, %v942_v39  ;;  %v752_v45 = vmax.f32 %v720_v41, 0.0  ;;  %v946_v59 = vrot.slane %v942_v39, 4 }
  0xe3   : > { %v1263_v47 = vsel %vm7346_vm6, %v945_v44, %v1262_v43  ;;  %v784_v48 = vpack.c.bf16 %v752_v45, %v752_v45  ;;  %v6663_v43 = vld [vmem:[#allocation6 + $0x18] sm:$0xff]  ;;  %v7396_v44 = vld [vmem:[#allocation6 + $0x20] sm:$0xff] }
  0xe4   : > { %1264 = vst [vmem:[#allocation2 + $0xc] sm:$0xf] %v1263_v47  ;;  %v604_v51 = vpop.f32.mrf.mxu0  ;;  %v842_v45 = vld [vmem:[#allocation2 + $0x3c] sm:$0x1]  ;;  %6887 = vmatpush.bf16.msra.mxu1 %v6663_v43  ;;  %1933 = vmatpush.bf16.msrb.mxu0 %v6663_v43 }
  0xe5   : > { %v948_v52 = vshrl.u32 %v784_v48, 16  ;;  %v685_v53 = vmul.f32 %v7328_v24, %v604_v51  ;;  %v951_v55 = vshll.u32 %v784_v48, 16  ;;  %6892 = vmatpush.bf16.msra.mxu3 %v7396_v44 }
  0xe7   : > { %v950_v54 = vrot.slane %v948_v52, 7  ;;  %v721_v56 = vadd.f32 %v7333_v26, %v685_v53  ;;  %643 = vmatmul.bf16.gmra.mxu0 %v6629_v49  ;;  %v843_v52 = vsel %vm7308_vm2, 0, %v842_v45 }
  0xe8   : > { %844 = vst [vmem:[#allocation2 + $0x3c] sm:$0x1] %v843_v52 }
  0xe9   : > { %v953_v60 = vor.u32 %v951_v55, %v950_v54  ;;  %v955_v61 = vrot.slane %v950_v54, 4  ;;  %v753_v62 = vmax.f32 %v721_v56, 0.0 }
  0xeb   : > { %v954_v0 = vsel %vm7358_vm8, %v946_v59, %v953_v60  ;;  %v1267_v1 = vsel %vm7308_vm2, %v955_v61, %v1266_v58  ;;  %v785_v2 = vpack.c.bf16 %v753_v62, %v753_v62  ;;  %v2246_v28 = vld [vmem:[#allocation2 + $0xc] sm:$0xe] }
  0xec   : > { %1265 = vst.msk [vmem:[#allocation2 + $0x10] sm:$0xf] %vm815_vm5, %v954_v0  ;;  %v606_v4 = vpop.f32.mrf.mxu0  ;;  %v6247_v37 = vrot.slane %v2246_v28, 9  ;;  %v6662_v58 = vld [vmem:[#allocation6 + $0x10] sm:$0xff]  ;;  %v1276_v0 = vld [vmem:[#allocation2 + $0x24] sm:$0xf] }
  0xed   : > { %1268 = vst [vmem:[#allocation2 + $0x14] sm:$0x1] %v1267_v1  ;;  %v957_v5 = vshrl.u32 %v785_v2, 16  ;;  %v686_v6 = vmul.f32 %v7328_v24, %v606_v4  ;;  %v960_v9 = vshll.u32 %v785_v2, 16  ;;  %6888 = vmatpush.bf16.msra.mxu1 %v6662_v58  ;;  %1934 = vmatpush.bf16.msrb.mxu0 %v6662_v58  ;;  %v898_v4 = vld [vmem:[#allocation2 + $0x44] sm:$0x1] }
  0xee   : > { %v845_v58 = vld [vmem:[#allocation2 + $0x48] sm:$0x1] }
  0xef   : > { %v959_v8 = vrot.slane %v957_v5, 7  ;;  %v722_v10 = vadd.f32 %v7333_v26, %v686_v6 }
  0xf1   : > { %v962_v12 = vor.u32 %v960_v9, %v959_v8  ;;  %v754_v13 = vmax.f32 %v722_v10, 0.0  ;;  %v963_v38 = vrot.slane %v959_v8, 4  ;;  %2162 = vmatpush.bf16.msra.mxu0 %v7370_v7  ;;  %v6631_v8 = vld [vmem:[%s7265_s20 + $0x58] sm:$0xff]  ;;  %v899_v9 = vsel %vm7316_vm4, 0, %v898_v4 }
  0xf2   : > { %900 = vst [vmem:[#allocation2 + $0x44] sm:$0x1] %v899_v9 }
  0xf3   : > { %v1270_v17 = vsel %vm7346_vm6, %v962_v12, %v1269_v11  ;;  %v786_v19 = vpack.c.bf16 %v754_v13, %v754_v13  ;;  %v7382_v23 = vld [vmem:[#allocation2 + $0x10] sm:$0xf]  ;;  %v1376_v12 = vld [vmem:[#allocation2 + $0xc] sm:$0xf] }
  0xf4   : > { %1271 = vst [vmem:[#allocation2 + $0x18] sm:$0xf] %v1270_v17  ;;  %v609_v22 = vpop.f32.mrf.mxu0  ;;  %v7392_v34 = vld [vmem:[#allocation2 + $0x14] sm:$0x1]  ;;  %v2305_v35 = vrot.slane %v7382_v23, 5  ;;  %v1457_v28 = vshll.u32 %v1376_v12, 16 }
  0xf5   : > { %v965_v25 = vshrl.u32 %v786_v19, 16  ;;  %v687_v27 = vmul.f32 %v7328_v24, %v609_v22  ;;  %v968_v31 = vshll.u32 %v786_v19, 16  ;;  %v2308_v48 = vrot.slane %v7392_v34, 5  ;;  %2163 = vmatpush.bf16.msra.mxu0 %v7374_v14 }
  0xf6   : > { %v2306_v46 = vsel %vm7388_vm11, %v6247_v37, %v2305_v35  ;;  %v2307_v47 = vrot.slane %v2305_v35, 4 }
  0xf7   : > { %v967_v30 = vrot.slane %v965_v25, 7  ;;  %v723_v32 = vadd.f32 %v7333_v26, %v687_v27  ;;  %648 = vmatmul.bf16.gmra.mxu0 %v6630_v20  ;;  %v2415_v59 = vunpack.c.l.b16 %v2306_v46  ;;  %v1280_v25 = vld [vmem:[#allocation2 + $0x2c] sm:$0x1]  ;;  %v1454_v27 = vshrl.u32 %v1376_v12, 16 }
  0xf8   : > { %v2309_v54 = vsel %vm7388_vm11, %v2307_v47, %v2308_v48 }
  0xf9   : > { %v970_v39 = vor.u32 %v968_v31, %v967_v30  ;;  %v972_v40 = vrot.slane %v967_v30, 4  ;;  %v755_v41 = vmax.f32 %v723_v32, 0.0  ;;  %v2416_v60 = vunpack.c.l.b16 %v2309_v54 }
  0xfa   : > { %v7437_v47 = vrot.slane %v1454_v27, 4 }
  0xfb   : > { %v971_v49 = vsel %vm7358_vm8, %v963_v38, %v970_v39  ;;  %v1274_v50 = vsel %vm7308_vm2, %v972_v40, %v1273_v36  ;;  %v787_v51 = vpack.c.bf16 %v755_v41, %v755_v41  ;;  %v7414_v1 = vpack.c.b16 %v2416_v60, %v2415_v59  ;;  %v2247_v16 = vld [vmem:[#allocation2 + $0x18] sm:$0xe] }
  0xfc   : > { %1272 = vst.msk [vmem:[#allocation2 + $0x1c] sm:$0xf] %vm815_vm5, %v971_v49  ;;  %v611_v53 = vpop.f32.mrf.mxu0  ;;  %v6248_v30 = vrot.slane %v2247_v16, 9 }
  0xfd   : > { %1275 = vst [vmem:[#allocation2 + $0x20] sm:$0x1] %v1274_v50  ;;  %v974_v55 = vshrl.u32 %v787_v51, 16  ;;  %v688_v56 = vmul.f32 %v7328_v24, %v611_v53  ;;  %v977_v62 = vshll.u32 %v787_v51, 16  ;;  %v6685_v51 = vld [vmem:[#allocation6 + $0x48] sm:$0xff]  ;;  %v7442_v53 = vrot.slane %v1457_v28, 5 }
  0xfe   : > { %3491 = vmatpush.bf16.msrb.mxu2 %v6685_v51 }
  0xff   : > { %v976_v61 = vrot.slane %v974_v55, 7  ;;  %v724_v63 = vadd.f32 %v7333_v26, %v688_v56  ;;  %v6683_v56 = vld [vmem:[#allocation6 + $0x38] sm:$0xff]  ;;  %v1460_v27 = vor.u32 %v7442_v53, %v7437_v47 }
 0x100   : > { %2825 = vmatpush.bf16.msrb.mxu1 %v6683_v56 }
 0x101   : > { %v979_v2 = vor.u32 %v977_v62, %v976_v61  ;;  %v756_v3 = vmax.f32 %v724_v63, 0.0  ;;  %v980_v31 = vrot.slane %v976_v61, 4 }
 0x103   : > { %v1277_v5 = vsel %vm7346_vm6, %v979_v2, %v1276_v0  ;;  %v788_v6 = vpack.c.bf16 %v756_v3, %v756_v3  ;;  %v7421_v10 = vld [vmem:[#allocation2 + $0x1c] sm:$0xf]  ;;  %v846_v0 = vsel %vm7308_vm2, 0, %v845_v58  ;;  %v1283_v2 = vld [vmem:[#allocation2 + $0x30] sm:$0xf] }
 0x104   : > { %1278 = vst [vmem:[#allocation2 + $0x24] sm:$0xf] %v1277_v5  ;;  %v614_v11 = vpop.f32.mrf.mxu0  ;;  %v2312_v17 = vrot.slane %v7421_v10, 5  ;;  %v7427_v22 = vld [vmem:[#allocation2 + $0x20] sm:$0x1] }
 0x105   : > { %v982_v7 = vshrl.u32 %v788_v6, 16  ;;  %v689_v13 = vmul.f32 %v7328_v24, %v614_v11  ;;  %v985_v20 = vshll.u32 %v788_v6, 16  ;;  %v2315_v37 = vrot.slane %v7427_v22, 5  ;;  %847 = vst [vmem:[#allocation2 + $0x48] sm:$0x1] %v846_v0 }
 0x106   : > { %v2314_v36 = vrot.slane %v2312_v17, 4  ;;  %v2313_v43 = vsel %vm7388_vm11, %v6248_v30, %v2312_v17 }
 0x107   : > { %v984_v19 = vrot.slane %v982_v7, 7  ;;  %v725_v21 = vadd.f32 %v7333_v26, %v689_v13  ;;  %653 = vmatmul.bf16.gmra.mxu0 %v6631_v8  ;;  %v2417_v59 = vunpack.c.l.b16 %v2313_v43  ;;  %v6632_v13 = vld [vmem:[%s7265_s20 + $0x60] sm:$0xff] }
 0x108   : > { %v2316_v48 = vsel %vm7388_vm11, %v2314_v36, %v2315_v37 }
 0x109   : > { %v987_v14 = vor.u32 %v985_v20, %v984_v19  ;;  %v989_v32 = vrot.slane %v984_v19, 4  ;;  %v757_v35 = vmax.f32 %v725_v21, 0.0  ;;  %v2418_v60 = vunpack.c.l.b16 %v2316_v48 }
 0x10b   : > { %v988_v38 = vsel %vm7358_vm8, %v980_v31, %v987_v14  ;;  %v1281_v39 = vsel %vm7308_vm2, %v989_v32, %v1280_v25  ;;  %v789_v40 = vpack.c.bf16 %v757_v35, %v757_v35  ;;  %v1380_v41 = vld [vmem:[#allocation2 + $0x24] sm:$0xf]  ;;  %v7447_v4 = vpack.c.b16 %v2418_v60, %v2417_v59  ;;  %v901_v32 = vld [vmem:[#allocation2 + $0x50] sm:$0x1] }
 0x10c   : > { %1279 = vst.msk [vmem:[#allocation2 + $0x28] sm:$0xf] %vm815_vm5, %v988_v38  ;;  %v616_v45 = vpop.f32.mrf.mxu0  ;;  %v1502_v46 = vshrl.u32 %v1380_v41, 16  ;;  %v1505_v52 = vshll.u32 %v1380_v41, 16  ;;  %v2248_v3 = vld [vmem:[#allocation2 + $0x24] sm:$0xe] }
 0x10d   : > { %1282 = vst [vmem:[#allocation2 + $0x2c] sm:$0x1] %v1281_v39  ;;  %v991_v49 = vshrl.u32 %v789_v40, 16  ;;  %v690_v50 = vmul.f32 %v7328_v24, %v616_v45  ;;  %v994_v54 = vshll.u32 %v789_v40, 16  ;;  %v6249_v17 = vrot.slane %v2248_v3, 9 }
 0x10e   : > { %v1504_v55 = vrot.slane %v1502_v46, 4  ;;  %v1507_v63 = vrot.slane %v1505_v52, 5  ;;  %v1287_v45 = vld [vmem:[#allocation2 + $0x38] sm:$0x1]  ;;  %v1463_v60 = vshll.u32 %v7382_v23, 16 }
 0x10f   : > { %v993_v61 = vrot.slane %v991_v49, 7  ;;  %v726_v62 = vadd.f32 %v7333_v26, %v690_v50  ;;  %v902_v50 = vsel %vm7316_vm4, 0, %v901_v32  ;;  %v7102_v32 = vmov 0  }
 0x110   : > { %v1508_v8 = vor.u32 %v1507_v63, %v1504_v55  ;;  %903 = vst [vmem:[#allocation2 + $0x50] sm:$0x1] %v902_v50 }
 0x111   : > { %v996_v5 = vor.u32 %v994_v54, %v993_v61  ;;  %v758_v6 = vmax.f32 %v726_v62, 0.0  ;;  %v997_v9 = vrot.slane %v993_v61, 4  ;;  %v1467_v61 = vshrl.u32 %v7382_v23, 16  ;;  %816 = vst.msk [vmem:[#allocation2] sm:$0xf] %vm815_vm5, %v7102_v32 }
 0x112   : > { %v1509_v14 = vrot.slane %v1508_v8, 4  ;;  %817 = vst.msk [vmem:[#allocation2 + $0x4] sm:$0xf] %vm815_vm5, %v7102_v32 }
 0x113   : > { %v1284_v11 = vsel %vm7346_vm6, %v996_v5, %v1283_v2  ;;  %v790_v12 = vpack.c.bf16 %v758_v6, %v758_v6  ;;  %v6647_v7 = vld [vmem:[#allocation2 + $0x24] sm:$0xff]  ;;  %819 = vst.msk [vmem:[#allocation2 + $0x8] sm:$0x1] %vm818_vm0, %v7102_v32 }
 0x114   : > { %v1381_v16 = vld [vmem:[#allocation2 + $0x28] sm:$0xf]  ;;  %1285 = vst [vmem:[#allocation2 + $0x30] sm:$0xf] %v1284_v11  ;;  %v619_v19 = vpop.f32.mrf.mxu0  ;;  %v1413_v20 = vld [vmem:[#allocation2 + $0x2c] sm:$0x1]  ;;  %6233 = vmatmul.msk.bf16.vlgmr.msra.gmra.mxu2 %vm1878_vm12, %v6647_v7 }
 0x115   : > { %v2319_v21 = vrot.slane %v1381_v16, 5  ;;  %v1511_v25 = vshll.u32 %v1381_v16, 16  ;;  %v999_v28 = vshrl.u32 %v790_v12, 16  ;;  %v691_v30 = vmul.f32 %v7328_v24, %v619_v19  ;;  %821 = vst.msk [vmem:[#allocation2 + $0xcc] sm:$0xf] %vm815_vm5, %v7102_v32 }
 0x116   : > { %v2322_v31 = vrot.slane %v1413_v20, 5  ;;  %v1515_v38 = vshrl.u32 %v1381_v16, 16  ;;  %v1002_v40 = vshll.u32 %v790_v12, 16  ;;  %v1521_v49 = vshll.u32 %v1413_v20, 16  ;;  %v848_v16 = vld [vmem:[#allocation2 + $0x54] sm:$0x1] }
 0x117   : > { %v2320_v35 = vsel %vm7388_vm11, %v6249_v17, %v2319_v21  ;;  %v2321_v36 = vrot.slane %v2319_v21, 4  ;;  %v1513_v37 = vrot.slane %v1511_v25, 5  ;;  %v1001_v39 = vrot.slane %v999_v28, 7  ;;  %658 = vmatmul.bf16.gmra.mxu0 %v6632_v13  ;;  %822 = vst.msk [vmem:[#allocation2 + $0xd0] sm:$0xf] %vm815_vm5, %v7102_v32 }
 0x118   : > { %v727_v41 = vadd.f32 %v7333_v26, %v691_v30  ;;  %v2419_v43 = vunpack.c.l.b16 %v2320_v35  ;;  %v1517_v48 = vrot.slane %v1515_v38, 4  ;;  %v1523_v8 = vrot.slane %v1521_v49, 5  ;;  %823 = vst.msk [vmem:[#allocation2 + $0xd4] sm:$0x1] %vm818_vm0, %v7102_v32 }
 0x119   : > { %v2323_v46 = vsel %vm7388_vm11, %v2321_v36, %v2322_v31  ;;  %v1004_v51 = vor.u32 %v1002_v40, %v1001_v39  ;;  %v1006_v52 = vrot.slane %v1001_v39, 4  ;;  %v1514_v58 = vsel %vm7465_vm15, %v1509_v14, %v1513_v37  ;;  %v1290_v14 = vld [vmem:[#allocation2 + $0x3c] sm:$0xf] }
 0x11a   : > { %v759_v54 = vmax.f32 %v727_v41, 0.0  ;;  %v2420_v55 = vunpack.c.l.b16 %v2323_v46  ;;  %v1518_v59 = vor.u32 %v1517_v48, %v1513_v37  ;;  %v849_v21 = vsel %vm7308_vm2, 0, %v848_v16  ;;  %v6633_v41 = vld [vmem:[%s7265_s20 + $0x68] sm:$0xff] }
 0x11b   : > { %v1005_v62 = vsel %vm7358_vm8, %v997_v9, %v1004_v51  ;;  %v1288_v63 = vsel %vm7308_vm2, %v1006_v52, %v1287_v45  ;;  %v1382_v3 = vld [vmem:[#allocation2 + $0x30] sm:$0xf]  ;;  %v1824_v9 = vunpack.c.l.b16 %v1514_v58  ;;  %850 = vst [vmem:[#allocation2 + $0x54] sm:$0x1] %v849_v21  ;;  %v7488_v35 = vrot.slane %v1463_v60, 5 }
 0x11c   : > { %v791_v0 = vpack.c.bf16 %v759_v54, %v759_v54  ;;  %v2448_v2 = vpack.c.b16 %v2420_v55, %v2419_v43  ;;  %1286 = vst.msk [vmem:[#allocation2 + $0x34] sm:$0xf] %vm815_vm5, %v1005_v62  ;;  %v621_v5 = vpop.f32.mrf.mxu0  ;;  %v1519_v6 = vrot.slane %v1518_v59, 4  ;;  %v1526_v11 = vshrl.u32 %v1382_v3, 16  ;;  %v2249_v31 = vld [vmem:[#allocation2 + $0x30] sm:$0xe] }
 0x11d   : > { %v1529_v12 = vshll.u32 %v1382_v3, 16  ;;  %1289 = vst [vmem:[#allocation2 + $0x38] sm:$0x1] %v1288_v63  ;;  %v692_v23 = vmul.f32 %v7328_v24, %v621_v5  ;;  %v7490_v36 = vrot.slane %v1467_v61, 4  ;;  %v6250_v43 = vrot.slane %v2249_v31, 9 }
 0x11e   : > { %v1008_v7 = vshrl.u32 %v791_v0, 16  ;;  %v1011_v13 = vshll.u32 %v791_v0, 16  ;;  %6273 = vmatmul.msk.bf16.vlgmr.msra.gmra.mxu3 %vm1878_vm12, %v2448_v2  ;;  %v1524_v17 = vsel %vm7465_vm15, %v1519_v6, %v1523_v8  ;;  %v1528_v19 = vrot.slane %v1526_v11, 4  ;;  %v904_v61 = vld [vmem:[#allocation2 + $0x5c] sm:$0x1] }
 0x11f   : > { %v1531_v20 = vrot.slane %v1529_v12, 5  ;;  %v728_v28 = vadd.f32 %v7333_v26, %v692_v23  ;;  %v1825_v30 = vunpack.c.l.b16 %v1524_v17  ;;  %v7499_v45 = vrot.slane %v1460_v27, 4  ;;  %v1294_v62 = vld [vmem:[#allocation2 + $0x44] sm:$0x1]  ;;  %v827_v12 = vld [vmem:[#allocation2] sm:$0x1] }
 0x120   : > { %v7484_v25 = vrot.slane %v1008_v7, 7  ;;  %v1473_v46 = vshll.u32 %v7392_v34, 16  ;;  %v1470_v34 = vor.u32 %v7490_v36, %v7488_v35 }
 0x121   : > { %v760_v38 = vmax.f32 %v728_v28, 0.0  ;;  %v1853_v39 = vpack.c.b16 %v1825_v30, %v1824_v9  ;;  %v1532_v40 = vor.u32 %v1531_v20, %v1528_v19  ;;  %v905_v9 = vsel %vm7316_vm4, 0, %v904_v61 }
 0x122   : > { %v1013_v37 = vor.u32 %v1011_v13, %v7484_v25  ;;  %v1014_v48 = vrot.slane %v7484_v25, 4  ;;  %906 = vst [vmem:[#allocation2 + $0x5c] sm:$0x1] %v905_v9  ;;  %v828_v28 = vsel %vm7308_vm2, 0, %v827_v12  ;;  %v7524_v30 = vrot.slane %v1473_v46, 5 }
 0x123   : > { %v792_v50 = vpack.c.bf16 %v760_v38, %v760_v38  ;;  %6145 = vmatmul.msk.bf16.vlgmr.msra.gmra.mxu1 %vm1878_vm12, %v1853_v39  ;;  %v6648_v51 = vld [vmem:[#allocation2 + $0x30] sm:$0xff]  ;;  %v1533_v60 = vrot.slane %v1532_v40, 4  ;;  %829 = vst [vmem:[#allocation2] sm:$0x1] %v828_v28  ;;  %v883_v39 = vld [vmem:[#allocation2 + $0x8] sm:$0x1] }
 0x124   : > { %v1291_v49 = vsel %vm7346_vm6, %v1013_v37, %v1290_v14  ;;  %v1383_v52 = vld [vmem:[#allocation2 + $0x34] sm:$0xf]  ;;  %v624_v54 = vpop.f32.mrf.mxu0  ;;  %v1414_v55 = vld [vmem:[#allocation2 + $0x38] sm:$0x1]  ;;  %6234 = vmatmul.msk.bf16.gmra.mxu2 %vm1878_vm12, %v6648_v51 }
 0x125   : > { %1292 = vst [vmem:[#allocation2 + $0x3c] sm:$0xf] %v1291_v49  ;;  %v2326_v47 = vrot.slane %v1383_v52, 5  ;;  %v1535_v53 = vshll.u32 %v1383_v52, 16  ;;  %v1016_v27 = vshrl.u32 %v792_v50, 16  ;;  %v693_v58 = vmul.f32 %v7328_v24, %v624_v54 }
 0x126   : > { %v2329_v59 = vrot.slane %v1414_v55, 5  ;;  %v1539_v3 = vshrl.u32 %v1383_v52, 16  ;;  %v1019_v6 = vshll.u32 %v792_v50, 16  ;;  %v1545_v23 = vshll.u32 %v1414_v55, 16  ;;  %v851_v54 = vld [vmem:[#allocation2 + $0x60] sm:$0x1] }
 0x127   : > { %v2327_v63 = vsel %vm7388_vm11, %v6250_v43, %v2326_v47  ;;  %v2328_v0 = vrot.slane %v2326_v47, 4  ;;  %v1537_v2 = vrot.slane %v1535_v53, 5  ;;  %v1018_v5 = vrot.slane %v1016_v27, 7  ;;  %663 = vmatmul.bf16.gmra.mxu0 %v6633_v41  ;;  %v7533_v55 = vld [vmem:[#allocation2 + $0x18] sm:$0xf] }
 0x128   : > { %v729_v8 = vadd.f32 %v7333_v26, %v693_v58  ;;  %v2421_v11 = vunpack.c.l.b16 %v2327_v63  ;;  %v1541_v13 = vrot.slane %v1539_v3, 4  ;;  %v1547_v43 = vrot.slane %v1545_v23, 5 }
 0x129   : > { %v2330_v7 = vsel %vm7388_vm11, %v2328_v0, %v2329_v59  ;;  %v1021_v16 = vor.u32 %v1019_v6, %v1018_v5  ;;  %v1023_v17 = vrot.slane %v1018_v5, 4  ;;  %v1538_v21 = vsel %vm7465_vm15, %v1533_v60, %v1537_v2  ;;  %v7539_v59 = vld [vmem:[#allocation2 + $0x4] sm:$0xf] }
 0x12a   : > { %v761_v19 = vmax.f32 %v729_v8, 0.0  ;;  %v2422_v20 = vunpack.c.l.b16 %v2330_v7  ;;  %v1542_v25 = vor.u32 %v1541_v13, %v1537_v2  ;;  %v1826_v52 = vunpack.c.l.b16 %v1538_v21  ;;  %v1297_v2 = vld [vmem:[#allocation2 + $0x48] sm:$0xf] }
 0x12b   : > { %v1022_v31 = vsel %vm7358_vm8, %v1014_v48, %v1021_v16  ;;  %v1295_v14 = vsel %vm7308_vm2, %v1023_v17, %v1294_v62  ;;  %v852_v58 = vsel %vm7308_vm2, 0, %v851_v54  ;;  %v884_v0 = vsel %vm7316_vm4, 0, %v883_v39 }
 0x12c   : > { %v793_v32 = vpack.c.bf16 %v761_v19, %v761_v19  ;;  %v2449_v37 = vpack.c.b16 %v2422_v20, %v2421_v11  ;;  %v1384_v38 = vld [vmem:[#allocation2 + $0x3c] sm:$0xf]  ;;  %1293 = vst.msk [vmem:[#allocation2 + $0x40] sm:$0xf] %vm815_vm5, %v1022_v31  ;;  %v626_v40 = vpop.f32.mrf.mxu0  ;;  %v1543_v41 = vrot.slane %v1542_v25, 4  ;;  %v1439_v5 = vshll.u32 %v7539_v59, 16 }
 0x12d   : > { %v1550_v49 = vshrl.u32 %v1384_v38, 16  ;;  %v1553_v50 = vshll.u32 %v1384_v38, 16  ;;  %1296 = vst [vmem:[#allocation2 + $0x44] sm:$0x1] %v1295_v14  ;;  %v694_v48 = vmul.f32 %v7328_v24, %v626_v40  ;;  %v2250_v63 = vld [vmem:[#allocation2 + $0x3c] sm:$0xe] }
 0x12e   : > { %v1025_v46 = vshrl.u32 %v793_v32, 16  ;;  %v1028_v51 = vshll.u32 %v793_v32, 16  ;;  %6274 = vmatmul.msk.bf16.gmra.mxu3 %vm1878_vm12, %v2449_v37  ;;  %v1548_v47 = vsel %vm7465_vm15, %v1543_v41, %v1547_v43  ;;  %853 = vst [vmem:[#allocation2 + $0x60] sm:$0x1] %v852_v58  ;;  %v7550_v6 = vrot.slane %v1470_v34, 4  ;;  %v6634_v34 = vld [vmem:[%s7265_s20 + $0x70] sm:$0xff] }
 0x12f   : > { %v1552_v53 = vrot.slane %v1550_v49, 4  ;;  %v1555_v27 = vrot.slane %v1553_v50, 5  ;;  %v730_v61 = vadd.f32 %v7333_v26, %v694_v48  ;;  %v1827_v62 = vunpack.c.l.b16 %v1548_v47  ;;  %885 = vst [vmem:[#allocation2 + $0x8] sm:$0x1] %v884_v0  ;;  %v907_v40 = vld [vmem:[#allocation2 + $0x68] sm:$0x1] }
 0x130   : > { %v7541_v60 = vrot.slane %v1025_v46, 7  ;;  %v1443_v7 = vshrl.u32 %v7539_v59, 16  ;;  %v6251_v23 = vrot.slane %v2250_v63, 9  ;;  %v1478_v9 = vshrl.u32 %v7533_v55, 16  ;;  %v1374_v47 = vld [vmem:[#allocation2] sm:$0xf] }
 0x131   : > { %v1556_v3 = vor.u32 %v1555_v27, %v1552_v53  ;;  %v762_v11 = vmax.f32 %v730_v61, 0.0  ;;  %v1854_v12 = vpack.c.b16 %v1827_v62, %v1826_v52  ;;  %v1481_v16 = vshll.u32 %v7533_v55, 16  ;;  %v1301_v53 = vld [vmem:[#allocation2 + $0x50] sm:$0x1] }
 0x132   : > { %v1030_v8 = vor.u32 %v1028_v51, %v7541_v60  ;;  %v1031_v13 = vrot.slane %v7541_v60, 4  ;;  %v7561_v25 = vrot.slane %v1439_v5, 5  ;;  %v7565_v41 = vrot.slane %v1443_v7, 4 }
 0x133   : > { %v794_v19 = vpack.c.bf16 %v762_v11, %v762_v11  ;;  %6146 = vmatmul.msk.bf16.gmra.mxu1 %vm1878_vm12, %v1854_v12  ;;  %v6649_v36 = vld [vmem:[#allocation2 + $0x3c] sm:$0xff]  ;;  %v1557_v21 = vrot.slane %v1556_v3, 4  ;;  %v908_v61 = vsel %vm7316_vm4, 0, %v907_v40  ;;  %v1433_v11 = vshll.u32 %v1374_v47, 16 }
 0x134   : > { %v1298_v17 = vsel %vm7346_vm6, %v1030_v8, %v1297_v2  ;;  %v1385_v20 = vld [vmem:[#allocation2 + $0x40] sm:$0xf]  ;;  %v629_v28 = vpop.f32.mrf.mxu0  ;;  %v1415_v31 = vld [vmem:[#allocation2 + $0x44] sm:$0x1]  ;;  %6235 = vmatmul.msk.bf16.gmra.mxu2 %vm1878_vm12, %v6649_v36  ;;  %909 = vst [vmem:[#allocation2 + $0x68] sm:$0x1] %v908_v61 }
 0x135   : > { %1299 = vst [vmem:[#allocation2 + $0x48] sm:$0xf] %v1298_v17  ;;  %v2333_v14 = vrot.slane %v1385_v20, 5  ;;  %v1559_v32 = vshll.u32 %v1385_v20, 16  ;;  %v1033_v37 = vshrl.u32 %v794_v19, 16  ;;  %v695_v38 = vmul.f32 %v7328_v24, %v629_v28 }
 0x136   : > { %v2336_v39 = vrot.slane %v1415_v31, 5  ;;  %v1563_v46 = vshrl.u32 %v1385_v20, 16  ;;  %v1036_v48 = vshll.u32 %v794_v19, 16  ;;  %v1569_v60 = vshll.u32 %v1415_v31, 16 }
 0x137   : > { %v2334_v43 = vsel %vm7388_vm11, %v6251_v23, %v2333_v14  ;;  %v2335_v49 = vrot.slane %v2333_v14, 4  ;;  %v1561_v50 = vrot.slane %v1559_v32, 5  ;;  %v1035_v51 = vrot.slane %v1033_v37, 7  ;;  %668 = vmatmul.bf16.gmra.mxu0 %v6634_v34  ;;  %v854_v32 = vld [vmem:[#allocation2 + $0x6c] sm:$0x1] }
 0x138   : > { %v731_v52 = vadd.f32 %v7333_v26, %v695_v38  ;;  %v2423_v54 = vunpack.c.l.b16 %v2334_v43  ;;  %v1565_v58 = vrot.slane %v1563_v46, 4  ;;  %v1430_v8 = vshrl.u32 %v1374_v47, 16 }
 0x139   : > { %v2337_v27 = vsel %vm7388_vm11, %v2335_v49, %v2336_v39  ;;  %v1038_v62 = vor.u32 %v1036_v48, %v1035_v51  ;;  %v1040_v63 = vrot.slane %v1035_v51, 4  ;;  %v1562_v3 = vsel %vm7465_vm15, %v1557_v21, %v1561_v50  ;;  %v7589_v49 = vld [vmem:[#allocation2 + $0x8] sm:$0x1] }
 0x13a   : > { %v763_v0 = vmax.f32 %v731_v52, 0.0  ;;  %v2424_v2 = vunpack.c.l.b16 %v2337_v27  ;;  %v1566_v5 = vor.u32 %v1565_v58, %v1561_v50  ;;  %v1571_v20 = vrot.slane %v1569_v60, 5 }
 0x13b   : > { %v1039_v12 = vsel %vm7358_vm8, %v1031_v13, %v1038_v62  ;;  %v1302_v7 = vsel %vm7308_vm2, %v1040_v63, %v1301_v53  ;;  %v1828_v13 = vunpack.c.l.b16 %v1562_v3  ;;  %v1446_v37 = vor.u32 %v7565_v41, %v7561_v25 }
 0x13c   : > { %v795_v23 = vpack.c.bf16 %v763_v0, %v763_v0  ;;  %v2450_v17 = vpack.c.b16 %v2424_v2, %v2423_v54  ;;  %v1386_v19 = vld [vmem:[#allocation2 + $0x48] sm:$0xf]  ;;  %1300 = vst.msk [vmem:[#allocation2 + $0x4c] sm:$0xf] %vm815_vm5, %v1039_v12  ;;  %v631_v36 = vpop.f32.mrf.mxu0  ;;  %v1567_v34 = vrot.slane %v1566_v5, 4  ;;  %v855_v43 = vsel %vm7308_vm2, 0, %v854_v32 }
 0x13d   : > { %v1574_v28 = vshrl.u32 %v1386_v19, 16  ;;  %v1577_v31 = vshll.u32 %v1386_v19, 16  ;;  %1303 = vst [vmem:[#allocation2 + $0x50] sm:$0x1] %v1302_v7  ;;  %v696_v14 = vmul.f32 %v7328_v24, %v631_v36  ;;  %v2251_v52 = vld [vmem:[#allocation2 + $0x48] sm:$0xe] }
 0x13e   : > { %v1042_v21 = vshrl.u32 %v795_v23, 16  ;;  %6275 = vmatmul.msk.bf16.gmra.mxu3 %vm1878_vm12, %v2450_v17  ;;  %v1572_v38 = vsel %vm7465_vm15, %v1567_v34, %v1571_v20  ;;  %v1045_v46 = vshll.u32 %v795_v23, 16  ;;  %856 = vst [vmem:[#allocation2 + $0x6c] sm:$0x1] %v855_v43  ;;  %v1304_v54 = vld [vmem:[#allocation2 + $0x54] sm:$0xf] }
 0x13f   : > { %v1576_v39 = vrot.slane %v1574_v28, 4  ;;  %v1579_v40 = vrot.slane %v1577_v31, 5  ;;  %v732_v51 = vadd.f32 %v7333_v26, %v696_v14  ;;  %v1829_v48 = vunpack.c.l.b16 %v1572_v38  ;;  %v6635_v12 = vld [vmem:[%s7265_s20 + $0x78] sm:$0xff] }
 0x140   : > { %v1044_v50 = vrot.slane %v1042_v21, 7  ;;  %v1432_v41 = vrot.slane %v1430_v8, 4  ;;  %v1435_v53 = vrot.slane %v1433_v11, 5  ;;  %v7594_v27 = vrot.slane %v1478_v9, 4 }
 0x141   : > { %v1580_v47 = vor.u32 %v1579_v40, %v1576_v39  ;;  %v764_v60 = vmax.f32 %v732_v51, 0.0  ;;  %v1855_v61 = vpack.c.b16 %v1829_v48, %v1828_v13  ;;  %v1449_v62 = vshll.u32 %v7589_v49, 16 }
 0x142   : > { %v1047_v58 = vor.u32 %v1045_v46, %v1044_v50  ;;  %v6252_v63 = vrot.slane %v2251_v52, 9  ;;  %v7597_v0 = vrot.slane %v1446_v37, 4  ;;  %v1487_v2 = vshll.u32 %v7421_v10, 16  ;;  %v1308_v46 = vld [vmem:[#allocation2 + $0x5c] sm:$0x1] }
 0x143   : > { %v1491_v3 = vshrl.u32 %v7421_v10, 16  ;;  %v1048_v5 = vrot.slane %v1044_v50, 4  ;;  %v796_v11 = vpack.c.bf16 %v764_v60, %v764_v60  ;;  %6147 = vmatmul.msk.bf16.gmra.mxu1 %vm1878_vm12, %v1855_v61  ;;  %v6650_v9 = vld [vmem:[#allocation2 + $0x48] sm:$0xff]  ;;  %v1581_v23 = vrot.slane %v1580_v47, 4 }
 0x144   : > { %v1305_v8 = vsel %vm7346_vm6, %v1047_v58, %v1304_v54  ;;  %v1387_v7 = vld [vmem:[#allocation2 + $0x4c] sm:$0xf]  ;;  %v634_v17 = vpop.f32.mrf.mxu0  ;;  %v1416_v19 = vld [vmem:[#allocation2 + $0x50] sm:$0x1]  ;;  %v1436_v20 = vor.u32 %v1435_v53, %v1432_v41  ;;  %6236 = vmatmul.msk.bf16.gmra.mxu2 %vm1878_vm12, %v6650_v9  ;;  %v1451_v14 = vrot.slane %v1449_v62, 5  ;;  %v1466_v10 = vsel %vm7465_vm15, %v7499_v45, %v7488_v35 }
 0x145   : > { %1306 = vst [vmem:[#allocation2 + $0x54] sm:$0xf] %v1305_v8  ;;  %v2340_v36 = vrot.slane %v1387_v7, 5  ;;  %v1583_v34 = vshll.u32 %v1387_v7, 16  ;;  %v1050_v28 = vshrl.u32 %v796_v11, 16  ;;  %v697_v31 = vmul.f32 %v7328_v24, %v634_v17 }
 0x146   : > { %v2343_v21 = vrot.slane %v1416_v19, 5  ;;  %v1587_v38 = vshrl.u32 %v1387_v7, 16  ;;  %v1053_v40 = vshll.u32 %v796_v11, 16  ;;  %v1593_v52 = vshll.u32 %v1416_v19, 16 }
 0x147   : > { %v2341_v13 = vsel %vm7388_vm11, %v6252_v63, %v2340_v36  ;;  %v2342_v32 = vrot.slane %v2340_v36, 4  ;;  %v1585_v37 = vrot.slane %v1583_v34, 5  ;;  %v1052_v39 = vrot.slane %v1050_v28, 7  ;;  %673 = vmatmul.bf16.gmra.mxu0 %v6635_v12  ;;  %v910_v12 = vld [vmem:[#allocation2 + $0x74] sm:$0x1] }
 0x148   : > { %v733_v43 = vadd.f32 %v7333_v26, %v697_v31  ;;  %v2425_v50 = vunpack.c.l.b16 %v2341_v13  ;;  %v1589_v48 = vrot.slane %v1587_v38, 4  ;;  %v1437_v54 = vrot.slane %v1436_v20, 4  ;;  %v7636_v13 = vld [vmem:[%s9013_s3] ss:$0 sm:$0xff] }
 0x149   : > { %v2344_v51 = vsel %vm7388_vm11, %v2342_v32, %v2343_v21  ;;  %v1055_v47 = vor.u32 %v1053_v40, %v1052_v39  ;;  %v1057_v41 = vrot.slane %v1052_v39, 4  ;;  %v1586_v60 = vsel %vm7465_vm15, %v1581_v23, %v1585_v37  ;;  %v857_v21 = vld [vmem:[#allocation2 + $0x78] sm:$0x1]  ;;  %v1311_v38 = vld [vmem:[#allocation2 + $0x60] sm:$0xf] }
 0x14a   : > { %v765_v53 = vmax.f32 %v733_v43, 0.0  ;;  %v2426_v58 = vunpack.c.l.b16 %v2344_v51  ;;  %v1590_v61 = vor.u32 %v1589_v48, %v1585_v37  ;;  %v1442_v26 = vsel %vm7465_vm15, %v1437_v54, %v7561_v25 }
 0x14b   : > { %v1452_v62 = vsel %vm7465_vm15, %v7597_v0, %v1451_v14  ;;  %v1056_v63 = vsel %vm7358_vm8, %v1048_v5, %v1055_v47  ;;  %v1309_v8 = vsel %vm7308_vm2, %v1057_v41, %v1308_v46  ;;  %v1595_v17 = vrot.slane %v1593_v52, 5 }
 0x14c   : > { %v797_v11 = vpack.c.bf16 %v765_v53, %v765_v53  ;;  %v2451_v9 = vpack.c.b16 %v2426_v58, %v2425_v50  ;;  %1307 = vst.msk [vmem:[#allocation2 + $0x58] sm:$0xf] %vm815_vm5, %v1056_v63  ;;  %v636_v7 = vpop.f32.mrf.mxu0  ;;  %v1591_v23 = vrot.slane %v1590_v61, 4  ;;  %v1388_v19 = vld [vmem:[#allocation2 + $0x54] sm:$0xf]  ;;  %v1830_v0 = vunpack.c.l.b16 %v1586_v60 }
 0x14d   : > { %1310 = vst [vmem:[#allocation2 + $0x5c] sm:$0x1] %v1309_v8  ;;  %v698_v36 = vmul.f32 %v7328_v24, %v636_v7  ;;  %v1818_v5 = vunpack.c.l.b16 %v1442_v26  ;;  %v1819_v28 = vunpack.c.l.b16 %v1452_v62  ;;  %v911_v31 = vsel %vm7316_vm4, 0, %v910_v12  ;;  %v2252_v39 = vld [vmem:[#allocation2 + $0x54] sm:$0xe] }
 0x14e   : > { %v1059_v25 = vshrl.u32 %v797_v11, 16  ;;  %6276 = vmatmul.msk.bf16.gmra.mxu3 %vm1878_vm12, %v2451_v9  ;;  %v1062_v34 = vshll.u32 %v797_v11, 16  ;;  %v1596_v20 = vsel %vm7465_vm15, %v1591_v23, %v1595_v17  ;;  %912 = vst [vmem:[#allocation2 + $0x74] sm:$0x1] %v911_v31  ;;  %v1598_v37 = vshrl.u32 %v1388_v19, 16 }
 0x14f   : > { %v734_v24 = vadd.f32 %v7636_v13, %v698_v36  ;;  %v1831_v32 = vunpack.c.l.b16 %v1596_v20  ;;  %v1601_v40 = vshll.u32 %v1388_v19, 16  ;;  %v858_v43 = vsel %vm7308_vm2, 0, %v857_v21  ;;  %v7665_v11 = vld [vmem:[%s9012_s2] ss:$0 sm:$0xff]  ;;  %v1315_v20 = vld [vmem:[#allocation2 + $0x68] sm:$0x1] }
 0x150   : > { %v7631_v14 = vrot.slane %v1059_v25, 7  ;;  %859 = vst [vmem:[#allocation2 + $0x78] sm:$0x1] %v858_v43  ;;  %v7644_v48 = vrot.slane %v1481_v16, 5  ;;  %v1600_v52 = vrot.slane %v1598_v37, 4  ;;  %v7648_v47 = vrot.slane %v1487_v2, 5 }
 0x151   : > { %v766_v46 = vmax.f32 %v734_v24, 0.0  ;;  %v1856_v51 = vpack.c.b16 %v1831_v32, %v1830_v0  ;;  %v1603_v54 = vrot.slane %v1601_v40, 5  ;;  %v7652_v41 = vrot.slane %v1491_v3, 4  ;;  %v913_v7 = vld [vmem:[#allocation2 + $0x80] sm:$0x1] }
 0x152   : > { %v1064_v50 = vor.u32 %v1062_v34, %v7631_v14  ;;  %v1850_v55 = vpack.c.b16 %v1819_v28, %v1818_v5  ;;  %v6253_v61 = vrot.slane %v2252_v39, 9  ;;  %v1065_v3 = vrot.slane %v7631_v14, 4 }
 0x153   : > { %v798_v58 = vpack.c.bf16 %v766_v46, %v766_v46  ;;  %6148 = vmatmul.msk.bf16.gmra.mxu1 %vm1878_vm12, %v1856_v51  ;;  %v6651_v60 = vld [vmem:[#allocation2 + $0x54] sm:$0xff]  ;;  %v1604_v12 = vor.u32 %v1603_v54, %v1600_v52  ;;  %v914_v14 = vsel %vm7316_vm4, 0, %v913_v7  ;;  %v1476_v43 = vsel %vm7465_vm15, %v7550_v6, %v7524_v30 }
 0x154   : > { %v1312_v53 = vsel %vm7346_vm6, %v1064_v50, %v1311_v38  ;;  %v1389_v16 = vld [vmem:[#allocation2 + $0x58] sm:$0xf]  ;;  %v639_v26 = vpop.f32.mrf.mxu0  ;;  %v1417_v62 = vld [vmem:[#allocation2 + $0x5c] sm:$0x1]  ;;  %6237 = vmatmul.msk.bf16.gmra.mxu2 %vm1878_vm12, %v6651_v60  ;;  %915 = vst [vmem:[#allocation2 + $0x80] sm:$0x1] %v914_v14  ;;  %v1484_v50 = vor.u32 %v7644_v48, %v7594_v27  ;;  %v1494_v30 = vor.u32 %v7652_v41, %v7648_v47 }
 0x155   : > { %1313 = vst [vmem:[#allocation2 + $0x60] sm:$0xf] %v1312_v53  ;;  %v2347_v63 = vrot.slane %v1389_v16, 5  ;;  %v1607_v2 = vshll.u32 %v1389_v16, 16  ;;  %v1067_v8 = vshrl.u32 %v798_v58, 16  ;;  %v699_v9 = vmul.f32 %v7665_v11, %v639_v26 }
 0x156   : > { %v1070_v23 = vshll.u32 %v798_v58, 16  ;;  %v2350_v25 = vrot.slane %v1417_v62, 5  ;;  %v1611_v34 = vshrl.u32 %v1389_v16, 16  ;;  %v1617_v21 = vshll.u32 %v1417_v62, 16 }
 0x157   : > { %v2348_v17 = vsel %vm7388_vm11, %v6253_v61, %v2347_v63  ;;  %v2349_v19 = vrot.slane %v2347_v63, 4  ;;  %v1069_v36 = vrot.slane %v1067_v8, 7  ;;  %v735_v0 = vadd.f32 %v7636_v13, %v699_v9  ;;  %6142 = vmatmul.msk.bf16.vlgmr.msrb.gmra.mxu0 %vm1878_vm12, %v1850_v55  ;;  %v860_v61 = vld [vmem:[#allocation2 + $0x84] sm:$0x1]  ;;  %v1318_v9 = vld [vmem:[#allocation2 + $0x6c] sm:$0xf] }
 0x158   : > { %v1609_v5 = vrot.slane %v1607_v2, 5  ;;  %v2427_v31 = vunpack.c.l.b16 %v2348_v17  ;;  %2527 = vmatpush.bf16.msrb.mxu0 %v7385_v29  ;;  %v1605_v39 = vrot.slane %v1604_v12, 4  ;;  %v1613_v40 = vrot.slane %v1611_v34, 4 }
 0x159   : > { %v2351_v28 = vsel %vm7388_vm11, %v2349_v19, %v2350_v25  ;;  %v1072_v24 = vor.u32 %v1070_v23, %v1069_v36  ;;  %v1074_v32 = vrot.slane %v1069_v36, 4  ;;  %v767_v37 = vmax.f32 %v735_v0, 0.0 }
 0x15a   : > { %v2428_v38 = vunpack.c.l.b16 %v2351_v28  ;;  %v1614_v58 = vor.u32 %v1613_v40, %v1609_v5  ;;  %v1610_v48 = vsel %vm7465_vm15, %v1605_v39, %v1609_v5  ;;  %v1619_v16 = vrot.slane %v1617_v21, 5 }
 0x15b   : > { %v1073_v46 = vsel %vm7358_vm8, %v1065_v3, %v1072_v24  ;;  %v1316_v29 = vsel %vm7308_vm2, %v1074_v32, %v1315_v20  ;;  %v799_v51 = vpack.c.bf16 %v767_v37, %v767_v37  ;;  %v861_v2 = vsel %vm7308_vm2, 0, %v860_v61 }
 0x15c   : > { %v2452_v52 = vpack.c.b16 %v2428_v38, %v2427_v31  ;;  %v1390_v54 = vld [vmem:[#allocation2 + $0x60] sm:$0xf]  ;;  %1314 = vst.msk [vmem:[#allocation2 + $0x64] sm:$0xf] %vm815_vm5, %v1073_v46  ;;  %v641_v53 = vpop.f32.mrf.mxu0  ;;  %2528 = vmatpush.bf16.msrb.mxu0 %v7396_v44  ;;  %v1615_v26 = vrot.slane %v1614_v58, 4  ;;  %v1832_v7 = vunpack.c.l.b16 %v1610_v48  ;;  %v1820_v23 = vunpack.c.l.b16 %v1466_v10 }
 0x15d   : > { %v1622_v60 = vshrl.u32 %v1390_v54, 16  ;;  %v1625_v55 = vshll.u32 %v1390_v54, 16  ;;  %1317 = vst [vmem:[#allocation2 + $0x68] sm:$0x1] %v1316_v29  ;;  %v1076_v6 = vshrl.u32 %v799_v51, 16  ;;  %v700_v27 = vmul.f32 %v7665_v11, %v641_v53 }
 0x15e   : > { %6277 = vmatmul.msk.bf16.gmra.mxu3 %vm1878_vm12, %v2452_v52  ;;  %v1079_v3 = vshll.u32 %v799_v51, 16  ;;  %v2253_v8 = vld [vmem:[#allocation2 + $0x60] sm:$0xe]  ;;  %862 = vst [vmem:[#allocation2 + $0x84] sm:$0x1] %v861_v2  ;;  %v1620_v12 = vsel %vm7465_vm15, %v1615_v26, %v1619_v16  ;;  %v1821_v17 = vunpack.c.l.b16 %v1476_v43  ;;  %v7706_v34 = vrot.slane %v1484_v50, 4 }
 0x15f   : > { %v1624_v62 = vrot.slane %v1622_v60, 4  ;;  %v1627_v63 = vrot.slane %v1625_v55, 5  ;;  %v1078_v41 = vrot.slane %v1076_v6, 7  ;;  %v736_v44 = vadd.f32 %v7636_v13, %v700_v27  ;;  %v916_v46 = vld [vmem:[#allocation2 + $0x8c] sm:$0x1] }
 0x160   : > { %v1833_v36 = vunpack.c.l.b16 %v1620_v12  ;;  %v6254_v5 = vrot.slane %v2253_v8, 9  ;;  %v7708_v20 = vrot.slane %v1494_v30, 4  ;;  %v1497_v28 = vshll.u32 %v7427_v22, 16  ;;  %v1322_v30 = vld [vmem:[#allocation2 + $0x74] sm:$0x1] }
 0x161   : > { %v1081_v19 = vor.u32 %v1079_v3, %v1078_v41  ;;  %v768_v25 = vmax.f32 %v736_v44, 0.0  ;;  %v1628_v0 = vor.u32 %v1627_v63, %v1624_v62  ;;  %v1082_v31 = vrot.slane %v1078_v41, 4 }
 0x162   : > { %v1857_v24 = vpack.c.b16 %v1833_v36, %v1832_v7  ;;  %v1851_v32 = vpack.c.b16 %v1821_v17, %v1820_v23  ;;  %v917_v16 = vsel %vm7316_vm4, 0, %v916_v46  ;;  %v1490_v3 = vsel %vm7465_vm15, %v7706_v34, %v7648_v47 }
 0x163   : > { %v1319_v21 = vsel %vm7346_vm6, %v1081_v19, %v1318_v9  ;;  %v800_v14 = vpack.c.bf16 %v768_v25, %v768_v25  ;;  %v6652_v35 = vld [vmem:[#allocation2 + $0x60] sm:$0xff]  ;;  %v1629_v50 = vrot.slane %v1628_v0, 4  ;;  %918 = vst [vmem:[#allocation2 + $0x8c] sm:$0x1] %v917_v16  ;;  %v1499_v44 = vrot.slane %v1497_v28, 5 }
 0x164   : > { %v1391_v45 = vld [vmem:[#allocation2 + $0x64] sm:$0xf]  ;;  %1320 = vst [vmem:[#allocation2 + $0x6c] sm:$0xf] %v1319_v21  ;;  %v644_v10 = vpop.f32.mrf.mxu0  ;;  %v1418_v37 = vld [vmem:[#allocation2 + $0x68] sm:$0x1]  ;;  %6149 = vmatmul.msk.bf16.gmra.mxu1 %vm1878_vm12, %v1857_v24  ;;  %6238 = vmatmul.msk.bf16.gmra.mxu2 %vm1878_vm12, %v6652_v35  ;;  %v1822_v46 = vunpack.c.l.b16 %v1490_v3 }
 0x165   : > { %v2354_v38 = vrot.slane %v1391_v45, 5  ;;  %v1631_v39 = vshll.u32 %v1391_v45, 16  ;;  %v1084_v40 = vshrl.u32 %v800_v14, 16  ;;  %v701_v43 = vmul.f32 %v7665_v11, %v644_v10 }
 0x166   : > { %v2357_v22 = vrot.slane %v1418_v37, 5  ;;  %v1635_v54 = vshrl.u32 %v1391_v45, 16  ;;  %v1087_v58 = vshll.u32 %v800_v14, 16  ;;  %v1641_v48 = vshll.u32 %v1418_v37, 16 }
 0x167   : > { %v2355_v29 = vsel %vm7388_vm11, %v6254_v5, %v2354_v38  ;;  %v2356_v51 = vrot.slane %v2354_v38, 4  ;;  %v1633_v52 = vrot.slane %v1631_v39, 5  ;;  %v1086_v53 = vrot.slane %v1084_v40, 7  ;;  %6143 = vmatmul.msk.bf16.gmra.mxu0 %vm1878_vm12, %v1851_v32  ;;  %v1325_v38 = vld [vmem:[#allocation2 + $0x78] sm:$0xf] }
 0x168   : > { %v737_v60 = vadd.f32 %v7636_v13, %v701_v43  ;;  %v2429_v55 = vunpack.c.l.b16 %v2355_v29  ;;  %v1637_v27 = vrot.slane %v1635_v54, 4  ;;  %v1643_v25 = vrot.slane %v1641_v48, 5 }
 0x169   : > { %v2358_v6 = vsel %vm7388_vm11, %v2356_v51, %v2357_v22  ;;  %v1089_v61 = vor.u32 %v1087_v58, %v1086_v53  ;;  %v1091_v26 = vrot.slane %v1086_v53, 4  ;;  %v1634_v2 = vsel %vm7465_vm15, %v1629_v50, %v1633_v52 }
 0x16a   : > { %v769_v62 = vmax.f32 %v737_v60, 0.0  ;;  %v2430_v63 = vunpack.c.l.b16 %v2358_v6  ;;  %v1638_v41 = vor.u32 %v1637_v27, %v1633_v52  ;;  %v1834_v34 = vunpack.c.l.b16 %v1634_v2 }
 0x16b   : > { %v1090_v8 = vsel %vm7358_vm8, %v1082_v31, %v1089_v61  ;;  %v1323_v9 = vsel %vm7308_vm2, %v1091_v26, %v1322_v30  ;;  %v1392_v23 = vld [vmem:[#allocation2 + $0x6c] sm:$0xf]  ;;  %v1500_v28 = vsel %vm7465_vm15, %v7708_v20, %v1499_v44  ;;  %v863_v31 = vld [vmem:[#allocation2 + $0x90] sm:$0x1] }
 0x16c   : > { %v801_v12 = vpack.c.bf16 %v769_v62, %v769_v62  ;;  %v2453_v7 = vpack.c.b16 %v2430_v63, %v2429_v55  ;;  %1321 = vst.msk [vmem:[#allocation2 + $0x70] sm:$0xf] %vm815_vm5, %v1090_v8  ;;  %v646_v17 = vpop.f32.mrf.mxu0  ;;  %v1639_v19 = vrot.slane %v1638_v41, 4  ;;  %v1646_v36 = vshrl.u32 %v1392_v23, 16  ;;  %v2254_v40 = vld [vmem:[#allocation2 + $0x6c] sm:$0xe] }
 0x16d   : > { %v1649_v0 = vshll.u32 %v1392_v23, 16  ;;  %1324 = vst [vmem:[#allocation2 + $0x74] sm:$0x1] %v1323_v9  ;;  %v702_v47 = vmul.f32 %v7665_v11, %v646_v17  ;;  %v864_v35 = vsel %vm7308_vm2, 0, %v863_v31  ;;  %v1823_v39 = vunpack.c.l.b16 %v1500_v28  ;;  %v6684_v62 = vld [vmem:[#allocation6 + $0x40] sm:$0xff]  ;;  %v6682_v63 = vld [vmem:[#allocation6 + $0x30] sm:$0xff] }
 0x16e   : > { %v1093_v5 = vshrl.u32 %v801_v12, 16  ;;  %6278 = vmatmul.msk.bf16.gmra.mxu3 %vm1878_vm12, %v2453_v7  ;;  %v1644_v21 = vsel %vm7465_vm15, %v1639_v19, %v1643_v25  ;;  %v1648_v14 = vrot.slane %v1646_v36, 4  ;;  %v1096_v10 = vshll.u32 %v801_v12, 16  ;;  %865 = vst [vmem:[#allocation2 + $0x90] sm:$0x1] %v864_v35  ;;  %3492 = vmatpush.bf16.msrb.mxu2 %v6684_v62 }
 0x16f   : > { %v1651_v24 = vrot.slane %v1649_v0, 5  ;;  %v738_v32 = vadd.f32 %v7636_v13, %v702_v47  ;;  %v1835_v37 = vunpack.c.l.b16 %v1644_v21  ;;  %v6255_v58 = vrot.slane %v2254_v40, 9  ;;  %v919_v23 = vld [vmem:[#allocation2 + $0x98] sm:$0x1]  ;;  %v1329_v17 = vld [vmem:[#allocation2 + $0x80] sm:$0x1]  ;;  %2826 = vmatpush.bf16.msrb.mxu1 %v6682_v63 }
 0x170   : > { %v1095_v45 = vrot.slane %v1093_v5, 7  ;;  %v1852_v55 = vpack.c.b16 %v1823_v39, %v1822_v46  ;;  %v920_v0 = vsel %vm7316_vm4, 0, %v919_v23 }
 0x171   : > { %v770_v20 = vmax.f32 %v738_v32, 0.0  ;;  %v1858_v22 = vpack.c.b16 %v1835_v37, %v1834_v34  ;;  %v1652_v50 = vor.u32 %v1651_v24, %v1648_v14  ;;  %921 = vst [vmem:[#allocation2 + $0x98] sm:$0x1] %v920_v0 }
 0x172   : > { %v1098_v43 = vor.u32 %v1096_v10, %v1095_v45  ;;  %v1099_v29 = vrot.slane %v1095_v45, 4 }
 0x173   : > { %v802_v52 = vpack.c.bf16 %v770_v20, %v770_v20  ;;  %v6653_v54 = vld [vmem:[#allocation2 + $0x6c] sm:$0xff]  ;;  %v1653_v26 = vrot.slane %v1652_v50, 4  ;;  %v866_v50 = vld [vmem:[#allocation2 + $0x9c] sm:$0x1] }
 0x174   : > { %v1326_v51 = vsel %vm7346_vm6, %v1098_v43, %v1325_v38  ;;  %v1393_v53 = vld [vmem:[#allocation2 + $0x70] sm:$0xf]  ;;  %v649_v60 = vpop.f32.mrf.mxu0  ;;  %v1419_v30 = vld [vmem:[#allocation2 + $0x74] sm:$0x1]  ;;  %6150 = vmatmul.msk.bf16.gmra.mxu1 %vm1878_vm12, %v1858_v22  ;;  %6239 = vmatmul.msk.bf16.gmra.mxu2 %vm1878_vm12, %v6653_v54 }
 0x175   : > { %1327 = vst [vmem:[#allocation2 + $0x78] sm:$0xf] %v1326_v51  ;;  %v2361_v6 = vrot.slane %v1393_v53, 5  ;;  %v1655_v27 = vshll.u32 %v1393_v53, 16  ;;  %v1101_v48 = vshrl.u32 %v802_v52, 16  ;;  %v703_v16 = vmul.f32 %v7665_v11, %v649_v60 }
 0x176   : > { %v2364_v61 = vrot.slane %v1419_v30, 5  ;;  %v1659_v44 = vshrl.u32 %v1393_v53, 16  ;;  %v1104_v9 = vshll.u32 %v802_v52, 16  ;;  %v1665_v36 = vshll.u32 %v1419_v30, 16 }
 0x177   : > { %v2362_v2 = vsel %vm7388_vm11, %v6255_v58, %v2361_v6  ;;  %v2363_v41 = vrot.slane %v2361_v6, 4  ;;  %v1657_v3 = vrot.slane %v1655_v27, 5  ;;  %v1103_v8 = vrot.slane %v1101_v48, 7  ;;  %6144 = vmatmul.msk.bf16.gmra.mxu0 %vm1878_vm12, %v1852_v55  ;;  %v1332_v55 = vld [vmem:[#allocation2 + $0x84] sm:$0xf] }
 0x178   : > { %v739_v12 = vadd.f32 %v7636_v13, %v703_v16  ;;  %v2431_v7 = vunpack.c.l.b16 %v2362_v2  ;;  %v1661_v25 = vrot.slane %v1659_v44, 4  ;;  %v1667_v38 = vrot.slane %v1665_v36, 5  ;;  %v6644_v2 = vld [vmem:[#allocation2] sm:$0xff] }
 0x179   : > { %v2365_v19 = vsel %vm7388_vm11, %v2363_v41, %v2364_v61  ;;  %v1106_v5 = vor.u32 %v1104_v9, %v1103_v8  ;;  %v1108_v47 = vrot.slane %v1103_v8, 4  ;;  %v1658_v31 = vsel %vm7465_vm15, %v1653_v26, %v1657_v3 }
 0x17a   : > { %v771_v34 = vmax.f32 %v739_v12, 0.0  ;;  %v2432_v28 = vunpack.c.l.b16 %v2365_v19  ;;  %v1662_v21 = vor.u32 %v1661_v25, %v1657_v3  ;;  %v1836_v22 = vunpack.c.l.b16 %v1658_v31  ;;  %v922_v25 = vld [vmem:[#allocation2 + $0xa4] sm:$0x1] }
 0x17b   : > { %v1107_v14 = vsel %vm7358_vm8, %v1099_v29, %v1106_v5  ;;  %v1330_v24 = vsel %vm7308_vm2, %v1108_v47, %v1329_v17  ;;  %v867_v52 = vsel %vm7308_vm2, 0, %v866_v50 }
 0x17c   : > { %v803_v35 = vpack.c.bf16 %v771_v34, %v771_v34  ;;  %v2454_v45 = vpack.c.b16 %v2432_v28, %v2431_v7  ;;  %v1394_v10 = vld [vmem:[#allocation2 + $0x78] sm:$0xf]  ;;  %1328 = vst.msk [vmem:[#allocation2 + $0x7c] sm:$0xf] %vm815_vm5, %v1107_v14  ;;  %v651_v32 = vpop.f32.mrf.mxu0  ;;  %v1663_v37 = vrot.slane %v1662_v21, 4 }
 0x17d   : > { %v1670_v39 = vshrl.u32 %v1394_v10, 16  ;;  %v1673_v40 = vshll.u32 %v1394_v10, 16  ;;  %1331 = vst [vmem:[#allocation2 + $0x80] sm:$0x1] %v1330_v24  ;;  %v704_v20 = vmul.f32 %v7665_v11, %v651_v32  ;;  %v2255_v30 = vld [vmem:[#allocation2 + $0x78] sm:$0xe] }
 0x17e   : > { %v1110_v43 = vshrl.u32 %v803_v35, 16  ;;  %6279 = vmatmul.msk.bf16.gmra.mxu3 %vm1878_vm12, %v2454_v45  ;;  %v1668_v46 = vsel %vm7465_vm15, %v1663_v37, %v1667_v38  ;;  %v1113_v53 = vshll.u32 %v803_v35, 16  ;;  %868 = vst [vmem:[#allocation2 + $0x9c] sm:$0x1] %v867_v52  ;;  %v6256_v3 = vrot.slane %v2255_v30, 9 }
 0x17f   : > { %v1672_v29 = vrot.slane %v1670_v39, 4  ;;  %v1675_v51 = vrot.slane %v1673_v40, 5  ;;  %v740_v58 = vadd.f32 %v7636_v13, %v704_v20  ;;  %v1837_v60 = vunpack.c.l.b16 %v1668_v46  ;;  %v1336_v14 = vld [vmem:[#allocation2 + $0x8c] sm:$0x1]  ;;  %v869_v30 = vld [vmem:[#allocation2 + $0xa8] sm:$0x1] }
 0x180   : > { %v1112_v54 = vrot.slane %v1110_v43, 7  ;;  %v923_v10 = vsel %vm7316_vm4, 0, %v922_v25 }
 0x181   : > { %v772_v27 = vmax.f32 %v740_v58, 0.0  ;;  %v1859_v48 = vpack.c.b16 %v1837_v60, %v1836_v22  ;;  %v1676_v16 = vor.u32 %v1675_v51, %v1672_v29  ;;  %924 = vst [vmem:[#allocation2 + $0xa4] sm:$0x1] %v923_v10 }
 0x182   : > { %v1115_v6 = vor.u32 %v1113_v53, %v1112_v54  ;;  %v1116_v61 = vrot.slane %v1112_v54, 4 }
 0x183   : > { %v804_v62 = vpack.c.bf16 %v772_v27, %v772_v27  ;;  %v6654_v63 = vld [vmem:[#allocation2 + $0x78] sm:$0xff]  ;;  %v1677_v19 = vrot.slane %v1676_v16, 4 }
 0x184   : > { %v1333_v26 = vsel %vm7346_vm6, %v1115_v6, %v1332_v55  ;;  %v1395_v41 = vld [vmem:[#allocation2 + $0x7c] sm:$0xf]  ;;  %v654_v44 = vpop.f32.mrf.mxu0  ;;  %v1420_v8 = vld [vmem:[#allocation2 + $0x80] sm:$0x1]  ;;  %6151 = vmatmul.msk.bf16.gmra.mxu1 %vm1878_vm12, %v1859_v48  ;;  %6240 = vmatmul.msk.bf16.gmra.mxu2 %vm1878_vm12, %v6654_v63  ;;  %v870_v48 = vsel %vm7308_vm2, 0, %v869_v30 }
 0x185   : > { %1334 = vst [vmem:[#allocation2 + $0x84] sm:$0xf] %v1333_v26  ;;  %v2368_v9 = vrot.slane %v1395_v41, 5  ;;  %v1679_v12 = vshll.u32 %v1395_v41, 16  ;;  %v1118_v7 = vshrl.u32 %v804_v62, 16  ;;  %v705_v23 = vmul.f32 %v7665_v11, %v654_v44 }
 0x186   : > { %v2371_v17 = vrot.slane %v1420_v8, 5  ;;  %v1683_v47 = vshrl.u32 %v1395_v41, 16  ;;  %v1121_v28 = vshll.u32 %v804_v62, 16  ;;  %v1689_v45 = vshll.u32 %v1420_v8, 16  ;;  %871 = vst [vmem:[#allocation2 + $0xa8] sm:$0x1] %v870_v48 }
 0x187   : > { %v2369_v36 = vsel %vm7388_vm11, %v6256_v3, %v2368_v9  ;;  %v2370_v0 = vrot.slane %v2368_v9, 4  ;;  %v1681_v5 = vrot.slane %v1679_v12, 5  ;;  %v1120_v34 = vrot.slane %v1118_v7, 7  ;;  %6230 = vmatmul.msk.bf16.vlgmr.msra.gmra.mxu0 %vm1878_vm12, %v6644_v2  ;;  %v1339_v63 = vld [vmem:[#allocation2 + $0x90] sm:$0xf] }
 0x188   : > { %v741_v31 = vadd.f32 %v7636_v13, %v705_v23  ;;  %v2433_v21 = vunpack.c.l.b16 %v2369_v36  ;;  %v1685_v35 = vrot.slane %v1683_v47, 4  ;;  %v1691_v54 = vrot.slane %v1689_v45, 5 }
 0x189   : > { %v2372_v24 = vsel %vm7388_vm11, %v2370_v0, %v2371_v17  ;;  %v1123_v32 = vor.u32 %v1121_v28, %v1120_v34  ;;  %v1125_v37 = vrot.slane %v1120_v34, 4  ;;  %v1682_v40 = vsel %vm7465_vm15, %v1677_v19, %v1681_v5 }
 0x18a   : > { %v773_v38 = vmax.f32 %v741_v31, 0.0  ;;  %v2434_v39 = vunpack.c.l.b16 %v2372_v24  ;;  %v1686_v43 = vor.u32 %v1685_v35, %v1681_v5  ;;  %v1838_v27 = vunpack.c.l.b16 %v1682_v40  ;;  %v925_v35 = vld [vmem:[#allocation2 + $0xb0] sm:$0x1] }
 0x18b   : > { %v1124_v20 = vsel %vm7358_vm8, %v1116_v61, %v1123_v32  ;;  %v1337_v22 = vsel %vm7308_vm2, %v1125_v37, %v1336_v14  ;;  %v2298_v12 = vrot.slane %v7539_v59, 5  ;;  %v6645_v14 = vld [vmem:[#allocation2 + $0xc] sm:$0xff] }
 0x18c   : > { %v805_v50 = vpack.c.bf16 %v773_v38, %v773_v38  ;;  %v2455_v46 = vpack.c.b16 %v2434_v39, %v2433_v21  ;;  %v1396_v29 = vld [vmem:[#allocation2 + $0x84] sm:$0xf]  ;;  %1335 = vst.msk [vmem:[#allocation2 + $0x88] sm:$0xf] %vm815_vm5, %v1124_v20  ;;  %v656_v51 = vpop.f32.mrf.mxu0  ;;  %v1687_v52 = vrot.slane %v1686_v43, 4 }
 0x18d   : > { %v1694_v53 = vshrl.u32 %v1396_v29, 16  ;;  %v1697_v58 = vshll.u32 %v1396_v29, 16  ;;  %1338 = vst [vmem:[#allocation2 + $0x8c] sm:$0x1] %v1337_v22  ;;  %v706_v55 = vmul.f32 %v7665_v11, %v656_v51  ;;  %v2256_v2 = vld [vmem:[#allocation2 + $0x84] sm:$0xe] }
 0x18e   : > { %v1127_v60 = vshrl.u32 %v805_v50, 16  ;;  %6280 = vmatmul.msk.bf16.gmra.mxu3 %vm1878_vm12, %v2455_v46  ;;  %v1692_v6 = vsel %vm7465_vm15, %v1687_v52, %v1691_v54  ;;  %v1130_v61 = vshll.u32 %v805_v50, 16  ;;  %v6257_v25 = vrot.slane %v2256_v2, 9  ;;  %v2245_v20 = vld [vmem:[#allocation2] sm:$0xe] }
 0x18f   : > { %v742_v26 = vadd.f32 %v7636_v13, %v706_v55  ;;  %v1839_v62 = vunpack.c.l.b16 %v1692_v6  ;;  %v1696_v41 = vrot.slane %v1694_v53, 4  ;;  %v1699_v3 = vrot.slane %v1697_v58, 5  ;;  %v1343_v22 = vld [vmem:[#allocation2 + $0x98] sm:$0x1] }
 0x190   : > { %v1129_v16 = vrot.slane %v1127_v60, 7  ;;  %v926_v52 = vsel %vm7316_vm4, 0, %v925_v35  ;;  %v2301_v55 = vrot.slane %v7589_v49, 5 }
 0x191   : > { %v774_v8 = vmax.f32 %v742_v26, 0.0  ;;  %v1860_v9 = vpack.c.b16 %v1839_v62, %v1838_v27  ;;  %v1700_v47 = vor.u32 %v1699_v3, %v1696_v41  ;;  %927 = vst [vmem:[#allocation2 + $0xb0] sm:$0x1] %v926_v52  ;;  %v6246_v27 = vrot.slane %v2245_v20, 9 }
 0x192   : > { %v1132_v44 = vor.u32 %v1130_v61, %v1129_v16  ;;  %v1133_v28 = vrot.slane %v1129_v16, 4 }
 0x193   : > { %v806_v23 = vpack.c.bf16 %v774_v8, %v774_v8  ;;  %v6655_v17 = vld [vmem:[#allocation2 + $0x84] sm:$0xff]  ;;  %v1701_v30 = vrot.slane %v1700_v47, 4 }
 0x194   : > { %v1340_v7 = vsel %vm7346_vm6, %v1132_v44, %v1339_v63  ;;  %v1397_v19 = vld [vmem:[#allocation2 + $0x88] sm:$0xf]  ;;  %v659_v36 = vpop.f32.mrf.mxu0  ;;  %v1421_v0 = vld [vmem:[#allocation2 + $0x8c] sm:$0x1]  ;;  %6152 = vmatmul.msk.bf16.gmra.mxu1 %vm1878_vm12, %v1860_v9  ;;  %6241 = vmatmul.msk.bf16.gmra.mxu2 %vm1878_vm12, %v6655_v17 }
 0x195   : > { %1341 = vst [vmem:[#allocation2 + $0x90] sm:$0xf] %v1340_v7  ;;  %v2375_v5 = vrot.slane %v1397_v19, 5  ;;  %v1703_v34 = vshll.u32 %v1397_v19, 16  ;;  %v1135_v31 = vshrl.u32 %v806_v23, 16  ;;  %v707_v21 = vmul.f32 %v7665_v11, %v659_v36  ;;  %v6687_v7 = vld [vmem:[#allocation6 + $0x58] sm:$0xff] }
 0x196   : > { %v2378_v24 = vrot.slane %v1421_v0, 5  ;;  %v1707_v37 = vshrl.u32 %v1397_v19, 16  ;;  %v1138_v39 = vshll.u32 %v806_v23, 16  ;;  %v1713_v51 = vshll.u32 %v1421_v0, 16  ;;  %3901 = vmatpush.bf16.msrb.mxu3 %v6687_v7 }
 0x197   : > { %v2376_v45 = vsel %vm7388_vm11, %v6257_v25, %v2375_v5  ;;  %v2377_v10 = vrot.slane %v2375_v5, 4  ;;  %v1705_v32 = vrot.slane %v1703_v34, 5  ;;  %v1137_v38 = vrot.slane %v1135_v31, 7  ;;  %6231 = vmatmul.msk.bf16.gmra.mxu0 %vm1878_vm12, %v6645_v14  ;;  %v2180_v50 = vpop.f32.mrf.mxu2  ;;  %v872_v25 = vld [vmem:[#allocation2 + $0xb4] sm:$0x1] }
 0x198   : > { %v743_v40 = vadd.f32 %v7636_v13, %v707_v21  ;;  %v2435_v43 = vunpack.c.l.b16 %v2376_v45  ;;  %v1709_v29 = vrot.slane %v1707_v37, 4  ;;  %v1715_v49 = vrot.slane %v1713_v51, 5  ;;  %v1346_v5 = vld [vmem:[#allocation2 + $0x9c] sm:$0xf] }
 0x199   : > { %v2379_v46 = vsel %vm7388_vm11, %v2377_v10, %v2378_v24  ;;  %v1140_v54 = vor.u32 %v1138_v39, %v1137_v38  ;;  %v1142_v53 = vrot.slane %v1137_v38, 4  ;;  %v1706_v2 = vsel %vm7465_vm15, %v1701_v30, %v1705_v32 }
 0x19a   : > { %v775_v58 = vmax.f32 %v743_v40, 0.0  ;;  %v2436_v60 = vunpack.c.l.b16 %v2379_v46  ;;  %v1710_v6 = vor.u32 %v1709_v29, %v1705_v32  ;;  %v2299_v23 = vsel %vm7388_vm11, %v6246_v27, %v2298_v12 }
 0x19b   : > { %v1141_v48 = vsel %vm7358_vm8, %v1133_v28, %v1140_v54  ;;  %v1344_v16 = vsel %vm7308_vm2, %v1142_v53, %v1343_v22  ;;  %v2300_v36 = vrot.slane %v2298_v12, 4  ;;  %v873_v28 = vsel %vm7308_vm2, 0, %v872_v25 }
 0x19c   : > { %v807_v61 = vpack.c.bf16 %v775_v58, %v775_v58  ;;  %v2456_v26 = vpack.c.b16 %v2436_v60, %v2435_v43  ;;  %v1398_v62 = vld [vmem:[#allocation2 + $0x90] sm:$0xf]  ;;  %1342 = vst.msk [vmem:[#allocation2 + $0x94] sm:$0xf] %vm815_vm5, %v1141_v48  ;;  %v661_v63 = vpop.f32.mrf.mxu0  ;;  %v1711_v41 = vrot.slane %v1710_v6, 4  ;;  %v1840_v14 = vunpack.c.l.b16 %v1706_v2  ;;  %v6646_v6 = vld [vmem:[#allocation2 + $0x18] sm:$0xff] }
 0x19d   : > { %v1718_v3 = vshrl.u32 %v1398_v62, 16  ;;  %1345 = vst [vmem:[#allocation2 + $0x98] sm:$0x1] %v1344_v16  ;;  %v708_v8 = vmul.f32 %v7665_v11, %v661_v63  ;;  %v1721_v9 = vshll.u32 %v1398_v62, 16  ;;  %v2257_v24 = vld [vmem:[#allocation2 + $0x90] sm:$0xe]  ;;  %v2302_v59 = vsel %vm7388_vm11, %v2300_v36, %v2301_v55 }
 0x19e   : > { %v1144_v44 = vshrl.u32 %v807_v61, 16  ;;  %6281 = vmatmul.msk.bf16.gmra.mxu3 %vm1878_vm12, %v2456_v26  ;;  %v1147_v17 = vshll.u32 %v807_v61, 16  ;;  %v1716_v19 = vsel %vm7465_vm15, %v1711_v41, %v1715_v49  ;;  %874 = vst [vmem:[#allocation2 + $0xb4] sm:$0x1] %v873_v28  ;;  %v2413_v12 = vunpack.c.l.b16 %v2299_v23  ;;  %v928_v48 = vld [vmem:[#allocation2 + $0xbc] sm:$0x1] }
 0x19f   : > { %v744_v47 = vadd.f32 %v7636_v13, %v708_v8  ;;  %v1841_v34 = vunpack.c.l.b16 %v1716_v19  ;;  %v1720_v35 = vrot.slane %v1718_v3, 4  ;;  %v2182_v37 = vpop.f32.mrf.mxu2  ;;  %v1723_v38 = vrot.slane %v1721_v9, 5  ;;  %v1350_v3 = vld [vmem:[#allocation2 + $0xa4] sm:$0x1] }
 0x1a0   : > { %v7831_v0 = vrot.slane %v1144_v44, 7  ;;  %v1951_v31 = vpop.f32.mrf.mxu1  ;;  %v2414_v40 = vunpack.c.l.b16 %v2302_v59  ;;  %v6258_v51 = vrot.slane %v2257_v24, 9 }
 0x1a1   : > { %v2545_v21 = vpop.f32.mrf.mxu3  ;;  %v776_v10 = vmax.f32 %v744_v47, 0.0  ;;  %v2181_v32 = vadd.f32 %v2180_v50, %v1951_v31  ;;  %v1861_v39 = vpack.c.b16 %v1841_v34, %v1840_v14  ;;  %v1724_v27 = vor.u32 %v1723_v38, %v1720_v35 }
 0x1a2   : > { %v1149_v45 = vor.u32 %v1147_v17, %v7831_v0  ;;  %v7843_v60 = vpack.c.b16 %v2414_v40, %v2413_v12  ;;  %v1150_v50 = vrot.slane %v7831_v0, 4  ;;  %v929_v17 = vsel %vm7316_vm4, 0, %v928_v48 }
 0x1a3   : > { %v808_v20 = vpack.c.bf16 %v776_v10, %v776_v10  ;;  %v7841_v22 = vadd.f32 %v2545_v21, %v2181_v32  ;;  %v6656_v46 = vld [vmem:[#allocation2 + $0x90] sm:$0xff]  ;;  %930 = vst [vmem:[#allocation2 + $0xbc] sm:$0x1] %v929_v17  ;;  %v1725_v28 = vrot.slane %v1724_v27, 4 }
 0x1a4   : > { %v1347_v43 = vsel %vm7346_vm6, %v1149_v45, %v1346_v5  ;;  %v1399_v29 = vld [vmem:[#allocation2 + $0x94] sm:$0xf]  ;;  %v664_v52 = vpop.f32.mrf.mxu0  ;;  %v1422_v54 = vld [vmem:[#allocation2 + $0x98] sm:$0x1]  ;;  %6153 = vmatmul.msk.bf16.gmra.mxu1 %vm1878_vm12, %v1861_v39  ;;  %6242 = vmatmul.msk.bf16.gmra.mxu2 %vm1878_vm12, %v6656_v46  ;;  %v875_v46 = vld [vmem:[#allocation2 + $0xc0] sm:$0x1] }
 0x1a5   : > { %1348 = vst [vmem:[#allocation2 + $0x9c] sm:$0xf] %v1347_v43  ;;  %v2382_v53 = vrot.slane %v1399_v29, 5  ;;  %v1727_v58 = vshll.u32 %v1399_v29, 16  ;;  %v1152_v55 = vshrl.u32 %v808_v20, 16  ;;  %v709_v30 = vmul.f32 %v7665_v11, %v664_v52 }
 0x1a6   : > { %v2385_v61 = vrot.slane %v1422_v54, 5  ;;  %v1731_v62 = vshrl.u32 %v1399_v29, 16  ;;  %v1155_v2 = vshll.u32 %v808_v20, 16  ;;  %v1737_v23 = vshll.u32 %v1422_v54, 16 }
 0x1a7   : > { %v2384_v16 = vrot.slane %v2382_v53, 4  ;;  %v1729_v26 = vrot.slane %v1727_v58, 5  ;;  %v1154_v63 = vrot.slane %v1152_v55, 7  ;;  %v745_v41 = vadd.f32 %v7636_v13, %v709_v30  ;;  %6232 = vmatmul.msk.bf16.gmra.mxu0 %vm1878_vm12, %v6646_v6  ;;  %v2185_v5 = vpop.f32.mrf.mxu2  ;;  %v1353_v58 = vld [vmem:[#allocation2 + $0xa8] sm:$0xf] }
 0x1a8   : > { %v2383_v49 = vsel %vm7388_vm11, %v6258_v51, %v2382_v53  ;;  %v1953_v44 = vpop.f32.mrf.mxu1  ;;  %v1733_v7 = vrot.slane %v1731_v62, 4  ;;  %v1739_v32 = vrot.slane %v1737_v23, 5  ;;  %v7873_v53 = vld [vmem:[#allocation2 + $0xc] sm:$0xf]  ;;  %v876_v48 = vsel %vm7308_vm2, 0, %v875_v46 }
 0x1a9   : > { %v2547_v8 = vpop.f32.mrf.mxu3  ;;  %v2386_v9 = vsel %vm7388_vm11, %v2384_v16, %v2385_v61  ;;  %v1157_v19 = vor.u32 %v1155_v2, %v1154_v63  ;;  %v1159_v25 = vrot.slane %v1154_v63, 4  ;;  %v777_v36 = vmax.f32 %v745_v41, 0.0  ;;  %877 = vst [vmem:[#allocation2 + $0xc0] sm:$0x1] %v876_v48  ;;  %v7907_v48 = vld [vmem:[#allocation2 + $0x10] sm:$0xf] }
 0x1aa   : > { %v2183_v0 = vadd.f32 %v2182_v37, %v1953_v44  ;;  %v2437_v47 = vunpack.c.l.b16 %v2383_v49  ;;  %v2438_v34 = vunpack.c.l.b16 %v2386_v9  ;;  %v1734_v31 = vor.u32 %v1733_v7, %v1729_v26 }
 0x1ab   : > { %v1158_v21 = vsel %vm7358_vm8, %v1150_v50, %v1157_v19  ;;  %v1351_v14 = vsel %vm7308_vm2, %v1159_v25, %v1350_v3  ;;  %v809_v24 = vpack.c.bf16 %v777_v36, %v777_v36  ;;  %v1730_v40 = vsel %vm7465_vm15, %v1725_v28, %v1729_v26 }
 0x1ac   : > { %v7861_v35 = vadd.f32 %v2547_v8, %v2183_v0  ;;  %v1400_v59 = vld [vmem:[#allocation2 + $0x9c] sm:$0xf]  ;;  %1349 = vst.msk [vmem:[#allocation2 + $0xa0] sm:$0xf] %vm815_vm5, %v1158_v21  ;;  %v666_v12 = vpop.f32.mrf.mxu0  ;;  %v2457_v45 = vpack.c.b16 %v2438_v34, %v2437_v47  ;;  %v1735_v10 = vrot.slane %v1734_v31, 4  ;;  %v1842_v30 = vunpack.c.l.b16 %v1730_v40 }
 0x1ad   : > { %v1742_v37 = vshrl.u32 %v1400_v59, 16  ;;  %1352 = vst [vmem:[#allocation2 + $0xa4] sm:$0x1] %v1351_v14  ;;  %v1161_v38 = vshrl.u32 %v809_v24, 16  ;;  %v710_v39 = vmul.f32 %v7665_v11, %v666_v12  ;;  %v1745_v43 = vshll.u32 %v1400_v59, 16 }
 0x1ae   : > { %6282 = vmatmul.msk.bf16.gmra.mxu3 %vm1878_vm12, %v2457_v45  ;;  %v1740_v20 = vsel %vm7465_vm15, %v1735_v10, %v1739_v32  ;;  %v1164_v51 = vshll.u32 %v809_v24, 16  ;;  %v2258_v6 = vld [vmem:[#allocation2 + $0x9c] sm:$0xe]  ;;  %v2989_v2 = vshrl.u32 %v7873_v53, 16  ;;  %v931_v47 = vld [vmem:[#allocation2 + $0xc8] sm:$0x1] }
 0x1af   : > { %v7870_v29 = vrot.slane %v1161_v38, 7  ;;  %v746_v52 = vadd.f32 %v7636_v13, %v710_v39  ;;  %v1843_v54 = vunpack.c.l.b16 %v1740_v20  ;;  %v1744_v27 = vrot.slane %v1742_v37, 4  ;;  %v2187_v62 = vpop.f32.mrf.mxu2  ;;  %v7890_v24 = vld [vmem:[%s9013_s3] ss:$0 sm:$0xff]  ;;  %v1357_v45 = vld [vmem:[#allocation2 + $0xb0] sm:$0x1] }
 0x1b0   : > { %v1956_v50 = vpop.f32.mrf.mxu1  ;;  %v1747_v63 = vrot.slane %v1745_v43, 5  ;;  %v6259_v9 = vrot.slane %v2258_v6, 9  ;;  %v932_v40 = vsel %vm7316_vm4, 0, %v931_v47 }
 0x1b1   : > { %v2550_v55 = vpop.f32.mrf.mxu3  ;;  %v1166_v16 = vor.u32 %v1164_v51, %v7870_v29  ;;  %v778_v61 = vmax.f32 %v746_v52, 0.0  ;;  %v2186_v26 = vadd.f32 %v2185_v5, %v1956_v50  ;;  %v1862_v13 = vpack.c.b16 %v1843_v54, %v1842_v30  ;;  %933 = vst [vmem:[#allocation2 + $0xc8] sm:$0x1] %v932_v40 }
 0x1b2   : > { %v1167_v7 = vrot.slane %v7870_v29, 4  ;;  %v1748_v5 = vor.u32 %v1747_v63, %v1744_v27  ;;  %v2992_v63 = vshll.u32 %v7873_v53, 16 }
 0x1b3   : > { %v1354_v41 = vsel %vm7346_vm6, %v1166_v16, %v1353_v58  ;;  %v810_v49 = vpack.c.bf16 %v778_v61, %v778_v61  ;;  %v7881_v3 = vadd.f32 %v2550_v55, %v2186_v26  ;;  %v6657_v44 = vld [vmem:[#allocation2 + $0x9c] sm:$0xff] }
 0x1b4   : > { %v1401_v8 = vld [vmem:[#allocation2 + $0xa0] sm:$0xf]  ;;  %1355 = vst [vmem:[#allocation2 + $0xa8] sm:$0xf] %v1354_v41  ;;  %v669_v23 = vpop.f32.mrf.mxu0  ;;  %v1423_v17 = vld [vmem:[#allocation2 + $0xa4] sm:$0x1]  ;;  %6154 = vmatmul.msk.bf16.gmra.mxu1 %vm1878_vm12, %v1862_v13  ;;  %6243 = vmatmul.msk.bf16.gmra.mxu2 %vm1878_vm12, %v6657_v44 }
 0x1b5   : > { %v2389_v19 = vrot.slane %v1401_v8, 5  ;;  %v1169_v25 = vshrl.u32 %v810_v49, 16  ;;  %v1172_v36 = vshll.u32 %v810_v49, 16  ;;  %v711_v0 = vmul.f32 %v7665_v11, %v669_v23  ;;  %v7914_v41 = vld [vmem:[%s9012_s2] ss:$0 sm:$0xff] }
 0x1b6   : > { %v2392_v28 = vrot.slane %v1423_v17, 5  ;;  %v1751_v31 = vshll.u32 %v1401_v8, 16  ;;  %v1755_v21 = vshrl.u32 %v1401_v8, 16  ;;  %v1761_v12 = vshll.u32 %v1423_v17, 16 }
 0x1b7   : > { %v2391_v34 = vrot.slane %v2389_v19, 4  ;;  %v1171_v14 = vrot.slane %v1169_v25, 7  ;;  %v747_v59 = vadd.f32 %v7890_v24, %v711_v0  ;;  %6270 = vmatmul.msk.bf16.vlgmr.msrb.gmra.mxu0 %vm1878_vm12, %v7843_v60  ;;  %v2390_v11 = vsel %vm7388_vm11, %v6259_v9, %v2389_v19  ;;  %v2190_v60 = vpop.f32.mrf.mxu2 }
 0x1b8   : > { %v1958_v10 = vpop.f32.mrf.mxu1  ;;  %v1753_v38 = vrot.slane %v1751_v31, 5  ;;  %v1757_v39 = vrot.slane %v1755_v21, 4  ;;  %v2439_v51 = vunpack.c.l.b16 %v2390_v11  ;;  %v1749_v54 = vrot.slane %v1748_v5, 4  ;;  %v1360_v5 = vld [vmem:[#allocation2 + $0xb4] sm:$0xf] }
 0x1b9   : > { %v2552_v32 = vpop.f32.mrf.mxu3  ;;  %v2393_v37 = vsel %vm7388_vm11, %v2391_v34, %v2392_v28  ;;  %v1174_v43 = vor.u32 %v1172_v36, %v1171_v14  ;;  %v1176_v20 = vrot.slane %v1171_v14, 4  ;;  %v779_v46 = vmax.f32 %v747_v59, 0.0 }
 0x1ba   : > { %v2188_v29 = vadd.f32 %v2187_v62, %v1958_v10  ;;  %v2440_v52 = vunpack.c.l.b16 %v2393_v37  ;;  %v1758_v58 = vor.u32 %v1757_v39, %v1753_v38  ;;  %v1763_v62 = vrot.slane %v1761_v12, 5 }
 0x1bb   : > { %v1175_v50 = vsel %vm7358_vm8, %v1167_v7, %v1174_v43  ;;  %v1358_v55 = vsel %vm7308_vm2, %v1176_v20, %v1357_v45  ;;  %v811_v30 = vpack.c.bf16 %v779_v46, %v779_v46  ;;  %v1402_v27 = vld [vmem:[#allocation2 + $0xa8] sm:$0xf]  ;;  %v1754_v44 = vsel %vm7465_vm15, %v1749_v54, %v1753_v38 }
 0x1bc   : > { %v7905_v6 = vadd.f32 %v2552_v32, %v2188_v29  ;;  %1356 = vst.msk [vmem:[#allocation2 + $0xac] sm:$0xf] %vm815_vm5, %v1175_v50  ;;  %v671_v16 = vpop.f32.mrf.mxu0  ;;  %v2458_v61 = vpack.c.b16 %v2440_v52, %v2439_v51  ;;  %v1759_v26 = vrot.slane %v1758_v58, 4  ;;  %v1766_v8 = vshrl.u32 %v1402_v27, 16  ;;  %v2259_v12 = vld [vmem:[#allocation2 + $0xa8] sm:$0xe] }
 0x1bd   : > { %1359 = vst [vmem:[#allocation2 + $0xb0] sm:$0x1] %v1358_v55  ;;  %v1178_v13 = vshrl.u32 %v811_v30, 16  ;;  %v712_v49 = vmul.f32 %v7914_v41, %v671_v16  ;;  %v1769_v7 = vshll.u32 %v1402_v27, 16  ;;  %v2998_v23 = vshll.u32 %v7907_v48, 16  ;;  %v6705_v55 = vld [vmem:[#allocation6 + $0x68] sm:$0xff] }
 0x1be   : > { %6283 = vmatmul.msk.bf16.gmra.mxu3 %vm1878_vm12, %v2458_v61  ;;  %v1764_v9 = vsel %vm7465_vm15, %v1759_v26, %v1763_v62  ;;  %v3002_v17 = vshrl.u32 %v7907_v48, 16  ;;  %v1181_v25 = vshll.u32 %v811_v30, 16  ;;  %v1844_v28 = vunpack.c.l.b16 %v1754_v44  ;;  %4200 = vmatpush.bf16.msra.mxu0 %v6705_v55 }
 0x1bf   : > { %v7924_v19 = vrot.slane %v1178_v13, 7  ;;  %v748_v36 = vadd.f32 %v7890_v24, %v712_v49  ;;  %v1845_v0 = vunpack.c.l.b16 %v1764_v9  ;;  %v1768_v31 = vrot.slane %v1766_v8, 4  ;;  %v2192_v11 = vpop.f32.mrf.mxu2  ;;  %v1364_v49 = vld [vmem:[#allocation2 + $0xbc] sm:$0x1] }
 0x1c0   : > { %v1961_v47 = vpop.f32.mrf.mxu1  ;;  %v1771_v45 = vrot.slane %v1769_v7, 5  ;;  %v7930_v32 = vrot.slane %v2989_v2, 4  ;;  %v7932_v37 = vrot.slane %v2992_v63, 5  ;;  %v7934_v38 = vrot.slane %v2998_v23, 5 }
 0x1c1   : > { %v2555_v34 = vpop.f32.mrf.mxu3  ;;  %v1183_v21 = vor.u32 %v1181_v25, %v7924_v19  ;;  %v780_v14 = vmax.f32 %v748_v36, 0.0  ;;  %v2191_v59 = vadd.f32 %v2190_v60, %v1961_v47  ;;  %v1863_v10 = vpack.c.b16 %v1845_v0, %v1844_v28 }
 0x1c2   : > { %v7940_v29 = vrot.slane %v3002_v17, 4  ;;  %v6260_v53 = vrot.slane %v2259_v12, 9  ;;  %v1184_v52 = vrot.slane %v7924_v19, 4  ;;  %v1772_v50 = vor.u32 %v1771_v45, %v1768_v31  ;;  %v6704_v19 = vld [vmem:[#allocation6 + $0x60] sm:$0xff] }
 0x1c3   : > { %v1361_v39 = vsel %vm7346_vm6, %v1183_v21, %v1360_v5  ;;  %v812_v40 = vpack.c.bf16 %v780_v14, %v780_v14  ;;  %v7938_v43 = vadd.f32 %v2555_v34, %v2191_v59  ;;  %v6658_v20 = vld [vmem:[#allocation2 + $0xa8] sm:$0xff]  ;;  %4201 = vmatpush.bf16.msra.mxu0 %v6704_v19 }
 0x1c4   : > { %v1403_v46 = vld [vmem:[#allocation2 + $0xac] sm:$0xf]  ;;  %1362 = vst [vmem:[#allocation2 + $0xb4] sm:$0xf] %v1361_v39  ;;  %v674_v60 = vpop.f32.mrf.mxu0  ;;  %v1424_v51 = vld [vmem:[#allocation2 + $0xb0] sm:$0x1]  ;;  %6155 = vmatmul.msk.bf16.gmra.mxu1 %vm1878_vm12, %v1863_v10  ;;  %6244 = vmatmul.msk.bf16.gmra.mxu2 %vm1878_vm12, %v6658_v20 }
 0x1c5   : > { %v2396_v2 = vrot.slane %v1403_v46, 5  ;;  %v1186_v54 = vshrl.u32 %v812_v40, 16  ;;  %v713_v58 = vmul.f32 %v7914_v41, %v674_v60  ;;  %v2399_v27 = vrot.slane %v1424_v51, 5 }
 0x1c6   : > { %v1775_v16 = vshll.u32 %v1403_v46, 16  ;;  %v1779_v61 = vshrl.u32 %v1403_v46, 16  ;;  %v1189_v62 = vshll.u32 %v812_v40, 16  ;;  %v1785_v17 = vshll.u32 %v1424_v51, 16 }
 0x1c7   : > { %v2398_v30 = vrot.slane %v2396_v2, 4  ;;  %v1188_v26 = vrot.slane %v1186_v54, 7  ;;  %v749_v63 = vadd.f32 %v7890_v24, %v713_v58  ;;  %6271 = vmatmul.msk.bf16.gmra.mxu0 %vm1878_vm12, %v7414_v1  ;;  %v2397_v13 = vsel %vm7388_vm11, %v6260_v53, %v2396_v2  ;;  %v2195_v47 = vpop.f32.mrf.mxu2  ;;  %v6686_v2 = vld [vmem:[#allocation6 + $0x50] sm:$0xff] }
 0x1c8   : > { %v1963_v44 = vpop.f32.mrf.mxu1  ;;  %v1777_v7 = vrot.slane %v1775_v16, 5  ;;  %v1781_v23 = vrot.slane %v1779_v61, 4  ;;  %v2441_v1 = vunpack.c.l.b16 %v2397_v13  ;;  %v1773_v28 = vrot.slane %v1772_v50, 4  ;;  %v6709_v50 = vld [vmem:[#allocation6 + $0x88] sm:$0xff]  ;;  %v7971_v16 = vld [vmem:[#allocation2 + $0x14] sm:$0x1]  ;;  %3902 = vmatpush.bf16.msrb.mxu3 %v6686_v2 }
 0x1c9   : > { %v2557_v8 = vpop.f32.mrf.mxu3  ;;  %v2400_v9 = vsel %vm7388_vm11, %v2398_v30, %v2399_v27  ;;  %v1191_v25 = vor.u32 %v1189_v62, %v1188_v26  ;;  %v1193_v36 = vrot.slane %v1188_v26, 4  ;;  %v781_v0 = vmax.f32 %v749_v63, 0.0  ;;  %v1367_v61 = vld [vmem:[#allocation2 + $0xc0] sm:$0xf]  ;;  %5276 = vmatpush.bf16.msra.mxu2 %v6709_v50 }
 0x1ca   : > { %v2193_v5 = vadd.f32 %v2192_v11, %v1963_v44  ;;  %v2442_v34 = vunpack.c.l.b16 %v2400_v9  ;;  %v1782_v31 = vor.u32 %v1781_v23, %v1777_v7  ;;  %v1778_v11 = vsel %vm7465_vm15, %v1773_v28, %v1777_v7 }
 0x1cb   : > { %v1192_v21 = vsel %vm7358_vm8, %v1184_v52, %v1191_v25  ;;  %v1365_v14 = vsel %vm7308_vm2, %v1193_v36, %v1364_v49  ;;  %v813_v59 = vpack.c.bf16 %v781_v0, %v781_v0  ;;  %v1404_v45 = vld [vmem:[#allocation2 + $0xb4] sm:$0xf]  ;;  %v1787_v20 = vrot.slane %v1785_v17, 5 }
 0x1cc   : > { %v7957_v12 = vadd.f32 %v2557_v8, %v2193_v5  ;;  %1363 = vst.msk [vmem:[#allocation2 + $0xb8] sm:$0xf] %vm815_vm5, %v1192_v21  ;;  %v676_v10 = vpop.f32.mrf.mxu0  ;;  %v2459_v39 = vpack.c.b16 %v2442_v34, %v2441_v1  ;;  %v1783_v40 = vrot.slane %v1782_v31, 4  ;;  %v1790_v53 = vshrl.u32 %v1404_v45, 16  ;;  %v2260_v8 = vld [vmem:[#allocation2 + $0xb4] sm:$0xe] }
 0x1cd   : > { %1366 = vst [vmem:[#allocation2 + $0xbc] sm:$0x1] %v1365_v14  ;;  %v1195_v46 = vshrl.u32 %v813_v59, 16  ;;  %v1198_v60 = vshll.u32 %v813_v59, 16  ;;  %v714_v51 = vmul.f32 %v7914_v41, %v676_v10  ;;  %v1793_v54 = vshll.u32 %v1404_v45, 16  ;;  %v6707_v59 = vld [vmem:[#allocation6 + $0x78] sm:$0xff] }
 0x1ce   : > { %6284 = vmatmul.msk.bf16.gmra.mxu3 %vm1878_vm12, %v2459_v39  ;;  %v1788_v52 = vsel %vm7465_vm15, %v1783_v40, %v1787_v20  ;;  %v2995_v58 = vor.u32 %v7932_v37, %v7930_v32  ;;  %v3005_v41 = vor.u32 %v7940_v29, %v7934_v38  ;;  %v1846_v63 = vunpack.c.l.b16 %v1778_v11  ;;  %4866 = vmatpush.bf16.msra.mxu1 %v6707_v59 }
 0x1cf   : > { %v7968_v55 = vrot.slane %v1195_v46, 7  ;;  %v750_v30 = vadd.f32 %v7890_v24, %v714_v51  ;;  %v1847_v27 = vunpack.c.l.b16 %v1788_v52  ;;  %v1792_v13 = vrot.slane %v1790_v53, 4  ;;  %v2197_v44 = vpop.f32.mrf.mxu2  ;;  %v7993_v51 = vld [vmem:[#allocation2 + $0x1c] sm:$0xf]  ;;  %v1371_v53 = vld [vmem:[#allocation2 + $0xc8] sm:$0x1] }
 0x1d0   : > { %v1966_v26 = vpop.f32.mrf.mxu1  ;;  %v1795_v24 = vrot.slane %v1793_v54, 5  ;;  %v7976_v7 = vrot.slane %v2995_v58, 4  ;;  %v3008_v23 = vshll.u32 %v7971_v16, 16  ;;  %v3672_v29 = vrot.slane %v7907_v48, 5 }
 0x1d1   : > { %v2560_v62 = vpop.f32.mrf.mxu3  ;;  %v1200_v32 = vor.u32 %v1198_v60, %v7968_v55  ;;  %v782_v37 = vmax.f32 %v750_v30, 0.0  ;;  %v2196_v49 = vadd.f32 %v2195_v47, %v1966_v26  ;;  %v1864_v9 = vpack.c.b16 %v1847_v27, %v1846_v63 }
 0x1d2   : > { %v3006_v5 = vrot.slane %v3005_v41, 4  ;;  %v6261_v34 = vrot.slane %v2260_v8, 9  ;;  %v1796_v42 = vor.u32 %v1795_v24, %v1792_v13  ;;  %v1201_v40 = vrot.slane %v7968_v55, 4  ;;  %v2943_v24 = vld [vmem:[#allocation2 + $0x18] sm:$0xf] }
 0x1d3   : > { %v1368_v17 = vsel %vm7346_vm6, %v1200_v32, %v1367_v61  ;;  %v814_v19 = vpack.c.bf16 %v782_v37, %v782_v37  ;;  %v7982_v25 = vadd.f32 %v2560_v62, %v2196_v49  ;;  %v6659_v36 = vld [vmem:[#allocation2 + $0xb4] sm:$0xff]  ;;  %v3010_v60 = vrot.slane %v3008_v23, 5 }
 0x1d4   : > { %v1405_v0 = vld [vmem:[#allocation2 + $0xb8] sm:$0xf]  ;;  %1369 = vst [vmem:[#allocation2 + $0xc0] sm:$0xf] %v1368_v17  ;;  %v7984_v47 = vpop.f32.mrf.mxu0  ;;  %v1425_v1 = vld [vmem:[#allocation2 + $0xbc] sm:$0x1]  ;;  %6156 = vmatmul.msk.bf16.gmra.mxu1 %vm1878_vm12, %v1864_v9  ;;  %6245 = vmatmul.msk.bf16.gmra.mxu2 %vm1878_vm12, %v6659_v36  ;;  %v3001_v36 = vsel %vm7465_vm15, %v7976_v7, %v7934_v38 }
 0x1d5   : > { %v2403_v28 = vrot.slane %v1405_v0, 5  ;;  %v1203_v31 = vshrl.u32 %v814_v19, 16  ;;  %v1206_v21 = vshll.u32 %v814_v19, 16  ;;  %v1799_v14 = vshll.u32 %v1405_v0, 16  ;;  %v2945_v7 = vld [vmem:[#allocation2 + $0x20] sm:$0x1] }
 0x1d6   : > { %v2406_v39 = vrot.slane %v1425_v1, 5  ;;  %v1803_v11 = vshrl.u32 %v1405_v0, 16  ;;  %v1809_v30 = vshll.u32 %v1425_v1, 16  ;;  %v3011_v63 = vsel %vm7465_vm15, %v3006_v5, %v3010_v60 }
 0x1d7   : > { %v2404_v45 = vsel %vm7388_vm11, %v6261_v34, %v2403_v28  ;;  %v2405_v10 = vrot.slane %v2403_v28, 4  ;;  %v1205_v20 = vrot.slane %v1203_v31, 7  ;;  %6272 = vmatmul.msk.bf16.gmra.mxu0 %vm1878_vm12, %v7447_v4  ;;  %v1801_v46 = vrot.slane %v1799_v14, 5  ;;  %v2200_v61 = vpop.f32.mrf.mxu2 }
 0x1d8   : > { %v1968_v2 = vpop.f32.mrf.mxu1  ;;  %v2443_v58 = vunpack.c.l.b16 %v2404_v45  ;;  %v1805_v50 = vrot.slane %v1803_v11, 4  ;;  %v1797_v4 = vrot.slane %v1796_v42, 4  ;;  %v3022_v13 = vshll.u32 %v7993_v51, 16 }
 0x1d9   : > { %v2562_v52 = vpop.f32.mrf.mxu3  ;;  %v2407_v54 = vsel %vm7388_vm11, %v2405_v10, %v2406_v39  ;;  %v1208_v27 = vor.u32 %v1206_v21, %v1205_v20  ;;  %v1210_v55 = vrot.slane %v1205_v20, 4  ;;  %v2198_v41 = vadd.f32 %v2197_v44, %v1968_v2  ;;  %v3606_v39 = vld [vmem:[#allocation2 + $0xc] sm:$0xe] }
 0x1da   : > { %v2444_v26 = vunpack.c.l.b16 %v2407_v54  ;;  %v1806_v62 = vor.u32 %v1805_v50, %v1801_v46  ;;  %v1802_v9 = vsel %vm7465_vm15, %v1797_v4, %v1801_v46  ;;  %v1811_v17 = vrot.slane %v1809_v30, 5  ;;  %v6688_v50 = vld [vmem:[#allocation2 + $0x18] sm:$0xff] }
 0x1db   : > { %v1209_v32 = vsel %vm7358_vm8, %v1201_v40, %v1208_v27  ;;  %v1372_v37 = vsel %vm7308_vm2, %v1210_v55, %v1371_v53  ;;  %v8004_v49 = vadd.f32 %v2562_v52, %v2198_v41  ;;  %v3026_v19 = vshrl.u32 %v7993_v51, 16 }
 0x1dc   : > { %v2460_v8 = vpack.c.b16 %v2444_v26, %v2443_v58  ;;  %1370 = vst.msk [vmem:[#allocation2 + $0xc4] sm:$0xf] %vm815_vm5, %v1209_v32  ;;  %v8007_v44 = vpop.f32.mrf.mxu0  ;;  %v1807_v23 = vrot.slane %v1806_v62, 4  ;;  %v3378_v0 = vunpack.c.l.b16 %v3011_v63  ;;  %v1848_v5 = vunpack.c.l.b16 %v1802_v9  ;;  %v8035_v62 = vld [vmem:[#allocation2 + $0x28] sm:$0xf] }
 0x1dd   : > { %1373 = vst [vmem:[#allocation2 + $0xc8] sm:$0x1] %v1372_v37  ;;  %v3013_v34 = vshrl.u32 %v2943_v24, 16  ;;  %v3016_v28 = vshll.u32 %v2943_v24, 16  ;;  %v3674_v21 = vrot.slane %v3672_v29, 4  ;;  %v3024_v42 = vrot.slane %v3022_v13, 5 }
 0x1de   : > { %6285 = vmatmul.msk.bf16.gmra.mxu3 %vm1878_vm12, %v2460_v8  ;;  %v1812_v57 = vsel %vm7465_vm15, %v1807_v23, %v1811_v17  ;;  %v3028_v14 = vrot.slane %v3026_v19, 4  ;;  %v3377_v10 = vunpack.c.l.b16 %v3001_v36  ;;  %v3675_v40 = vrot.slane %v7971_v16, 5  ;;  %v2946_v9 = vld [vmem:[#allocation2 + $0x24] sm:$0xf] }
 0x1df   : > { %v1849_v1 = vunpack.c.l.b16 %v1812_v57  ;;  %v2202_v45 = vpop.f32.mrf.mxu2  ;;  %v3015_v46 = vrot.slane %v3013_v34, 4  ;;  %v3018_v60 = vrot.slane %v3016_v28, 5  ;;  %v6398_v2 = vrot.slane %v3606_v39, 9  ;;  %v6666_v39 = vld [vmem:[#allocation2 + $0xc] sm:$0xff] }
 0x1e0   : > { %v3409_v38 = vpack.c.b16 %v3378_v0, %v3377_v10  ;;  %v3676_v52 = vsel %vm7388_vm11, %v3674_v21, %v3675_v40  ;;  %v3029_v54 = vor.u32 %v3028_v14, %v3024_v42  ;;  %v3032_v30 = vshll.u32 %v2945_v7, 16  ;;  %v3607_v14 = vld [vmem:[#allocation2 + $0x18] sm:$0xe]  ;;  %v2948_v40 = vld [vmem:[#allocation2 + $0x2c] sm:$0x1] }
 0x1e1   : > { %v2565_v31 = vpop.f32.mrf.mxu3  ;;  %v1865_v59 = vpack.c.b16 %v1849_v1, %v1848_v5  ;;  %v1971_v11 = vpop.f32.mrf.mxu1  ;;  %v3673_v16 = vsel %vm7388_vm11, %v6398_v2, %v3672_v29  ;;  %v3788_v27 = vunpack.c.l.b16 %v3676_v52  ;;  %v3019_v55 = vor.u32 %v3018_v60, %v3015_v46 }
 0x1e2   : > { %v2201_v20 = vadd.f32 %v2200_v61, %v1971_v11  ;;  %v3030_v61 = vrot.slane %v3029_v54, 4  ;;  %v3787_v4 = vunpack.c.l.b16 %v3673_v16  ;;  %v3034_v13 = vrot.slane %v3032_v30, 5 }
 0x1e3   : > { %v3020_v8 = vrot.slane %v3019_v55, 4  ;;  %v3679_v24 = vrot.slane %v7993_v51, 5  ;;  %v3046_v23 = vshll.u32 %v8035_v62, 16  ;;  %v3050_v17 = vshrl.u32 %v8035_v62, 16 }
 0x1e4   : > { %v8022_v53 = vpop.f32.mrf.mxu0  ;;  %v8026_v58 = vadd.f32 %v2565_v31, %v2201_v20  ;;  %6157 = vmatmul.msk.bf16.gmra.mxu1 %vm1878_vm12, %v1865_v59  ;;  %6382 = vmatmul.msk.bf16.vlgmr.msrb.gmra.mxu2 %vm1878_vm12, %v3409_v38  ;;  %v3819_v37 = vpack.c.b16 %v3788_v27, %v3787_v4  ;;  %v3035_v29 = vsel %vm7465_vm15, %v3030_v61, %v3034_v13  ;;  %v3037_v0 = vshrl.u32 %v2946_v9, 16 }
 0x1e5   : > { %v3025_v57 = vsel %vm7465_vm15, %v3020_v8, %v3024_v42  ;;  %v3380_v36 = vunpack.c.l.b16 %v3035_v29  ;;  %v3040_v5 = vshll.u32 %v2946_v9, 16  ;;  %v3681_v34 = vrot.slane %v3679_v24, 4  ;;  %v2949_v9 = vld [vmem:[#allocation2 + $0x30] sm:$0xf] }
 0x1e6   : > { %v3048_v28 = vrot.slane %v3046_v23, 5  ;;  %v3052_v31 = vrot.slane %v3050_v17, 4  ;;  %v3379_v21 = vunpack.c.l.b16 %v3025_v57  ;;  %v3039_v20 = vrot.slane %v3037_v0, 4 }
 0x1e7   : > { %6510 = vmatmul.msk.bf16.vlgmr.msra.gmra.mxu0 %vm1878_vm12, %v6688_v50  ;;  %v2205_v26 = vpop.f32.mrf.mxu2  ;;  %v3042_v38 = vrot.slane %v3040_v5, 5  ;;  %v6399_v42 = vrot.slane %v3607_v14, 9  ;;  %v3056_v50 = vshll.u32 %v2948_v40, 16  ;;  %v3061_v5 = vshrl.u32 %v2949_v9, 16 }
 0x1e8   : > { %v3410_v11 = vpack.c.b16 %v3380_v36, %v3379_v21  ;;  %v3053_v2 = vor.u32 %v3052_v31, %v3048_v28 }
 0x1e9   : > { %v2567_v41 = vpop.f32.mrf.mxu3  ;;  %v1973_v63 = vpop.f32.mrf.mxu1  ;;  %v3680_v54 = vsel %vm7388_vm11, %v6399_v42, %v3679_v24  ;;  %v3043_v30 = vor.u32 %v3042_v38, %v3039_v20  ;;  %v3686_v24 = vrot.slane %v8035_v62, 5  ;;  %v2951_v38 = vld [vmem:[#allocation2 + $0x38] sm:$0x1]  ;;  %v3063_v42 = vrot.slane %v3061_v5, 4 }
 0x1ea   : > { %v2203_v32 = vadd.f32 %v2202_v45, %v1973_v63  ;;  %v3682_v45 = vrot.slane %v2945_v7, 5  ;;  %v6689_v7 = vld [vmem:[#allocation2 + $0x24] sm:$0xff]  ;;  %v3054_v55 = vrot.slane %v3053_v2, 4  ;;  %v3789_v61 = vunpack.c.l.b16 %v3680_v54 }
 0x1eb   : > { %v3058_v63 = vrot.slane %v3056_v50, 5  ;;  %v3688_v31 = vrot.slane %v3686_v24, 4 }
 0x1ec   : > { %v8037_v48 = vpop.f32.mrf.mxu0  ;;  %v8044_v19 = vadd.f32 %v2567_v41, %v2203_v32  ;;  %v3683_v60 = vsel %vm7388_vm11, %v3681_v34, %v3682_v45 }
 0x1ed   : > { %v3790_v16 = vunpack.c.l.b16 %v3683_v60  ;;  %v3059_v29 = vsel %vm7465_vm15, %v3054_v55, %v3058_v63 }
 0x1ee   : > { %6422 = vmatmul.msk.bf16.vlgmr.msrb.gmra.mxu3 %vm1878_vm12, %v3819_v37  ;;  %v3044_v37 = vrot.slane %v3043_v30, 4  ;;  %v3382_v0 = vunpack.c.l.b16 %v3059_v29 }
 0x1ef   : > { %v2207_v51 = vpop.f32.mrf.mxu2  ;;  %v3820_v32 = vpack.c.b16 %v3790_v16, %v3789_v61 }
 0x1f0   : > { %v3049_v36 = vsel %vm7465_vm15, %v3044_v37, %v3048_v28 }
 0x1f1   : > { %v2570_v1 = vpop.f32.mrf.mxu3  ;;  %v1976_v59 = vpop.f32.mrf.mxu1  ;;  %v3381_v14 = vunpack.c.l.b16 %v3049_v36 }
 0x1f2   : > { %v2206_v10 = vadd.f32 %v2205_v26, %v1976_v59  ;;  %v8060_v26 = vld [vmem:[#allocation2 + $0x34] sm:$0xf]  ;;  %v3608_v59 = vld [vmem:[#allocation2 + $0x24] sm:$0xe] }
 0x1f3   : > { %v3070_v23 = vshll.u32 %v8060_v26, 16  ;;  %v3074_v17 = vshrl.u32 %v8060_v26, 16  ;;  %v3411_v20 = vpack.c.b16 %v3382_v0, %v3381_v14  ;;  %v6400_v28 = vrot.slane %v3608_v59, 9  ;;  %v2952_v0 = vld [vmem:[#allocation2 + $0x3c] sm:$0xf] }
 0x1f4   : > { %v8049_v46 = vpop.f32.mrf.mxu0  ;;  %v8053_v52 = vadd.f32 %v2570_v1, %v2206_v10  ;;  %6358 = vmatmul.msk.bf16.vlgmr.msrb.gmra.mxu1 %vm1878_vm12, %v6666_v39  ;;  %6383 = vmatmul.msk.bf16.gmra.mxu2 %vm1878_vm12, %v3410_v11  ;;  %v3064_v1 = vshll.u32 %v2949_v9, 16  ;;  %v3689_v10 = vrot.slane %v2948_v40, 5  ;;  %v6667_v11 = vld [vmem:[#allocation2 + $0x18] sm:$0xff]  ;;  %v6690_v40 = vld [vmem:[#allocation2 + $0x30] sm:$0xff]  ;;  %v3693_v36 = vrot.slane %v8060_v26, 5 }
 0x1f5   : > { %v3076_v21 = vrot.slane %v3074_v17, 4  ;;  %v3687_v30 = vsel %vm7388_vm11, %v6400_v28, %v3686_v24  ;;  %v3085_v14 = vshrl.u32 %v2952_v0, 16  ;;  %v3088_v59 = vshll.u32 %v2952_v0, 16 }
 0x1f6   : > { %v3066_v60 = vrot.slane %v3064_v1, 5  ;;  %v3695_v26 = vrot.slane %v3693_v36, 4 }
 0x1f7   : > { %6511 = vmatmul.msk.bf16.gmra.mxu0 %vm1878_vm12, %v6689_v7  ;;  %v2210_v41 = vpop.f32.mrf.mxu2  ;;  %v3690_v7 = vsel %vm7388_vm11, %v3688_v31, %v3689_v10 }
 0x1f8   : > { %v3792_v55 = vunpack.c.l.b16 %v3690_v7 }
 0x1f9   : > { %v2572_v27 = vpop.f32.mrf.mxu3  ;;  %v1978_v4 = vpop.f32.mrf.mxu1 }
 0x1fa   : > { %v2208_v13 = vadd.f32 %v2207_v51, %v1978_v4  ;;  %v3072_v51 = vrot.slane %v3070_v23, 5 }
 0x1fc   : > { %v8062_v8 = vpop.f32.mrf.mxu0  ;;  %v8069_v57 = vadd.f32 %v2572_v27, %v2208_v13  ;;  %v3077_v54 = vor.u32 %v3076_v21, %v3072_v51  ;;  %v3080_v27 = vshll.u32 %v2951_v38, 16  ;;  %v3791_v13 = vunpack.c.l.b16 %v3687_v30 }
 0x1fd   : > { %v3090_v30 = vrot.slane %v3088_v59, 5  ;;  %v2955_v59 = vld [vmem:[#allocation2 + $0x48] sm:$0xf] }
 0x1fe   : > { %6423 = vmatmul.msk.bf16.gmra.mxu3 %vm1878_vm12, %v3820_v32  ;;  %v3078_v4 = vrot.slane %v3077_v54, 4  ;;  %v8086_v32 = vld [vmem:[#allocation2 + $0x40] sm:$0xf]  ;;  %v3821_v9 = vpack.c.b16 %v3792_v55, %v3791_v13  ;;  %v2954_v54 = vld [vmem:[#allocation2 + $0x44] sm:$0x1] }
 0x1ff   : > { %v2212_v62 = vpop.f32.mrf.mxu2  ;;  %v3094_v5 = vshll.u32 %v8086_v32, 16  ;;  %v3098_v1 = vshrl.u32 %v8086_v32, 16  ;;  %v3104_v13 = vshll.u32 %v2954_v54, 16 }
 0x201   : > { %v2575_v34 = vpop.f32.mrf.mxu3  ;;  %v1981_v45 = vpop.f32.mrf.mxu1  ;;  %v3096_v10 = vrot.slane %v3094_v5, 5 }
 0x202   : > { %v2211_v39 = vadd.f32 %v2210_v41, %v1981_v45  ;;  %v3067_v41 = vor.u32 %v3066_v60, %v3063_v42  ;;  %v3609_v42 = vld [vmem:[#allocation2 + $0x30] sm:$0xe] }
 0x204   : > { %v2165_v2 = vpop.f32.mrf.mxu0  ;;  %v8076_v50 = vadd.f32 %v2575_v34, %v2211_v39  ;;  %6359 = vmatmul.msk.bf16.gmra.mxu1 %vm1878_vm12, %v6667_v11  ;;  %6384 = vmatmul.msk.bf16.gmra.mxu2 %vm1878_vm12, %v3411_v20  ;;  %v3068_v23 = vrot.slane %v3067_v41, 4  ;;  %v3100_v39 = vrot.slane %v3098_v1, 4 }
 0x205   : > { %v8080_v16 = vadd.f32 %v2165_v2, %v7984_v47  ;;  %v3082_v47 = vrot.slane %v3080_v27, 5  ;;  %v3696_v2 = vrot.slane %v2951_v38, 5  ;;  %v6691_v38 = vld [vmem:[#allocation2 + $0x3c] sm:$0xff] }
 0x206   : > { %v3073_v21 = vsel %vm7465_vm15, %v3068_v23, %v3072_v51  ;;  %v6401_v51 = vrot.slane %v3609_v42, 9  ;;  %v3101_v41 = vor.u32 %v3100_v39, %v3096_v10 }
 0x207   : > { %6512 = vmatmul.msk.bf16.gmra.mxu0 %vm1878_vm12, %v6690_v40  ;;  %v2215_v63 = vpop.f32.mrf.mxu2  ;;  %v3083_v24 = vsel %vm7465_vm15, %v3078_v4, %v3082_v47  ;;  %v3383_v20 = vunpack.c.l.b16 %v3073_v21  ;;  %v3087_v40 = vrot.slane %v3085_v14, 4  ;;  %v3697_v55 = vsel %vm7388_vm11, %v3695_v26, %v3696_v2 }
 0x208   : > { %v3700_v14 = vrot.slane %v8086_v32, 5 }
 0x209   : > { %v2577_v61 = vpop.f32.mrf.mxu3  ;;  %v1983_v37 = vpop.f32.mrf.mxu1  ;;  %v3091_v47 = vor.u32 %v3090_v30, %v3087_v40 }
 0x20a   : > { %v2213_v29 = vadd.f32 %v2212_v62, %v1983_v37  ;;  %v3384_v62 = vunpack.c.l.b16 %v3083_v24  ;;  %v3794_v37 = vunpack.c.l.b16 %v3697_v55  ;;  %v8113_v24 = vld [vmem:[#allocation2 + $0x4c] sm:$0xf]  ;;  %v3702_v32 = vrot.slane %v3700_v14, 4 }
 0x20b   : > { %v3092_v21 = vrot.slane %v3091_v47, 4  ;;  %v3122_v26 = vshrl.u32 %v8113_v24, 16  ;;  %v3703_v55 = vrot.slane %v2954_v54, 5  ;;  %v6692_v54 = vld [vmem:[#allocation2 + $0x48] sm:$0xff] }
 0x20c   : > { %v2167_v17 = vpop.f32.mrf.mxu0  ;;  %v8093_v34 = vadd.f32 %v2577_v61, %v2213_v29  ;;  %v3412_v7 = vpack.c.b16 %v3384_v62, %v3383_v20 }
 0x20d   : > { %v8096_v31 = vadd.f32 %v2167_v17, %v8007_v44  ;;  %v6668_v44 = vld [vmem:[#allocation2 + $0x24] sm:$0xff]  ;;  %v3124_v40 = vrot.slane %v3122_v26, 4 }
 0x20e   : > { %6424 = vmatmul.msk.bf16.gmra.mxu3 %vm1878_vm12, %v3821_v9  ;;  %v3102_v9 = vrot.slane %v3101_v41, 4 }
 0x20f   : > { %v2217_v11 = vpop.f32.mrf.mxu2 }
 0x211   : > { %v2580_v45 = vpop.f32.mrf.mxu3  ;;  %v1986_v60 = vpop.f32.mrf.mxu1 }
 0x212   : > { %v2216_v28 = vadd.f32 %v2215_v63, %v1986_v60  ;;  %v3694_v63 = vsel %vm7388_vm11, %v6401_v51, %v3693_v36  ;;  %v3109_v60 = vshrl.u32 %v2955_v59, 16 }
 0x213   : > { %v3793_v17 = vunpack.c.l.b16 %v3694_v63 }
 0x214   : > { %v2170_v27 = vpop.f32.mrf.mxu0  ;;  %v8103_v61 = vadd.f32 %v2580_v45, %v2216_v28  ;;  %6360 = vmatmul.msk.bf16.gmra.mxu1 %vm1878_vm12, %v6668_v44  ;;  %6385 = vmatmul.msk.bf16.gmra.mxu2 %vm1878_vm12, %v3412_v7  ;;  %v3118_v45 = vshll.u32 %v8113_v24, 16  ;;  %v3610_v28 = vld [vmem:[#allocation2 + $0x3c] sm:$0xe]  ;;  %v3112_v44 = vshll.u32 %v2955_v59, 16  ;;  %v3111_v47 = vrot.slane %v3109_v60, 4 }
 0x215   : > { %v8107_v4 = vadd.f32 %v2170_v27, %v8022_v53  ;;  %v3106_v53 = vrot.slane %v3104_v13, 5  ;;  %v3822_v1 = vpack.c.b16 %v3794_v37, %v3793_v17  ;;  %v6402_v63 = vrot.slane %v3610_v28, 9  ;;  %v2957_v13 = vld [vmem:[#allocation2 + $0x50] sm:$0x1] }
 0x216   : > { %v3120_v7 = vrot.slane %v3118_v45, 5  ;;  %v8140_v45 = vld [vmem:[#allocation2 + $0x58] sm:$0xf]  ;;  %v3707_v60 = vrot.slane %v8113_v24, 5 }
 0x217   : > { %6513 = vmatmul.msk.bf16.gmra.mxu0 %vm1878_vm12, %v6691_v38  ;;  %v2220_v23 = vpop.f32.mrf.mxu2  ;;  %v3107_v36 = vsel %vm7465_vm15, %v3102_v9, %v3106_v53  ;;  %v3128_v53 = vshll.u32 %v2957_v13, 16 }
 0x218   : > { %v3386_v42 = vunpack.c.l.b16 %v3107_v36  ;;  %v3125_v9 = vor.u32 %v3124_v40, %v3120_v7 }
 0x219   : > { %v2582_v29 = vpop.f32.mrf.mxu3  ;;  %v1988_v0 = vpop.f32.mrf.mxu1 }
 0x21a   : > { %v2218_v5 = vadd.f32 %v2217_v11, %v1988_v0  ;;  %v3097_v11 = vsel %vm7465_vm15, %v3092_v21, %v3096_v10  ;;  %v3704_v10 = vsel %vm7388_vm11, %v3702_v32, %v3703_v55  ;;  %v3142_v32 = vshll.u32 %v8140_v45, 16 }
 0x21b   : > { %v3385_v27 = vunpack.c.l.b16 %v3097_v11  ;;  %v3709_v55 = vrot.slane %v3707_v60, 4 }
 0x21c   : > { %v2172_v62 = vpop.f32.mrf.mxu0  ;;  %v8120_v39 = vadd.f32 %v2582_v29, %v2218_v5  ;;  %v3114_v29 = vrot.slane %v3112_v44, 5  ;;  %v3796_v5 = vunpack.c.l.b16 %v3704_v10  ;;  %v3146_v44 = vshrl.u32 %v8140_v45, 16 }
 0x21d   : > { %v8123_v20 = vadd.f32 %v2172_v62, %v8037_v48  ;;  %v6669_v48 = vld [vmem:[#allocation2 + $0x30] sm:$0xff]  ;;  %v3413_v38 = vpack.c.b16 %v3386_v42, %v3385_v27  ;;  %v3126_v62 = vrot.slane %v3125_v9, 4 }
 0x21e   : > { %6425 = vmatmul.msk.bf16.gmra.mxu3 %vm1878_vm12, %v3822_v1  ;;  %v3115_v21 = vor.u32 %v3114_v29, %v3111_v47 }
 0x21f   : > { %v2222_v30 = vpop.f32.mrf.mxu2 }
 0x220   : > { %v3116_v28 = vrot.slane %v3115_v21, 4 }
 0x221   : > { %v2585_v2 = vpop.f32.mrf.mxu3  ;;  %v1991_v51 = vpop.f32.mrf.mxu1 }
 0x222   : > { %v2221_v41 = vadd.f32 %v2220_v23, %v1991_v51  ;;  %v3701_v23 = vsel %vm7388_vm11, %v6402_v63, %v3700_v14  ;;  %v2958_v51 = vld [vmem:[#allocation2 + $0x54] sm:$0xf]  ;;  %v3121_v24 = vsel %vm7465_vm15, %v3116_v28, %v3120_v7  ;;  %v3144_v63 = vrot.slane %v3142_v32, 5 }
 0x223   : > { %v3795_v59 = vunpack.c.l.b16 %v3701_v23  ;;  %v3387_v29 = vunpack.c.l.b16 %v3121_v24  ;;  %v6670_v23 = vld [vmem:[#allocation2 + $0x3c] sm:$0xff]  ;;  %v8167_v24 = vld [vmem:[#allocation2 + $0x64] sm:$0xf] }
 0x224   : > { %v2175_v37 = vpop.f32.mrf.mxu0  ;;  %v8130_v17 = vadd.f32 %v2585_v2, %v2221_v41  ;;  %6361 = vmatmul.msk.bf16.gmra.mxu1 %vm1878_vm12, %v6669_v48  ;;  %6386 = vmatmul.msk.bf16.gmra.mxu2 %vm1878_vm12, %v3413_v38  ;;  %v3611_v41 = vld [vmem:[#allocation2 + $0x48] sm:$0xe]  ;;  %v3133_v48 = vshrl.u32 %v2958_v51, 16  ;;  %v3136_v38 = vshll.u32 %v2958_v51, 16 }
 0x225   : > { %v8134_v0 = vadd.f32 %v2175_v37, %v8049_v46  ;;  %v3130_v46 = vrot.slane %v3128_v53, 5  ;;  %v3823_v42 = vpack.c.b16 %v3796_v5, %v3795_v59  ;;  %v3148_v37 = vrot.slane %v3146_v44, 4 }
 0x226   : > { %v6403_v5 = vrot.slane %v3611_v41, 9  ;;  %v3138_v59 = vrot.slane %v3136_v38, 5 }
 0x227   : > { %6514 = vmatmul.msk.bf16.gmra.mxu0 %vm1878_vm12, %v6692_v54  ;;  %v2225_v36 = vpop.f32.mrf.mxu2  ;;  %v3131_v14 = vsel %vm7465_vm15, %v3126_v62, %v3130_v46  ;;  %v3710_v54 = vrot.slane %v2957_v13, 5  ;;  %v3135_v62 = vrot.slane %v3133_v48, 4  ;;  %v6693_v13 = vld [vmem:[#allocation2 + $0x54] sm:$0xff]  ;;  %v3714_v48 = vrot.slane %v8140_v45, 5 }
 0x229   : > { %v2587_v1 = vpop.f32.mrf.mxu3  ;;  %v1993_v26 = vpop.f32.mrf.mxu1  ;;  %v3711_v7 = vsel %vm7388_vm11, %v3709_v55, %v3710_v54  ;;  %v3139_v28 = vor.u32 %v3138_v59, %v3135_v62 }
 0x22a   : > { %v2223_v11 = vadd.f32 %v2222_v30, %v1993_v26  ;;  %v3388_v30 = vunpack.c.l.b16 %v3131_v14  ;;  %v3149_v26 = vor.u32 %v3148_v37, %v3144_v63 }
 0x22b   : > { %v3140_v37 = vrot.slane %v3139_v28, 4 }
 0x22c   : > { %v2177_v2 = vpop.f32.mrf.mxu0  ;;  %v8147_v40 = vadd.f32 %v2587_v1, %v2223_v11  ;;  %v3414_v53 = vpack.c.b16 %v3388_v30, %v3387_v29  ;;  %v2960_v1 = vld [vmem:[#allocation2 + $0x5c] sm:$0x1]  ;;  %v3150_v14 = vrot.slane %v3149_v26, 4  ;;  %v3170_v29 = vshrl.u32 %v8167_v24, 16 }
 0x22d   : > { %v8150_v27 = vadd.f32 %v2177_v2, %v8062_v8  ;;  %v3798_v2 = vunpack.c.l.b16 %v3711_v7  ;;  %v3145_v45 = vsel %vm7465_vm15, %v3140_v37, %v3144_v63 }
 0x22e   : > { %6426 = vmatmul.msk.bf16.gmra.mxu3 %vm1878_vm12, %v3823_v42  ;;  %v3152_v42 = vshll.u32 %v2960_v1, 16  ;;  %v3172_v62 = vrot.slane %v3170_v29, 4 }
 0x22f   : > { %v2227_v47 = vpop.f32.mrf.mxu2 }
 0x231   : > { %v2590_v10 = vpop.f32.mrf.mxu3  ;;  %v1996_v9 = vpop.f32.mrf.mxu1 }
 0x232   : > { %v2226_v8 = vadd.f32 %v2225_v36, %v1996_v9  ;;  %v3708_v36 = vsel %vm7388_vm11, %v6403_v5, %v3707_v60 }
 0x233   : > { %v3797_v51 = vunpack.c.l.b16 %v3708_v36 }
 0x234   : > { %v2530_v21 = vpop.f32.mrf.mxu0  ;;  %v8157_v46 = vadd.f32 %v2590_v10, %v2226_v8  ;;  %6362 = vmatmul.msk.bf16.gmra.mxu1 %vm1878_vm12, %v6670_v23  ;;  %6387 = vmatmul.msk.bf16.gmra.mxu2 %vm1878_vm12, %v3414_v53  ;;  %v3166_v10 = vshll.u32 %v8167_v24, 16  ;;  %v2961_v8 = vld [vmem:[#allocation2 + $0x60] sm:$0xf]  ;;  %v3716_v23 = vrot.slane %v3714_v48, 4  ;;  %v3612_v53 = vld [vmem:[#allocation2 + $0x54] sm:$0xe] }
 0x235   : > { %v8161_v11 = vadd.f32 %v2530_v21, %v8080_v16  ;;  %v3154_v16 = vrot.slane %v3152_v42, 5  ;;  %v3824_v41 = vpack.c.b16 %v3798_v2, %v3797_v51  ;;  %v3157_v5 = vshrl.u32 %v2961_v8, 16  ;;  %v6671_v2 = vld [vmem:[#allocation2 + $0x48] sm:$0xff] }
 0x236   : > { %v3160_v21 = vshll.u32 %v2961_v8, 16  ;;  %v3168_v7 = vrot.slane %v3166_v10, 5  ;;  %v3717_v42 = vrot.slane %v2960_v1, 5  ;;  %v6694_v1 = vld [vmem:[#allocation2 + $0x60] sm:$0xff] }
 0x237   : > { %6515 = vmatmul.msk.bf16.gmra.mxu0 %vm1878_vm12, %v6693_v13  ;;  %v2230_v44 = vpop.f32.mrf.mxu2  ;;  %v3155_v60 = vsel %vm7465_vm15, %v3150_v14, %v3154_v16  ;;  %v3389_v13 = vunpack.c.l.b16 %v3145_v45  ;;  %v6404_v14 = vrot.slane %v3612_v53, 9 }
 0x238   : > { %v3718_v63 = vsel %vm7388_vm11, %v3716_v23, %v3717_v42  ;;  %v3162_v16 = vrot.slane %v3160_v21, 5  ;;  %v8194_v23 = vld [vmem:[#allocation2 + $0x70] sm:$0xf] }
 0x239   : > { %v2592_v32 = vpop.f32.mrf.mxu3  ;;  %v1998_v30 = vpop.f32.mrf.mxu1  ;;  %v3194_v42 = vshrl.u32 %v8194_v23, 16 }
 0x23a   : > { %v2228_v55 = vadd.f32 %v2227_v47, %v1998_v30  ;;  %v3390_v47 = vunpack.c.l.b16 %v3155_v60  ;;  %v3159_v30 = vrot.slane %v3157_v5, 4  ;;  %v3800_v60 = vunpack.c.l.b16 %v3718_v63  ;;  %v3613_v63 = vld [vmem:[#allocation2 + $0x60] sm:$0xe] }
 0x23c   : > { %v2532_v38 = vpop.f32.mrf.mxu0  ;;  %v8174_v9 = vadd.f32 %v2592_v32, %v2228_v55  ;;  %v3415_v28 = vpack.c.b16 %v3390_v47, %v3389_v13  ;;  %v2963_v32 = vld [vmem:[#allocation2 + $0x68] sm:$0x1]  ;;  %v3173_v55 = vor.u32 %v3172_v62, %v3168_v7  ;;  %v3163_v10 = vor.u32 %v3162_v16, %v3159_v30 }
 0x23d   : > { %v8177_v54 = vadd.f32 %v2532_v38, %v8096_v31  ;;  %v3176_v37 = vshll.u32 %v2963_v32, 16  ;;  %v3721_v62 = vrot.slane %v8167_v24, 5 }
 0x23e   : > { %6427 = vmatmul.msk.bf16.gmra.mxu3 %vm1878_vm12, %v3824_v41  ;;  %v3174_v29 = vrot.slane %v3173_v55, 4  ;;  %v3164_v13 = vrot.slane %v3163_v10, 4  ;;  %v3724_v10 = vrot.slane %v2963_v32, 5  ;;  %v6695_v32 = vld [vmem:[#allocation2 + $0x6c] sm:$0xff] }
 0x23f   : > { %v2232_v26 = vpop.f32.mrf.mxu2 }
 0x240   : > { %v3169_v24 = vsel %vm7465_vm15, %v3164_v13, %v3168_v7 }
 0x241   : > { %v2595_v59 = vpop.f32.mrf.mxu3  ;;  %v2001_v36 = vpop.f32.mrf.mxu1 }
 0x242   : > { %v2231_v31 = vadd.f32 %v2230_v44, %v2001_v36  ;;  %v3715_v44 = vsel %vm7388_vm11, %v6404_v14, %v3714_v48  ;;  %v3190_v36 = vshll.u32 %v8194_v23, 16 }
 0x243   : > { %v3799_v47 = vunpack.c.l.b16 %v3715_v44 }
 0x244   : > { %v2535_v51 = vpop.f32.mrf.mxu0  ;;  %v8184_v41 = vadd.f32 %v2595_v59, %v2231_v31  ;;  %6363 = vmatmul.msk.bf16.gmra.mxu1 %vm1878_vm12, %v6671_v2  ;;  %6388 = vmatmul.msk.bf16.gmra.mxu2 %vm1878_vm12, %v3415_v28  ;;  %v2964_v28 = vld [vmem:[#allocation2 + $0x6c] sm:$0xf]  ;;  %v3192_v55 = vrot.slane %v3190_v36, 5 }
 0x245   : > { %v8188_v38 = vadd.f32 %v2535_v51, %v8107_v4  ;;  %v3178_v4 = vrot.slane %v3176_v37, 5  ;;  %v3825_v21 = vpack.c.b16 %v3800_v60, %v3799_v47  ;;  %v3723_v51 = vrot.slane %v3721_v62, 4 }
 0x246   : > { %v3181_v30 = vshrl.u32 %v2964_v28, 16  ;;  %v3184_v16 = vshll.u32 %v2964_v28, 16  ;;  %v3391_v60 = vunpack.c.l.b16 %v3169_v24  ;;  %v6706_v24 = vld [vmem:[#allocation6 + $0x70] sm:$0xff] }
 0x247   : > { %6516 = vmatmul.msk.bf16.gmra.mxu0 %vm1878_vm12, %v6694_v1  ;;  %v2235_v45 = vpop.f32.mrf.mxu2  ;;  %v3179_v48 = vsel %vm7465_vm15, %v3174_v29, %v3178_v4  ;;  %v3196_v1 = vrot.slane %v3194_v42, 4  ;;  %v2966_v4 = vld [vmem:[#allocation2 + $0x74] sm:$0x1]  ;;  %4867 = vmatpush.bf16.msra.mxu1 %v6706_v24 }
 0x248   : > { %v3392_v14 = vunpack.c.l.b16 %v3179_v48  ;;  %v3200_v42 = vshll.u32 %v2966_v4, 16 }
 0x249   : > { %v2597_v8 = vpop.f32.mrf.mxu3  ;;  %v2003_v53 = vpop.f32.mrf.mxu1  ;;  %v3197_v13 = vor.u32 %v3196_v1, %v3192_v55 }
 0x24a   : > { %v2233_v5 = vadd.f32 %v2232_v26, %v2003_v53  ;;  %v6708_v26 = vld [vmem:[#allocation6 + $0x80] sm:$0xff]  ;;  %v3416_v47 = vpack.c.b16 %v3392_v14, %v3391_v60  ;;  %v6405_v53 = vrot.slane %v3613_v63, 9  ;;  %v3202_v1 = vrot.slane %v3200_v42, 5 }
 0x24b   : > { %5277 = vmatpush.bf16.msra.mxu2 %v6708_v26  ;;  %v3198_v14 = vrot.slane %v3197_v13, 4 }
 0x24c   : > { %v2537_v59 = vpop.f32.mrf.mxu0  ;;  %v8201_v31 = vadd.f32 %v2597_v8, %v2233_v5  ;;  %v6672_v8 = vld [vmem:[#allocation2 + $0x54] sm:$0xff]  ;;  %v3725_v5 = vsel %vm7388_vm11, %v3723_v51, %v3724_v10 }
 0x24d   : > { %v8204_v2 = vadd.f32 %v2537_v59, %v8123_v20  ;;  %v3186_v59 = vrot.slane %v3184_v16, 5  ;;  %v3802_v28 = vunpack.c.l.b16 %v3725_v5  ;;  %v8221_v16 = vld [vmem:[#allocation2 + $0x7c] sm:$0xf]  ;;  %v2967_v5 = vld [vmem:[#allocation2 + $0x78] sm:$0xf] }
 0x24e   : > { %6428 = vmatmul.msk.bf16.gmra.mxu3 %vm1878_vm12, %v3825_v21  ;;  %v3183_v21 = vrot.slane %v3181_v30, 4  ;;  %v3205_v13 = vshrl.u32 %v2967_v5, 16 }
 0x24f   : > { %v2237_v37 = vpop.f32.mrf.mxu2 }
 0x250   : > { %v3187_v26 = vor.u32 %v3186_v59, %v3183_v21  ;;  %v3614_v59 = vld [vmem:[#allocation2 + $0x6c] sm:$0xe] }
 0x251   : > { %v2600_v44 = vpop.f32.mrf.mxu3  ;;  %v2006_v20 = vpop.f32.mrf.mxu1 }
 0x252   : > { %v2236_v29 = vadd.f32 %v2235_v45, %v2006_v20  ;;  %v3722_v45 = vsel %vm7388_vm11, %v6405_v53, %v3721_v62  ;;  %v3728_v20 = vrot.slane %v8194_v23, 5  ;;  %v3188_v10 = vrot.slane %v3187_v26, 4 }
 0x253   : > { %v3801_v30 = vunpack.c.l.b16 %v3722_v45 }
 0x254   : > { %v2540_v7 = vpop.f32.mrf.mxu0  ;;  %v8211_v48 = vadd.f32 %v2600_v44, %v2236_v29  ;;  %6364 = vmatmul.msk.bf16.gmra.mxu1 %vm1878_vm12, %v6672_v8  ;;  %6389 = vmatmul.msk.bf16.gmra.mxu2 %vm1878_vm12, %v3416_v47  ;;  %v3203_v29 = vsel %vm7465_vm15, %v3198_v14, %v3202_v1  ;;  %v3214_v8 = vshll.u32 %v8221_v16, 16  ;;  %v3218_v47 = vshrl.u32 %v8221_v16, 16 }
 0x255   : > { %v8215_v36 = vadd.f32 %v2540_v7, %v8134_v0  ;;  %v3826_v60 = vpack.c.b16 %v3802_v28, %v3801_v30  ;;  %v3193_v23 = vsel %vm7465_vm15, %v3188_v10, %v3192_v55  ;;  %v3730_v21 = vrot.slane %v3728_v20, 4  ;;  %v6673_v30 = vld [vmem:[#allocation2 + $0x60] sm:$0xff] }
 0x256   : > { %v3216_v45 = vrot.slane %v3214_v8, 5  ;;  %v3220_v42 = vrot.slane %v3218_v47, 4  ;;  %v3393_v26 = vunpack.c.l.b16 %v3193_v23  ;;  %v6406_v1 = vrot.slane %v3614_v59, 9  ;;  %v6696_v8 = vld [vmem:[#allocation2 + $0x78] sm:$0xff] }
 0x257   : > { %6517 = vmatmul.msk.bf16.gmra.mxu0 %vm1878_vm12, %v6695_v32  ;;  %v2240_v63 = vpop.f32.mrf.mxu2  ;;  %v3208_v32 = vshll.u32 %v2967_v5, 16  ;;  %v6711_v5 = vld [vmem:[%s9017_s7 + $0x8] sm:$0xff] }
 0x258   : > { %v3221_v10 = vor.u32 %v3220_v42, %v3216_v45  ;;  %5581 = vmatpush.bf16.msra.mxu3 %v6711_v5 }
 0x259   : > { %v2602_v51 = vpop.f32.mrf.mxu3  ;;  %v2008_v0 = vpop.f32.mrf.mxu1 }
 0x25a   : > { %v2238_v44 = vadd.f32 %v2237_v37, %v2008_v0  ;;  %v3394_v37 = vunpack.c.l.b16 %v3203_v29 }
 0x25c   : > { %v2542_v62 = vpop.f32.mrf.mxu0  ;;  %v8228_v53 = vadd.f32 %v2602_v51, %v2238_v44  ;;  %v3731_v51 = vrot.slane %v2966_v4, 5  ;;  %v3417_v0 = vpack.c.b16 %v3394_v37, %v3393_v26  ;;  %v2969_v44 = vld [vmem:[#allocation2 + $0x80] sm:$0x1]  ;;  %v3729_v4 = vsel %vm7388_vm11, %v6406_v1, %v3728_v20 }
 0x25d   : > { %v8231_v7 = vadd.f32 %v2542_v62, %v8150_v27  ;;  %v3210_v62 = vrot.slane %v3208_v32, 5  ;;  %v3222_v37 = vrot.slane %v3221_v10, 4  ;;  %v8248_v32 = vld [vmem:[#allocation2 + $0x88] sm:$0xf]  ;;  %v3615_v10 = vld [vmem:[#allocation2 + $0x78] sm:$0xe] }
 0x25e   : > { %6429 = vmatmul.msk.bf16.gmra.mxu3 %vm1878_vm12, %v3826_v60  ;;  %v3732_v55 = vsel %vm7388_vm11, %v3730_v21, %v3731_v51  ;;  %v3207_v60 = vrot.slane %v3205_v13, 4  ;;  %v3803_v13 = vunpack.c.l.b16 %v3729_v4 }
 0x25f   : > { %v2242_v24 = vpop.f32.mrf.mxu2  ;;  %v3804_v47 = vunpack.c.l.b16 %v3732_v55  ;;  %v2970_v55 = vld [vmem:[#allocation2 + $0x84] sm:$0xf] }
 0x260   : > { %v3211_v23 = vor.u32 %v3210_v62, %v3207_v60 }
 0x261   : > { %v2605_v28 = vpop.f32.mrf.mxu3  ;;  %v2011_v14 = vpop.f32.mrf.mxu1  ;;  %v3827_v20 = vpack.c.b16 %v3804_v47, %v3803_v13  ;;  %v3738_v13 = vrot.slane %v2969_v44, 5 }
 0x262   : > { %v2241_v27 = vadd.f32 %v2240_v63, %v2011_v14  ;;  %v3224_v63 = vshll.u32 %v2969_v44, 16  ;;  %v3735_v14 = vrot.slane %v8221_v16, 5  ;;  %v3212_v51 = vrot.slane %v3211_v23, 4 }
 0x263   : > { %v3229_v16 = vshrl.u32 %v2970_v55, 16 }
 0x264   : > { %v8238_v29 = vadd.f32 %v2605_v28, %v2241_v27  ;;  %6365 = vmatmul.msk.bf16.gmra.mxu1 %vm1878_vm12, %v6673_v30  ;;  %6390 = vmatmul.msk.bf16.gmra.mxu2 %vm1878_vm12, %v3417_v0  ;;  %v3226_v28 = vrot.slane %v3224_v63, 5  ;;  %v3238_v30 = vshll.u32 %v8248_v32, 16  ;;  %v3242_v0 = vshrl.u32 %v8248_v32, 16 }
 0x265   : > { %v3217_v60 = vsel %vm7465_vm15, %v3212_v51, %v3216_v45  ;;  %v3737_v62 = vrot.slane %v3735_v14, 4  ;;  %v3231_v51 = vrot.slane %v3229_v16, 4 }
 0x266   : > { %v3227_v27 = vsel %vm7465_vm15, %v3222_v37, %v3226_v28  ;;  %v3240_v4 = vrot.slane %v3238_v30, 5  ;;  %v3244_v63 = vrot.slane %v3242_v0, 4  ;;  %v3395_v23 = vunpack.c.l.b16 %v3217_v60  ;;  %v6697_v30 = vld [vmem:[#allocation2 + $0x84] sm:$0xff] }
 0x267   : > { %6518 = vmatmul.msk.bf16.gmra.mxu0 %vm1878_vm12, %v6696_v8  ;;  %v3494_v59 = vpop.f32.mrf.mxu2  ;;  %v3232_v8 = vshll.u32 %v2970_v55, 16  ;;  %v3739_v45 = vsel %vm7388_vm11, %v3737_v62, %v3738_v13 }
 0x268   : > { %v3245_v18 = vor.u32 %v3244_v63, %v3240_v4  ;;  %v3806_v60 = vunpack.c.l.b16 %v3739_v45 }
 0x269   : > { %v2607_v21 = vpop.f32.mrf.mxu3  ;;  %v2013_v42 = vpop.f32.mrf.mxu1 }
 0x26a   : > { %v2243_v26 = vadd.f32 %v2242_v24, %v2013_v42  ;;  %v3396_v24 = vunpack.c.l.b16 %v3227_v27  ;;  %v6674_v42 = vld [vmem:[#allocation2 + $0x6c] sm:$0xff]  ;;  %v3234_v27 = vrot.slane %v3232_v8, 5  ;;  %v3246_v62 = vrot.slane %v3245_v18, 4 }
 0x26c   : > { %v8255_v1 = vadd.f32 %v2607_v21, %v2243_v26  ;;  %v3418_v28 = vpack.c.b16 %v3396_v24, %v3395_v23  ;;  %v6407_v26 = vrot.slane %v3615_v10, 9  ;;  %v3235_v24 = vor.u32 %v3234_v27, %v3231_v51 }
 0x26e   : > { %6430 = vmatmul.msk.bf16.gmra.mxu3 %vm1878_vm12, %v3827_v20  ;;  %v2972_v20 = vld [vmem:[#allocation2 + $0x8c] sm:$0x1]  ;;  %v3736_v44 = vsel %vm7388_vm11, %v6407_v26, %v3735_v14  ;;  %v3742_v14 = vrot.slane %v8248_v32, 5  ;;  %v2973_v26 = vld [vmem:[#allocation2 + $0x90] sm:$0xf] }
 0x26f   : > { %v3496_v5 = vpop.f32.mrf.mxu2  ;;  %v3805_v8 = vunpack.c.l.b16 %v3736_v44  ;;  %v3616_v32 = vld [vmem:[#allocation2 + $0x84] sm:$0xe] }
 0x270   : > { %v3744_v27 = vrot.slane %v3742_v14, 4 }
 0x271   : > { %v3904_v47 = vpop.f32.mrf.mxu3  ;;  %v2828_v37 = vpop.f32.mrf.mxu1  ;;  %v3828_v13 = vpack.c.b16 %v3806_v60, %v3805_v8 }
 0x272   : > { %v2908_v21 = vadd.f32 %v2828_v37, %v8161_v11  ;;  %v3248_v11 = vshll.u32 %v2972_v20, 16 }
 0x274   : > { %v3574_v55 = vadd.f32 %v3494_v59, %v2908_v21  ;;  %6366 = vmatmul.msk.bf16.gmra.mxu1 %vm1878_vm12, %v6674_v42  ;;  %6391 = vmatmul.msk.bf16.gmra.mxu2 %vm1878_vm12, %v3418_v28  ;;  %v8270_v59 = vld [vmem:[#allocation2 + $0x94] sm:$0xf]  ;;  %v3250_v23 = vrot.slane %v3248_v11, 5  ;;  %v3236_v21 = vrot.slane %v3235_v24, 4 }
 0x275   : > { %v3262_v42 = vshll.u32 %v8270_v59, 16  ;;  %v3266_v18 = vshrl.u32 %v8270_v59, 16 }
 0x276   : > { %v8267_v0 = vadd.f32 %v3904_v47, %v3574_v55  ;;  %v3251_v47 = vsel %vm7465_vm15, %v3246_v62, %v3250_v23  ;;  %v3241_v45 = vsel %vm7465_vm15, %v3236_v21, %v3240_v4  ;;  %v3253_v55 = vshrl.u32 %v2973_v26, 16  ;;  %v6675_v23 = vld [vmem:[#allocation2 + $0x78] sm:$0xff] }
 0x277   : > { %6519 = vmatmul.msk.bf16.gmra.mxu0 %vm1878_vm12, %v6697_v30  ;;  %v3499_v16 = vpop.f32.mrf.mxu2  ;;  %v3256_v30 = vshll.u32 %v2973_v26, 16  ;;  %v3264_v44 = vrot.slane %v3262_v42, 5  ;;  %v3268_v11 = vrot.slane %v3266_v18, 4  ;;  %v3397_v62 = vunpack.c.l.b16 %v3241_v45  ;;  %v2975_v4 = vld [vmem:[#allocation2 + $0x98] sm:$0x1]  ;;  %v6698_v42 = vld [vmem:[#allocation2 + $0x90] sm:$0xff] }
 0x278   : > { %v3255_v21 = vrot.slane %v3253_v55, 4 }
 0x279   : > { %v3906_v10 = vpop.f32.mrf.mxu3  ;;  %v2830_v63 = vpop.f32.mrf.mxu1 }
 0x27a   : > { %v2909_v37 = vadd.f32 %v2830_v63, %v8177_v54  ;;  %v3398_v54 = vunpack.c.l.b16 %v3251_v47  ;;  %v3258_v47 = vrot.slane %v3256_v30, 5 }
 0x27c   : > { %v3575_v28 = vadd.f32 %v3496_v5, %v2909_v37  ;;  %v3745_v5 = vrot.slane %v2972_v20, 5  ;;  %v3419_v37 = vpack.c.b16 %v3398_v54, %v3397_v62  ;;  %v3259_v54 = vor.u32 %v3258_v47, %v3255_v21 }
 0x27e   : > { %6431 = vmatmul.msk.bf16.gmra.mxu3 %vm1878_vm12, %v3828_v13  ;;  %v8281_v51 = vadd.f32 %v3906_v10, %v3575_v28  ;;  %v6408_v13 = vrot.slane %v3616_v32, 9  ;;  %v3746_v10 = vsel %vm7388_vm11, %v3744_v27, %v3745_v5  ;;  %v3269_v28 = vor.u32 %v3268_v11, %v3264_v44 }
 0x27f   : > { %v3501_v24 = vpop.f32.mrf.mxu2  ;;  %v3808_v45 = vunpack.c.l.b16 %v3746_v10  ;;  %v2976_v10 = vld [vmem:[#allocation2 + $0x9c] sm:$0xf] }
 0x280   : > { %v3743_v20 = vsel %vm7388_vm11, %v6408_v13, %v3742_v14  ;;  %v3270_v27 = vrot.slane %v3269_v28, 4  ;;  %v3749_v13 = vrot.slane %v8270_v59, 5  ;;  %v8306_v28 = vpop.f32.mrf.mxu0 }
 0x281   : > { %v3909_v60 = vpop.f32.mrf.mxu3  ;;  %v2833_v8 = vpop.f32.mrf.mxu1  ;;  %v3807_v30 = vunpack.c.l.b16 %v3743_v20 }
 0x282   : > { %v2910_v63 = vadd.f32 %v2833_v8, %v8188_v38  ;;  %v3272_v38 = vshll.u32 %v2975_v4, 16 }
 0x283   : > { %v3829_v5 = vpack.c.b16 %v3808_v45, %v3807_v30  ;;  %v3617_v30 = vld [vmem:[#allocation2 + $0x90] sm:$0xe] }
 0x284   : > { %v3576_v26 = vadd.f32 %v3499_v16, %v2910_v63  ;;  %6367 = vmatmul.msk.bf16.gmra.mxu1 %vm1878_vm12, %v6675_v23  ;;  %6392 = vmatmul.msk.bf16.gmra.mxu2 %vm1878_vm12, %v3419_v37  ;;  %v8293_v16 = vld [vmem:[#allocation2 + $0xa0] sm:$0xf]  ;;  %v3274_v62 = vrot.slane %v3272_v38, 5  ;;  %v3260_v63 = vrot.slane %v3259_v54, 4 }
 0x285   : > { %v3290_v23 = vshrl.u32 %v8293_v16, 16 }
 0x286   : > { %v8290_v18 = vadd.f32 %v3909_v60, %v3576_v26  ;;  %v3275_v14 = vsel %vm7465_vm15, %v3270_v27, %v3274_v62  ;;  %v3286_v60 = vshll.u32 %v8293_v16, 16  ;;  %v3265_v21 = vsel %vm7465_vm15, %v3260_v63, %v3264_v44  ;;  %v6676_v62 = vld [vmem:[#allocation2 + $0x84] sm:$0xff] }
 0x287   : > { %6520 = vmatmul.msk.bf16.gmra.mxu0 %vm1878_vm12, %v6698_v42  ;;  %v3504_v55 = vpop.f32.mrf.mxu2  ;;  %v3277_v26 = vshrl.u32 %v2976_v10, 16  ;;  %v3280_v42 = vshll.u32 %v2976_v10, 16  ;;  %v3292_v38 = vrot.slane %v3290_v23, 4  ;;  %v3751_v27 = vrot.slane %v3749_v13, 4 }
 0x288   : > { %v3288_v20 = vrot.slane %v3286_v60, 5  ;;  %v3752_v44 = vrot.slane %v2975_v4, 5  ;;  %v6699_v60 = vld [vmem:[#allocation2 + $0x9c] sm:$0xff]  ;;  %v6409_v23 = vrot.slane %v3617_v30, 9 }
 0x289   : > { %v3911_v32 = vpop.f32.mrf.mxu3  ;;  %v2835_v11 = vpop.f32.mrf.mxu1  ;;  %v3282_v63 = vrot.slane %v3280_v42, 5  ;;  %v8321_v42 = vld [vmem:[#allocation2 + $0xac] sm:$0xf] }
 0x28a   : > { %v2911_v8 = vadd.f32 %v2835_v11, %v8204_v2  ;;  %v3400_v2 = vunpack.c.l.b16 %v3275_v14  ;;  %v3293_v14 = vor.u32 %v3292_v38, %v3288_v20  ;;  %v3753_v10 = vsel %vm7388_vm11, %v3751_v27, %v3752_v44 }
 0x28b   : > { %v3750_v4 = vsel %vm7388_vm11, %v6409_v23, %v3749_v13  ;;  %v3314_v44 = vshrl.u32 %v8321_v42, 16 }
 0x28c   : > { %v3577_v37 = vadd.f32 %v3501_v24, %v2911_v8  ;;  %v3399_v24 = vunpack.c.l.b16 %v3265_v21  ;;  %v3809_v27 = vunpack.c.l.b16 %v3750_v4 }
 0x28e   : > { %6432 = vmatmul.msk.bf16.gmra.mxu3 %vm1878_vm12, %v3829_v5  ;;  %v8304_v47 = vadd.f32 %v3911_v32, %v3577_v37  ;;  %v3420_v8 = vpack.c.b16 %v3400_v2, %v3399_v24  ;;  %v8309_v32 = vld [vmem:[#allocation2 + $0xa4] sm:$0x1]  ;;  %v3279_v5 = vrot.slane %v3277_v26, 4  ;;  %v3810_v2 = vunpack.c.l.b16 %v3753_v10 }
 0x28f   : > { %v3506_v54 = vpop.f32.mrf.mxu2  ;;  %v3294_v26 = vrot.slane %v3293_v14, 4  ;;  %v3756_v14 = vrot.slane %v8293_v16, 5 }
 0x290   : > { %v3830_v13 = vpack.c.b16 %v3810_v2, %v3809_v27 }
 0x291   : > { %v3914_v45 = vpop.f32.mrf.mxu3  ;;  %v2838_v59 = vpop.f32.mrf.mxu1 }
 0x292   : > { %v2912_v11 = vadd.f32 %v2838_v59, %v8215_v36  ;;  %v3296_v36 = vshll.u32 %v8309_v32, 16  ;;  %v8323_v59 = vpop.f32.mrf.mxu0 }
 0x294   : > { %v3578_v37 = vadd.f32 %v3504_v55, %v2912_v11  ;;  %6368 = vmatmul.msk.bf16.gmra.mxu1 %vm1878_vm12, %v6676_v62  ;;  %6393 = vmatmul.msk.bf16.gmra.mxu2 %vm1878_vm12, %v3420_v8  ;;  %v3283_v55 = vor.u32 %v3282_v63, %v3279_v5  ;;  %v3298_v11 = vrot.slane %v3296_v36, 5  ;;  %v2979_v62 = vld [vmem:[#allocation2 + $0xa8] sm:$0xf]  ;;  %v3310_v8 = vshll.u32 %v8321_v42, 16 }
 0x295   : > { %v3301_v23 = vshrl.u32 %v2979_v62, 16 }
 0x296   : > { %v8316_v21 = vadd.f32 %v3914_v45, %v3578_v37  ;;  %v3284_v37 = vrot.slane %v3283_v55, 4  ;;  %v3299_v5 = vsel %vm7465_vm15, %v3294_v26, %v3298_v11  ;;  %v3312_v4 = vrot.slane %v3310_v8, 5  ;;  %v8336_v11 = vld [vmem:[#allocation2 + $0xb0] sm:$0x1] }
 0x297   : > { %6521 = vmatmul.msk.bf16.gmra.mxu0 %vm1878_vm12, %v6699_v60  ;;  %v3509_v24 = vpop.f32.mrf.mxu2  ;;  %v3402_v36 = vunpack.c.l.b16 %v3299_v5  ;;  %v3303_v16 = vrot.slane %v3301_v23, 4  ;;  %v3320_v23 = vshll.u32 %v8336_v11, 16 }
 0x298   : > { %9051 = vst [vmem:[#allocation16_spill] sm:$0xff] %v8316_v21  ;;  %v3289_v60 = vsel %vm7465_vm15, %v3284_v37, %v3288_v20  ;;  %v3758_v21 = vrot.slane %v3756_v14, 4  ;;  %v6677_v20 = vld [vmem:[#allocation2 + $0x90] sm:$0xff] }
 0x299   : > { %v3916_v38 = vpop.f32.mrf.mxu3  ;;  %v2840_v30 = vpop.f32.mrf.mxu1  ;;  %v3401_v27 = vunpack.c.l.b16 %v3289_v60 }
 0x29a   : > { %v2913_v45 = vadd.f32 %v2840_v30, %v8231_v7  ;;  %v3304_v7 = vshll.u32 %v2979_v62, 16  ;;  %v3316_v30 = vrot.slane %v3314_v44, 4  ;;  %v8340_v5 = vpop.f32.mrf.mxu0  ;;  %v6700_v44 = vld [vmem:[#allocation2 + $0xa8] sm:$0xff] }
 0x29b   : > { %v3421_v37 = vpack.c.b16 %v3402_v36, %v3401_v27 }
 0x29c   : > { %v3579_v63 = vadd.f32 %v3506_v54, %v2913_v45  ;;  %v3618_v54 = vld [vmem:[#allocation2 + $0x9c] sm:$0xe]  ;;  %v3306_v45 = vrot.slane %v3304_v7, 5  ;;  %v3317_v62 = vor.u32 %v3316_v30, %v3312_v4  ;;  %v8352_v30 = vld [vmem:[#allocation2 + $0xb8] sm:$0xf] }
 0x29e   : > { %6433 = vmatmul.msk.bf16.gmra.mxu3 %vm1878_vm12, %v3830_v13  ;;  %v8334_v10 = vadd.f32 %v3916_v38, %v3579_v63  ;;  %v3759_v38 = vrot.slane %v8309_v32, 5  ;;  %v6410_v63 = vrot.slane %v3618_v54, 9  ;;  %v3322_v54 = vrot.slane %v3320_v23, 5 }
 0x29f   : > { %v3511_v55 = vpop.f32.mrf.mxu2 }
 0x2a0   : > { %v3760_v60 = vsel %vm7388_vm11, %v3758_v21, %v3759_v38  ;;  %v3757_v32 = vsel %vm7388_vm11, %v6410_v63, %v3756_v14  ;;  %v3338_v14 = vshrl.u32 %v8352_v30, 16 }
 0x2a1   : > { %v3919_v2 = vpop.f32.mrf.mxu3  ;;  %v2843_v26 = vpop.f32.mrf.mxu1  ;;  %v3812_v36 = vunpack.c.l.b16 %v3760_v60 }
 0x2a2   : > { %v2914_v13 = vadd.f32 %v2843_v26, %v7841_v22  ;;  %v3307_v22 = vor.u32 %v3306_v45, %v3303_v16  ;;  %v2982_v16 = vld [vmem:[#allocation2 + $0xb4] sm:$0xf]  ;;  %v3334_v45 = vshll.u32 %v8352_v30, 16  ;;  %v8362_v63 = vpop.f32.mrf.mxu0 }
 0x2a3   : > { %v3325_v60 = vshrl.u32 %v2982_v16, 16 }
 0x2a4   : > { %v3580_v8 = vadd.f32 %v3509_v24, %v2914_v13  ;;  %6369 = vmatmul.msk.bf16.gmra.mxu1 %vm1878_vm12, %v6677_v20  ;;  %6394 = vmatmul.msk.bf16.gmra.mxu2 %vm1878_vm12, %v3421_v37  ;;  %v3318_v24 = vrot.slane %v3317_v62, 4  ;;  %v3811_v20 = vunpack.c.l.b16 %v3757_v32  ;;  %v3308_v21 = vrot.slane %v3307_v22, 4 }
 0x2a5   : > { %v3763_v62 = vrot.slane %v8321_v42, 5  ;;  %v3328_v22 = vshll.u32 %v2982_v16, 16  ;;  %v3336_v32 = vrot.slane %v3334_v45, 5  ;;  %v3619_v42 = vld [vmem:[#allocation2 + $0xa8] sm:$0xe] }
 0x2a6   : > { %v8347_v7 = vadd.f32 %v3919_v2, %v3580_v8  ;;  %v3323_v2 = vsel %vm7465_vm15, %v3318_v24, %v3322_v54  ;;  %v3831_v38 = vpack.c.b16 %v3812_v36, %v3811_v20  ;;  %v3340_v24 = vrot.slane %v3338_v14, 4 }
 0x2a7   : > { %6522 = vmatmul.msk.bf16.gmra.mxu0 %vm1878_vm12, %v6700_v44  ;;  %v3514_v26 = vpop.f32.mrf.mxu2  ;;  %v3313_v44 = vsel %vm7465_vm15, %v3308_v21, %v3312_v4  ;;  %v3766_v4 = vrot.slane %v8336_v11, 5  ;;  %v8368_v21 = vld [vmem:[#allocation2 + $0xbc] sm:$0x1]  ;;  %v6411_v16 = vrot.slane %v3619_v42, 9 }
 0x2a8   : > { %9052 = vst [vmem:[#allocation17_spill] sm:$0xff] %v8347_v7  ;;  %v3403_v54 = vunpack.c.l.b16 %v3313_v44  ;;  %v3327_v7 = vrot.slane %v3325_v60, 4  ;;  %v6701_v44 = vld [vmem:[#allocation2 + $0xb4] sm:$0xff]  ;;  %v3344_v11 = vshll.u32 %v8368_v21, 16 }
 0x2a9   : > { %v3921_v27 = vpop.f32.mrf.mxu3  ;;  %v2845_v13 = vpop.f32.mrf.mxu1 }
 0x2aa   : > { %v2915_v37 = vadd.f32 %v2845_v13, %v7861_v35  ;;  %v3404_v35 = vunpack.c.l.b16 %v3323_v2  ;;  %v3765_v13 = vrot.slane %v3763_v62, 4  ;;  %v6678_v2 = vld [vmem:[#allocation2 + $0x9c] sm:$0xff] }
 0x2ac   : > { %v3581_v8 = vadd.f32 %v3511_v55, %v2915_v37  ;;  %v3422_v37 = vpack.c.b16 %v3404_v35, %v3403_v54  ;;  %v3767_v45 = vsel %vm7388_vm11, %v3765_v13, %v3766_v4  ;;  %v3764_v35 = vsel %vm7388_vm11, %v6411_v16, %v3763_v62  ;;  %v8381_v54 = vpop.f32.mrf.mxu0  ;;  %v8388_v16 = vld [vmem:[#allocation2 + $0xc4] sm:$0xf] }
 0x2ad   : > { %v3814_v60 = vunpack.c.l.b16 %v3767_v45  ;;  %v3813_v42 = vunpack.c.l.b16 %v3764_v35  ;;  %v3362_v45 = vshrl.u32 %v8388_v16, 16 }
 0x2ae   : > { %6434 = vmatmul.msk.bf16.gmra.mxu3 %vm1878_vm12, %v3831_v38  ;;  %v8365_v23 = vadd.f32 %v3921_v27, %v3581_v8  ;;  %v3330_v27 = vrot.slane %v3328_v22, 5  ;;  %v3341_v8 = vor.u32 %v3340_v24, %v3336_v32 }
 0x2af   : > { %v3516_v20 = vpop.f32.mrf.mxu2 }
 0x2b0   : > { %9053 = vst [vmem:[#allocation18_spill] sm:$0xff] %v8365_v23  ;;  %v3331_v22 = vor.u32 %v3330_v27, %v3327_v7  ;;  %v3342_v24 = vrot.slane %v3341_v8, 4  ;;  %v3358_v8 = vshll.u32 %v8388_v16, 16  ;;  %v6702_v23 = vld [vmem:[#allocation2 + $0xc0] sm:$0xff] }
 0x2b1   : > { %v3924_v36 = vpop.f32.mrf.mxu3  ;;  %v2848_v55 = vpop.f32.mrf.mxu1 }
 0x2b2   : > { %v2916_v38 = vadd.f32 %v2848_v55, %v7881_v3  ;;  %v3346_v55 = vrot.slane %v3344_v11, 5 }
 0x2b4   : > { %v3582_v14 = vadd.f32 %v3514_v26, %v2916_v38  ;;  %6370 = vmatmul.msk.bf16.gmra.mxu1 %vm1878_vm12, %v6678_v2  ;;  %6395 = vmatmul.msk.bf16.gmra.mxu2 %vm1878_vm12, %v3422_v37  ;;  %v3832_v38 = vpack.c.b16 %v3814_v60, %v3813_v42  ;;  %v3332_v2 = vrot.slane %v3331_v22, 4  ;;  %v3347_v62 = vsel %vm7465_vm15, %v3342_v24, %v3346_v55 }
 0x2b5   : > { %v3406_v11 = vunpack.c.l.b16 %v3347_v62  ;;  %v3360_v22 = vrot.slane %v3358_v8, 5  ;;  %v3364_v24 = vrot.slane %v3362_v45, 4 }
 0x2b6   : > { %v8378_v3 = vadd.f32 %v3924_v36, %v3582_v14  ;;  %v2985_v36 = vld [vmem:[#allocation2 + $0xc0] sm:$0xf] }
 0x2b7   : > { %6523 = vmatmul.msk.bf16.gmra.mxu0 %vm1878_vm12, %v6701_v44  ;;  %v3519_v13 = vpop.f32.mrf.mxu2  ;;  %v3349_v7 = vshrl.u32 %v2985_v36, 16  ;;  %v3352_v27 = vshll.u32 %v2985_v36, 16  ;;  %v3770_v44 = vrot.slane %v8352_v30, 5  ;;  %v3365_v62 = vor.u32 %v3364_v24, %v3360_v22 }
 0x2b8   : > { %9054 = vst [vmem:[#allocation19_spill] sm:$0xff] %v8378_v3 }
 0x2b9   : > { %v8383_v26 = vpop.f32.mrf.mxu3  ;;  %v2850_v37 = vpop.f32.mrf.mxu1  ;;  %v3351_v35 = vrot.slane %v3349_v7, 4  ;;  %v3354_v60 = vrot.slane %v3352_v27, 5  ;;  %v3772_v36 = vrot.slane %v3770_v44, 4 }
 0x2ba   : > { %9055 = vst [vmem:[#allocation20_spill] sm:$0xff] %v8383_v26  ;;  %v2917_v4 = vadd.f32 %v2850_v37, %v7905_v6  ;;  %v3337_v6 = vsel %vm7465_vm15, %v3332_v2, %v3336_v32  ;;  %v2987_v26 = vld [vmem:[#allocation2 + $0xc8] sm:$0x1]  ;;  %v3773_v32 = vrot.slane %v8368_v21, 5 }
 0x2bb   : > { %v3405_v37 = vunpack.c.l.b16 %v3337_v6  ;;  %v3355_v2 = vor.u32 %v3354_v60, %v3351_v35  ;;  %v3368_v7 = vshll.u32 %v2987_v26, 16 }
 0x2bc   : > { %v8392_v14 = vadd.f32 %v3516_v20, %v2917_v4  ;;  %v3620_v20 = vld [vmem:[#allocation2 + $0xb4] sm:$0xe]  ;;  %v8398_v4 = vpop.f32.mrf.mxu0  ;;  %v3774_v45 = vsel %vm7388_vm11, %v3772_v36, %v3773_v32  ;;  %v3777_v32 = vrot.slane %v8388_v16, 5 }
 0x2bd   : > { %v6412_v8 = vrot.slane %v3620_v20, 9  ;;  %v3816_v21 = vunpack.c.l.b16 %v3774_v45  ;;  %v3370_v35 = vrot.slane %v3368_v7, 5  ;;  %v878_v20 = vld [vmem:[#allocation2 + $0xcc] sm:$0x1]  ;;  %v3780_v45 = vrot.slane %v2987_v26, 5 }
 0x2be   : > { %9056 = vst [vmem:[#allocation21_spill] sm:$0xff] %v8392_v14  ;;  %6435 = vmatmul.msk.bf16.gmra.mxu3 %vm1878_vm12, %v3832_v38  ;;  %v6679_v38 = vld [vmem:[#allocation2 + $0xa8] sm:$0xff]  ;;  %v3423_v14 = vpack.c.b16 %v3406_v11, %v3405_v37  ;;  %v3366_v11 = vrot.slane %v3365_v62, 4 }
 0x2bf   : > { %v3521_v55 = vpop.f32.mrf.mxu2 }
 0x2c1   : > { %v3929_v42 = vpop.f32.mrf.mxu3  ;;  %v2853_v3 = vpop.f32.mrf.mxu1 }
 0x2c2   : > { %v2918_v30 = vadd.f32 %v2853_v3, %v7938_v43  ;;  %v3771_v43 = vsel %vm7388_vm11, %v6412_v8, %v3770_v44  ;;  %v3356_v3 = vrot.slane %v3355_v2, 4  ;;  %v879_v44 = vsel %vm7308_vm2, 0, %v878_v20 }
 0x2c3   : > { %880 = vst [vmem:[#allocation2 + $0xcc] sm:$0x1] %v879_v44  ;;  %v3779_v8 = vrot.slane %v3777_v32, 4 }
 0x2c4   : > { %v3584_v27 = vadd.f32 %v3519_v13, %v2918_v30  ;;  %6371 = vmatmul.msk.bf16.gmra.mxu1 %vm1878_vm12, %v6679_v38  ;;  %6396 = vmatmul.msk.bf16.gmra.mxu2 %vm1878_vm12, %v3423_v14  ;;  %v3815_v14 = vunpack.c.l.b16 %v3771_v43  ;;  %v8420_v30 = vpop.f32.mrf.mxu0  ;;  %v4316_v43 = vld [vmem:[#allocation2 + $0x1c] sm:$0xf] }
 0x2c6   : > { %v8406_v6 = vadd.f32 %v3929_v42, %v3584_v27  ;;  %v3833_v36 = vpack.c.b16 %v3816_v21, %v3815_v14  ;;  %v3361_v42 = vsel %vm7465_vm15, %v3356_v3, %v3360_v22  ;;  %v6680_v3 = vld [vmem:[#allocation2 + $0xb4] sm:$0xff]  ;;  %v3781_v14 = vsel %vm7388_vm11, %v3779_v8, %v3780_v45 }
 0x2c7   : > { %6524 = vmatmul.msk.bf16.gmra.mxu0 %vm1878_vm12, %v6702_v23  ;;  %v3524_v60 = vpop.f32.mrf.mxu2  ;;  %v3371_v23 = vsel %vm7465_vm15, %v3366_v11, %v3370_v35  ;;  %v3407_v2 = vunpack.c.l.b16 %v3361_v42  ;;  %v5047_v11 = vrot.slane %v4316_v43, 5  ;;  %v4315_v8 = vld [vmem:[#allocation2 + $0x18] sm:$0xf]  ;;  %v4373_v45 = vshll.u32 %v4316_v43, 16 }
 0x2c8   : > { %v3408_v62 = vunpack.c.l.b16 %v3371_v23 }
 0x2c9   : > { %v8411_v13 = vpop.f32.mrf.mxu3  ;;  %v2855_v24 = vpop.f32.mrf.mxu1  ;;  %v5049_v42 = vrot.slane %v5047_v11, 4 }
 0x2ca   : > { %v2919_v37 = vadd.f32 %v2855_v24, %v7957_v12  ;;  %v3621_v12 = vld [vmem:[#allocation2 + $0xc0] sm:$0xe]  ;;  %v6703_v35 = vld [vmem:[#allocation2 + $0xcc] sm:$0xff] }
 0x2cb   : > { %v6413_v27 = vrot.slane %v3621_v12, 9 }
 0x2cc   : > { %v8422_v38 = vadd.f32 %v3521_v55, %v2919_v37  ;;  %v3424_v55 = vpack.c.b16 %v3408_v62, %v3407_v2  ;;  %v8433_v26 = vpop.f32.mrf.mxu0 }
 0x2cd   : > { %v3778_v24 = vsel %vm7388_vm11, %v6413_v27, %v3777_v32 }
 0x2ce   : > { %6436 = vmatmul.msk.bf16.gmra.mxu3 %vm1878_vm12, %v3833_v36  ;;  %v3817_v20 = vunpack.c.l.b16 %v3778_v24  ;;  %v3818_v36 = vunpack.c.l.b16 %v3781_v14  ;;  %v4375_v24 = vrot.slane %v4373_v45, 5 }
 0x2cf   : > { %v3526_v22 = vpop.f32.mrf.mxu2 }
 0x2d0   : > { %v3834_v27 = vpack.c.b16 %v3818_v36, %v3817_v20 }
 0x2d1   : > { %v3934_v7 = vpop.f32.mrf.mxu3  ;;  %v2858_v15 = vpop.f32.mrf.mxu1 }
 0x2d2   : > { %v2920_v21 = vadd.f32 %v2858_v15, %v7982_v25  ;;  %v4317_v25 = vld [vmem:[#allocation2 + $0x20] sm:$0x1]  ;;  %v4377_v15 = vshrl.u32 %v4316_v43, 16 }
 0x2d3   : > { %v5050_v2 = vrot.slane %v4317_v25, 5  ;;  %v6681_v43 = vld [vmem:[#allocation2 + $0xc0] sm:$0xff] }
 0x2d4   : > { %v3586_v16 = vadd.f32 %v3524_v60, %v2920_v21  ;;  %6372 = vmatmul.msk.bf16.gmra.mxu1 %vm1878_vm12, %v6680_v3  ;;  %6397 = vmatmul.msk.bf16.gmra.mxu2 %vm1878_vm12, %v3424_v55  ;;  %v4981_v60 = vld [vmem:[#allocation2 + $0x18] sm:$0xe] }
 0x2d5   : > { %v6550_v62 = vrot.slane %v4981_v60, 9  ;;  %v4319_v60 = vld [vmem:[#allocation2 + $0x28] sm:$0xf] }
 0x2d6   : > { %v8435_v37 = vadd.f32 %v3934_v7, %v3586_v16  ;;  %v5051_v7 = vsel %vm7388_vm11, %v5049_v42, %v5050_v2  ;;  %v4367_v16 = vshll.u32 %v4315_v8, 16 }
 0x2d7   : > { %6525 = vmatmul.msk.bf16.gmra.mxu0 %vm1878_vm12, %v6703_v35  ;;  %v3529_v44 = vpop.f32.mrf.mxu2  ;;  %v5048_v3 = vsel %vm7388_vm11, %v6550_v62, %v5047_v11  ;;  %v5163_v55 = vunpack.c.l.b16 %v5051_v7  ;;  %v4364_v35 = vshrl.u32 %v4315_v8, 16  ;;  %v4383_v11 = vshll.u32 %v4317_v25, 16  ;;  %v4320_v8 = vld [vmem:[#allocation2 + $0x2c] sm:$0x1] }
 0x2d8   : > { %v5162_v36 = vunpack.c.l.b16 %v5048_v3 }
 0x2d9   : > { %v8438_v23 = vpop.f32.mrf.mxu3  ;;  %v2860_v12 = vpop.f32.mrf.mxu1  ;;  %v4366_v2 = vrot.slane %v4364_v35, 4 }
 0x2da   : > { %9057 = vst [vmem:[#allocation22_spill] sm:$0xff] %v8438_v23  ;;  %v2921_v32 = vadd.f32 %v2860_v12, %v8004_v49  ;;  %v4379_v49 = vrot.slane %v4377_v15, 4  ;;  %v5054_v23 = vrot.slane %v4319_v60, 5  ;;  %v4982_v15 = vld [vmem:[#allocation2 + $0x24] sm:$0xe] }
 0x2dc   : > { %v8443_v21 = vadd.f32 %v3526_v22, %v2921_v32  ;;  %v5194_v22 = vpack.c.b16 %v5163_v55, %v5162_v36  ;;  %v4369_v32 = vrot.slane %v4367_v16, 5  ;;  %v5056_v3 = vrot.slane %v5054_v23, 4 }
 0x2dd   : > { %v4385_v16 = vrot.slane %v4383_v11, 5 }
 0x2de   : > { %9058 = vst [vmem:[#allocation23_spill] sm:$0xff] %v8443_v21  ;;  %6437 = vmatmul.msk.bf16.gmra.mxu3 %vm1878_vm12, %v3834_v27  ;;  %v4380_v27 = vor.u32 %v4379_v49, %v4375_v24  ;;  %v4370_v7 = vor.u32 %v4369_v32, %v4366_v2  ;;  %v5057_v49 = vrot.slane %v4320_v8, 5  ;;  %v4318_v2 = vld [vmem:[#allocation2 + $0x24] sm:$0xf] }
 0x2df   : > { %v3531_v20 = vpop.f32.mrf.mxu2 }
 0x2e0   : > { %v4381_v45 = vrot.slane %v4380_v27, 4 }
 0x2e1   : > { %v3939_v14 = vpop.f32.mrf.mxu3  ;;  %v2863_v42 = vpop.f32.mrf.mxu1  ;;  %v9077_v33 = vld [vmem:[#allocation22_spill] sm:$0xff] }
 0x2e2   : > { %v2922_v12 = vadd.f32 %v2863_v42, %v8026_v58  ;;  %v6710_v58 = vld [vmem:[%s9017_s7] sm:$0xff]  ;;  %v4386_v36 = vsel %vm7465_vm15, %v4381_v45, %v4385_v16  ;;  %v5058_v42 = vsel %vm7388_vm11, %v5056_v3, %v5057_v49 }
 0x2e3   : > { %5582 = vmatpush.bf16.msra.mxu3 %v6710_v58  ;;  %v5165_v11 = vunpack.c.l.b16 %v5058_v42  ;;  %v4391_v58 = vshll.u32 %v4318_v2, 16 }
 0x2e4   : > { %v3588_v21 = vadd.f32 %v3529_v44, %v2922_v12  ;;  %6373 = vmatmul.msk.bf16.gmra.mxu1 %vm1878_vm12, %v6681_v43  ;;  %6574 = vmatmul.msk.bf16.vlgmr.msra.gmra.mxu2 %vm1878_vm12, %v5194_v22  ;;  %v4397_v12 = vshll.u32 %v4319_v60, 16  ;;  %v4401_v43 = vshrl.u32 %v4319_v60, 16  ;;  %v4322_v60 = vld [vmem:[#allocation2 + $0x34] sm:$0xf] }
 0x2e6   : > { %v8451_v62 = vadd.f32 %v3939_v14, %v3588_v21  ;;  %v4371_v21 = vrot.slane %v4370_v7, 4  ;;  %v6551_v14 = vrot.slane %v4982_v15, 9  ;;  %v4388_v7 = vshrl.u32 %v4318_v2, 16 }
 0x2e7   : > { %v3534_v35 = vpop.f32.mrf.mxu2  ;;  %v4399_v15 = vrot.slane %v4397_v12, 5  ;;  %v4403_v45 = vrot.slane %v4401_v43, 4  ;;  %v4323_v12 = vld [vmem:[#allocation2 + $0x38] sm:$0x1] }
 0x2e8   : > { %9059 = vst [vmem:[#allocation24_spill] sm:$0xff] %v8451_v62  ;;  %v4376_v32 = vsel %vm7465_vm15, %v4371_v21, %v4375_v24  ;;  %v5055_v27 = vsel %vm7388_vm11, %v6551_v14, %v5054_v23  ;;  %v4390_v24 = vrot.slane %v4388_v7, 4  ;;  %v4393_v21 = vrot.slane %v4391_v58, 5 }
 0x2e9   : > { %v8456_v55 = vpop.f32.mrf.mxu3  ;;  %v2865_v44 = vpop.f32.mrf.mxu1  ;;  %v4752_v3 = vunpack.c.l.b16 %v4376_v32  ;;  %v5164_v49 = vunpack.c.l.b16 %v5055_v27  ;;  %v4404_v62 = vor.u32 %v4403_v45, %v4399_v15  ;;  %v5061_v23 = vrot.slane %v4322_v60, 5  ;;  %v4321_v45 = vld [vmem:[#allocation2 + $0x30] sm:$0xf] }
 0x2ea   : > { %9060 = vst [vmem:[#allocation25_spill] sm:$0xff] %v8456_v55  ;;  %v2923_v25 = vadd.f32 %v2865_v44, %v8044_v19  ;;  %v4753_v19 = vunpack.c.l.b16 %v4386_v36  ;;  %v4407_v36 = vshll.u32 %v4320_v8, 16  ;;  %v4394_v43 = vor.u32 %v4393_v21, %v4390_v24 }
 0x2eb   : > { %v4405_v2 = vrot.slane %v4404_v62, 4  ;;  %v5063_v32 = vrot.slane %v5061_v23, 4  ;;  %v5064_v58 = vrot.slane %v4323_v12, 5  ;;  %v4415_v24 = vshll.u32 %v4321_v45, 16 }
 0x2ec   : > { %v8463_v22 = vadd.f32 %v3531_v20, %v2923_v25  ;;  %v4784_v55 = vpack.c.b16 %v4753_v19, %v4752_v3  ;;  %v4983_v19 = vld [vmem:[#allocation2 + $0x30] sm:$0xe]  ;;  %v4409_v7 = vrot.slane %v4407_v36, 5  ;;  %v4425_v3 = vshrl.u32 %v4322_v60, 16 }
 0x2ed   : > { %v5065_v62 = vsel %vm7388_vm11, %v5063_v32, %v5064_v58  ;;  %v4417_v58 = vrot.slane %v4415_v24, 5  ;;  %v4984_v24 = vld [vmem:[#allocation2 + $0x3c] sm:$0xe] }
 0x2ee   : > { %9061 = vst [vmem:[#allocation26_spill] sm:$0xff] %v8463_v22  ;;  %v5195_v22 = vpack.c.b16 %v5165_v11, %v5164_v49  ;;  %v4410_v8 = vsel %vm7465_vm15, %v4405_v2, %v4409_v7  ;;  %v4427_v36 = vrot.slane %v4425_v3, 4  ;;  %v4325_v7 = vld [vmem:[#allocation2 + $0x40] sm:$0xf] }
 0x2ef   : > { %v3536_v16 = vpop.f32.mrf.mxu2  ;;  %v4755_v21 = vunpack.c.l.b16 %v4410_v8 }
 0x2f1   : > { %v3944_v44 = vpop.f32.mrf.mxu3  ;;  %v2868_v20 = vpop.f32.mrf.mxu1 }
 0x2f2   : > { %v2924_v25 = vadd.f32 %v2868_v20, %v8053_v52 }
 0x2f4   : > { %v3590_v14 = vadd.f32 %v3534_v35, %v2924_v25  ;;  %6534 = vmatmul.msk.bf16.vlgmr.msra.gmra.mxu1 %vm1878_vm12, %v4784_v55  ;;  %6575 = vmatmul.msk.bf16.gmra.mxu2 %vm1878_vm12, %v5195_v22  ;;  %v4421_v55 = vshll.u32 %v4322_v60, 16  ;;  %v4395_v22 = vrot.slane %v4394_v43, 4  ;;  %v5167_v60 = vunpack.c.l.b16 %v5065_v62  ;;  %v4326_v62 = vld [vmem:[#allocation2 + $0x44] sm:$0x1] }
 0x2f6   : > { %v8472_v42 = vadd.f32 %v3944_v44, %v3590_v14  ;;  %v6552_v44 = vrot.slane %v4983_v19, 9  ;;  %v4400_v20 = vsel %vm7465_vm15, %v4395_v22, %v4399_v15  ;;  %v4423_v14 = vrot.slane %v4421_v55, 5 }
 0x2f7   : > { %v3539_v52 = vpop.f32.mrf.mxu2  ;;  %v4754_v19 = vunpack.c.l.b16 %v4400_v20 }
 0x2f8   : > { %v5062_v25 = vsel %vm7388_vm11, %v6552_v44, %v5061_v23  ;;  %v5068_v23 = vrot.slane %v4325_v7, 5 }
 0x2f9   : > { %v8474_v27 = vpop.f32.mrf.mxu3  ;;  %v2870_v11 = vpop.f32.mrf.mxu1  ;;  %v4785_v15 = vpack.c.b16 %v4755_v21, %v4754_v19 }
 0x2fa   : > { %9062 = vst [vmem:[#allocation27_spill] sm:$0xff] %v8474_v27  ;;  %v2925_v35 = vadd.f32 %v2870_v11, %v8069_v57  ;;  %v4412_v57 = vshrl.u32 %v4321_v45, 16  ;;  %v5166_v11 = vunpack.c.l.b16 %v5062_v25  ;;  %v4428_v27 = vor.u32 %v4427_v36, %v4423_v14 }
 0x2fb   : > { %v4431_v45 = vshll.u32 %v4323_v12, 16  ;;  %v5070_v20 = vrot.slane %v5068_v23, 4  ;;  %v6553_v12 = vrot.slane %v4984_v24, 9 }
 0x2fc   : > { %v8481_v49 = vadd.f32 %v3536_v16, %v2925_v35  ;;  %v4414_v16 = vrot.slane %v4412_v57, 4  ;;  %v5196_v22 = vpack.c.b16 %v5167_v60, %v5166_v11  ;;  %v4429_v8 = vrot.slane %v4428_v27, 4 }
 0x2fd   : > { %v5071_v60 = vrot.slane %v4326_v62, 5  ;;  %v4445_v27 = vshll.u32 %v4325_v7, 16  ;;  %v4449_v11 = vshrl.u32 %v4325_v7, 16  ;;  %v4328_v7 = vld [vmem:[#allocation2 + $0x4c] sm:$0xf] }
 0x2fe   : > { %v4418_v3 = vor.u32 %v4417_v58, %v4414_v16  ;;  %v4324_v16 = vld [vmem:[#allocation2 + $0x3c] sm:$0xf] }
 0x2ff   : > { %v3541_v2 = vpop.f32.mrf.mxu2 }
 0x300   : > { %v4419_v36 = vrot.slane %v4418_v3, 4  ;;  %v4451_v3 = vrot.slane %v4449_v11, 4 }
 0x301   : > { %v3949_v43 = vpop.f32.mrf.mxu3  ;;  %v2873_v32 = vpop.f32.mrf.mxu1 }
 0x302   : > { %v2926_v35 = vadd.f32 %v2873_v32, %v8076_v50  ;;  %v4433_v50 = vrot.slane %v4431_v45, 5  ;;  %v4424_v58 = vsel %vm7465_vm15, %v4419_v36, %v4423_v14  ;;  %v4447_v45 = vrot.slane %v4445_v27, 5  ;;  %v4329_v27 = vld [vmem:[#allocation2 + $0x50] sm:$0x1] }
 0x304   : > { %v3592_v44 = vadd.f32 %v3539_v52, %v2926_v35  ;;  %6535 = vmatmul.msk.bf16.gmra.mxu1 %vm1878_vm12, %v4785_v15  ;;  %6576 = vmatmul.msk.bf16.gmra.mxu2 %vm1878_vm12, %v5196_v22  ;;  %v4434_v19 = vsel %vm7465_vm15, %v4429_v8, %v4433_v50  ;;  %v5069_v35 = vsel %vm7388_vm11, %v6553_v12, %v5068_v23  ;;  %v4436_v22 = vshrl.u32 %v4324_v16, 16 }
 0x305   : > { %v5168_v24 = vunpack.c.l.b16 %v5069_v35  ;;  %v5075_v23 = vrot.slane %v4328_v7, 5  ;;  %v4455_v12 = vshll.u32 %v4326_v62, 16 }
 0x306   : > { %v8490_v55 = vadd.f32 %v3949_v43, %v3592_v44  ;;  %v5072_v43 = vsel %vm7388_vm11, %v5070_v20, %v5071_v60  ;;  %v4439_v44 = vshll.u32 %v4324_v16, 16  ;;  %v4756_v20 = vunpack.c.l.b16 %v4424_v58 }
 0x307   : > { %v3544_v57 = vpop.f32.mrf.mxu2  ;;  %v5169_v15 = vunpack.c.l.b16 %v5072_v43  ;;  %v4438_v14 = vrot.slane %v4436_v22, 4  ;;  %v5077_v58 = vrot.slane %v5075_v23, 4  ;;  %v4457_v22 = vrot.slane %v4455_v12, 5 }
 0x308   : > { %v4441_v36 = vrot.slane %v4439_v44, 5  ;;  %v5078_v44 = vrot.slane %v4329_v27, 5 }
 0x309   : > { %v8492_v25 = vpop.f32.mrf.mxu3  ;;  %v2875_v21 = vpop.f32.mrf.mxu1 }
 0x30a   : > { %9063 = vst [vmem:[#allocation28_spill] sm:$0xff] %v8492_v25  ;;  %v2927_v52 = vadd.f32 %v2875_v21, %v8093_v34  ;;  %v4757_v34 = vunpack.c.l.b16 %v4434_v19  ;;  %v4452_v25 = vor.u32 %v4451_v3, %v4447_v45  ;;  %v4442_v11 = vor.u32 %v4441_v36, %v4438_v14  ;;  %v4327_v3 = vld [vmem:[#allocation2 + $0x48] sm:$0xf] }
 0x30b   : > { %v4463_v14 = vshll.u32 %v4327_v3, 16 }
 0x30c   : > { %v8499_v32 = vadd.f32 %v3541_v2, %v2927_v52  ;;  %v4786_v60 = vpack.c.b16 %v4757_v34, %v4756_v20  ;;  %v5197_v52 = vpack.c.b16 %v5169_v15, %v5168_v24  ;;  %v4453_v16 = vrot.slane %v4452_v25, 4  ;;  %v4985_v34 = vld [vmem:[#allocation2 + $0x48] sm:$0xe] }
 0x30d   : > { %v4469_v20 = vshll.u32 %v4328_v7, 16  ;;  %v4473_v24 = vshrl.u32 %v4328_v7, 16  ;;  %v5079_v25 = vsel %vm7388_vm11, %v5077_v58, %v5078_v44  ;;  %v4465_v44 = vrot.slane %v4463_v14, 5  ;;  %v4986_v14 = vld [vmem:[#allocation2 + $0x54] sm:$0xe] }
 0x30e   : > { %v4458_v62 = vsel %vm7465_vm15, %v4453_v16, %v4457_v22  ;;  %v5171_v7 = vunpack.c.l.b16 %v5079_v25  ;;  %v4331_v22 = vld [vmem:[#allocation2 + $0x58] sm:$0xf]  ;;  %v4332_v25 = vld [vmem:[#allocation2 + $0x5c] sm:$0x1] }
 0x30f   : > { %v3546_v50 = vpop.f32.mrf.mxu2  ;;  %v4759_v36 = vunpack.c.l.b16 %v4458_v62  ;;  %v4475_v12 = vrot.slane %v4473_v24, 4 }
 0x311   : > { %v3954_v8 = vpop.f32.mrf.mxu3  ;;  %v2878_v2 = vpop.f32.mrf.mxu1 }
 0x312   : > { %v2928_v21 = vadd.f32 %v2878_v2, %v8103_v61  ;;  %v4443_v2 = vrot.slane %v4442_v11, 4 }
 0x314   : > { %v3594_v19 = vadd.f32 %v3544_v57, %v2928_v21  ;;  %6536 = vmatmul.msk.bf16.gmra.mxu1 %vm1878_vm12, %v4786_v60  ;;  %6577 = vmatmul.msk.bf16.gmra.mxu2 %vm1878_vm12, %v5197_v52  ;;  %v4448_v60 = vsel %vm7465_vm15, %v4443_v2, %v4447_v45 }
 0x316   : > { %v8508_v43 = vadd.f32 %v3954_v8, %v3594_v19  ;;  %v6554_v8 = vrot.slane %v4985_v34, 9  ;;  %v4471_v19 = vrot.slane %v4469_v20, 5  ;;  %v4758_v34 = vunpack.c.l.b16 %v4448_v60 }
 0x317   : > { %v3549_v61 = vpop.f32.mrf.mxu2 }
 0x318   : > { %v5076_v52 = vsel %vm7388_vm11, %v6554_v8, %v5075_v23  ;;  %v4787_v45 = vpack.c.b16 %v4759_v36, %v4758_v34  ;;  %v5082_v23 = vrot.slane %v4331_v22, 5 }
 0x319   : > { %v8510_v35 = vpop.f32.mrf.mxu3  ;;  %v2880_v15 = vpop.f32.mrf.mxu1 }
 0x31a   : > { %9064 = vst [vmem:[#allocation29_spill] sm:$0xff] %v8510_v35  ;;  %v2929_v57 = vadd.f32 %v2880_v15, %v8120_v39  ;;  %v4460_v39 = vshrl.u32 %v4327_v3, 16  ;;  %v5170_v15 = vunpack.c.l.b16 %v5076_v52  ;;  %v4476_v35 = vor.u32 %v4475_v12, %v4471_v19 }
 0x31b   : > { %v4479_v3 = vshll.u32 %v4329_v27, 16  ;;  %v5084_v60 = vrot.slane %v5082_v23, 4  ;;  %v6555_v27 = vrot.slane %v4986_v14, 9 }
 0x31c   : > { %v8517_v21 = vadd.f32 %v3546_v50, %v2929_v57  ;;  %v4462_v50 = vrot.slane %v4460_v39, 4  ;;  %v5198_v2 = vpack.c.b16 %v5171_v7, %v5170_v15  ;;  %v4477_v62 = vrot.slane %v4476_v35, 4 }
 0x31d   : > { %v5085_v7 = vrot.slane %v4332_v25, 5  ;;  %v4493_v35 = vshll.u32 %v4331_v22, 16  ;;  %v4497_v15 = vshrl.u32 %v4331_v22, 16  ;;  %v4334_v22 = vld [vmem:[#allocation2 + $0x64] sm:$0xf] }
 0x31e   : > { %v4466_v24 = vor.u32 %v4465_v44, %v4462_v50  ;;  %v4330_v50 = vld [vmem:[#allocation2 + $0x54] sm:$0xf] }
 0x31f   : > { %v3551_v16 = vpop.f32.mrf.mxu2 }
 0x320   : > { %v4467_v12 = vrot.slane %v4466_v24, 4  ;;  %v4499_v24 = vrot.slane %v4497_v15, 4 }
 0x321   : > { %v3959_v11 = vpop.f32.mrf.mxu3  ;;  %v2883_v58 = vpop.f32.mrf.mxu1 }
 0x322   : > { %v2930_v57 = vadd.f32 %v2883_v58, %v8130_v17  ;;  %v4481_v17 = vrot.slane %v4479_v3, 5  ;;  %v4472_v44 = vsel %vm7465_vm15, %v4467_v12, %v4471_v19  ;;  %v4495_v3 = vrot.slane %v4493_v35, 5  ;;  %v4335_v35 = vld [vmem:[#allocation2 + $0x68] sm:$0x1] }
 0x324   : > { %v3596_v8 = vadd.f32 %v3549_v61, %v2930_v57  ;;  %6537 = vmatmul.msk.bf16.gmra.mxu1 %vm1878_vm12, %v4787_v45  ;;  %6578 = vmatmul.msk.bf16.gmra.mxu2 %vm1878_vm12, %v5198_v2  ;;  %v4482_v34 = vsel %vm7465_vm15, %v4477_v62, %v4481_v17  ;;  %v5083_v57 = vsel %vm7388_vm11, %v6555_v27, %v5082_v23  ;;  %v4484_v2 = vshrl.u32 %v4330_v50, 16 }
 0x325   : > { %v5172_v14 = vunpack.c.l.b16 %v5083_v57  ;;  %v5089_v23 = vrot.slane %v4334_v22, 5  ;;  %v4503_v27 = vshll.u32 %v4332_v25, 16 }
 0x326   : > { %v8526_v20 = vadd.f32 %v3959_v11, %v3596_v8  ;;  %v5086_v11 = vsel %vm7388_vm11, %v5084_v60, %v5085_v7  ;;  %v4487_v8 = vshll.u32 %v4330_v50, 16  ;;  %v4760_v60 = vunpack.c.l.b16 %v4472_v44 }
 0x327   : > { %v3554_v39 = vpop.f32.mrf.mxu2  ;;  %v5173_v45 = vunpack.c.l.b16 %v5086_v11  ;;  %v4486_v19 = vrot.slane %v4484_v2, 4  ;;  %v5091_v44 = vrot.slane %v5089_v23, 4  ;;  %v4505_v2 = vrot.slane %v4503_v27, 5 }
 0x328   : > { %v4489_v12 = vrot.slane %v4487_v8, 5  ;;  %v5092_v8 = vrot.slane %v4335_v35, 5 }
 0x329   : > { %v8528_v52 = vpop.f32.mrf.mxu3  ;;  %v2885_v36 = vpop.f32.mrf.mxu1 }
 0x32a   : > { %9065 = vst [vmem:[#allocation30_spill] sm:$0xff] %v8528_v52  ;;  %v2931_v61 = vadd.f32 %v2885_v36, %v8147_v40  ;;  %v4761_v40 = vunpack.c.l.b16 %v4482_v34  ;;  %v4500_v52 = vor.u32 %v4499_v24, %v4495_v3  ;;  %v4490_v15 = vor.u32 %v4489_v12, %v4486_v19  ;;  %v4333_v24 = vld [vmem:[#allocation2 + $0x60] sm:$0xf] }
 0x32b   : > { %v4511_v19 = vshll.u32 %v4333_v24, 16 }
 0x32c   : > { %v8535_v58 = vadd.f32 %v3551_v16, %v2931_v61  ;;  %v4788_v7 = vpack.c.b16 %v4761_v40, %v4760_v60  ;;  %v5199_v61 = vpack.c.b16 %v5173_v45, %v5172_v14  ;;  %v4501_v50 = vrot.slane %v4500_v52, 4  ;;  %v4987_v40 = vld [vmem:[#allocation2 + $0x60] sm:$0xe] }
 0x32d   : > { %v4517_v60 = vshll.u32 %v4334_v22, 16  ;;  %v4521_v14 = vshrl.u32 %v4334_v22, 16  ;;  %v5093_v52 = vsel %vm7388_vm11, %v5091_v44, %v5092_v8  ;;  %v4513_v8 = vrot.slane %v4511_v19, 5  ;;  %v4988_v19 = vld [vmem:[#allocation2 + $0x6c] sm:$0xe] }
 0x32e   : > { %v4506_v25 = vsel %vm7465_vm15, %v4501_v50, %v4505_v2  ;;  %v5175_v22 = vunpack.c.l.b16 %v5093_v52  ;;  %v4337_v2 = vld [vmem:[#allocation2 + $0x70] sm:$0xf]  ;;  %v4338_v52 = vld [vmem:[#allocation2 + $0x74] sm:$0x1] }
 0x32f   : > { %v3556_v17 = vpop.f32.mrf.mxu2  ;;  %v4763_v12 = vunpack.c.l.b16 %v4506_v25  ;;  %v4523_v27 = vrot.slane %v4521_v14, 4 }
 0x331   : > { %v3964_v62 = vpop.f32.mrf.mxu3  ;;  %v2888_v16 = vpop.f32.mrf.mxu1 }
 0x332   : > { %v2932_v36 = vadd.f32 %v2888_v16, %v8157_v46  ;;  %v4491_v16 = vrot.slane %v4490_v15, 4 }
 0x334   : > { %v3598_v34 = vadd.f32 %v3554_v39, %v2932_v36  ;;  %6538 = vmatmul.msk.bf16.gmra.mxu1 %vm1878_vm12, %v4788_v7  ;;  %6579 = vmatmul.msk.bf16.gmra.mxu2 %vm1878_vm12, %v5199_v61  ;;  %v4496_v7 = vsel %vm7465_vm15, %v4491_v16, %v4495_v3 }
 0x336   : > { %v8544_v11 = vadd.f32 %v3964_v62, %v3598_v34  ;;  %v6556_v62 = vrot.slane %v4987_v40, 9  ;;  %v4519_v34 = vrot.slane %v4517_v60, 5  ;;  %v4762_v40 = vunpack.c.l.b16 %v4496_v7 }
 0x337   : > { %v3559_v46 = vpop.f32.mrf.mxu2 }
 0x338   : > { %v5090_v61 = vsel %vm7388_vm11, %v6556_v62, %v5089_v23  ;;  %v4789_v3 = vpack.c.b16 %v4763_v12, %v4762_v40  ;;  %v5096_v23 = vrot.slane %v4337_v2, 5 }
 0x339   : > { %v8546_v57 = vpop.f32.mrf.mxu3  ;;  %v2890_v45 = vpop.f32.mrf.mxu1 }
 0x33a   : > { %9066 = vst [vmem:[#allocation31_spill] sm:$0xff] %v8546_v57  ;;  %v2933_v39 = vadd.f32 %v2890_v45, %v8174_v9  ;;  %v4508_v9 = vshrl.u32 %v4333_v24, 16  ;;  %v5174_v45 = vunpack.c.l.b16 %v5090_v61  ;;  %v4524_v57 = vor.u32 %v4523_v27, %v4519_v34 }
 0x33b   : > { %v4527_v24 = vshll.u32 %v4335_v35, 16  ;;  %v5098_v7 = vrot.slane %v5096_v23, 4  ;;  %v6557_v35 = vrot.slane %v4988_v19, 9  ;;  %v4340_v19 = vld [vmem:[#allocation2 + $0x7c] sm:$0xf] }
 0x33c   : > { %v8553_v36 = vadd.f32 %v3556_v17, %v2933_v39  ;;  %v4510_v17 = vrot.slane %v4508_v9, 4  ;;  %v5200_v16 = vpack.c.b16 %v5175_v22, %v5174_v45  ;;  %v4525_v25 = vrot.slane %v4524_v57, 4  ;;  %v4336_v57 = vld [vmem:[#allocation2 + $0x6c] sm:$0xf] }
 0x33d   : > { %v5099_v22 = vrot.slane %v4338_v52, 5  ;;  %v4541_v45 = vshll.u32 %v4337_v2, 16 }
 0x33e   : > { %v4514_v14 = vor.u32 %v4513_v8, %v4510_v17 }
 0x33f   : > { %v3561_v50 = vpop.f32.mrf.mxu2 }
 0x340   : > { %v4515_v27 = vrot.slane %v4514_v14, 4  ;;  %v4543_v14 = vrot.slane %v4541_v45, 5  ;;  %v4341_v45 = vld [vmem:[#allocation2 + $0x80] sm:$0x1] }
 0x341   : > { %v3969_v15 = vpop.f32.mrf.mxu3  ;;  %v2893_v44 = vpop.f32.mrf.mxu1 }
 0x342   : > { %v2934_v39 = vadd.f32 %v2893_v44, %v8184_v41  ;;  %v4529_v41 = vrot.slane %v4527_v24, 5  ;;  %v4545_v44 = vshrl.u32 %v4337_v2, 16  ;;  %v4520_v8 = vsel %vm7465_vm15, %v4515_v27, %v4519_v34 }
 0x343   : > { %v4764_v24 = vunpack.c.l.b16 %v4520_v8  ;;  %v4989_v8 = vld [vmem:[#allocation2 + $0x78] sm:$0xe] }
 0x344   : > { %v3600_v62 = vadd.f32 %v3559_v46, %v2934_v39  ;;  %6539 = vmatmul.msk.bf16.gmra.mxu1 %vm1878_vm12, %v4789_v3  ;;  %6580 = vmatmul.msk.bf16.gmra.mxu2 %vm1878_vm12, %v5200_v16  ;;  %v4530_v40 = vsel %vm7465_vm15, %v4525_v25, %v4529_v41  ;;  %v4532_v16 = vshrl.u32 %v4336_v57, 16  ;;  %v4547_v25 = vrot.slane %v4545_v44, 4 }
 0x345   : > { %v4765_v39 = vunpack.c.l.b16 %v4530_v40 }
 0x346   : > { %v8562_v60 = vadd.f32 %v3969_v15, %v3600_v62  ;;  %v5100_v15 = vsel %vm7388_vm11, %v5098_v7, %v5099_v22  ;;  %v4535_v62 = vshll.u32 %v4336_v57, 16  ;;  %v4534_v34 = vrot.slane %v4532_v16, 4 }
 0x347   : > { %v3564_v9 = vpop.f32.mrf.mxu2  ;;  %v5177_v3 = vunpack.c.l.b16 %v5100_v15  ;;  %v4548_v40 = vor.u32 %v4547_v25, %v4543_v14  ;;  %v5106_v16 = vrot.slane %v4341_v45, 5 }
 0x348   : > { %v4537_v27 = vrot.slane %v4535_v62, 5 }
 0x349   : > { %v8564_v61 = vpop.f32.mrf.mxu3  ;;  %v2895_v12 = vpop.f32.mrf.mxu1  ;;  %v4549_v44 = vrot.slane %v4548_v40, 4 }
 0x34a   : > { %9067 = vst [vmem:[#allocation32_spill] sm:$0xff] %v8564_v61  ;;  %v2935_v46 = vadd.f32 %v2895_v12, %v8201_v31  ;;  %v5097_v31 = vsel %vm7388_vm11, %v6557_v35, %v5096_v23  ;;  %v5103_v61 = vrot.slane %v4340_v19, 5  ;;  %v4551_v35 = vshll.u32 %v4338_v52, 16 }
 0x34b   : > { %v5176_v7 = vunpack.c.l.b16 %v5097_v31  ;;  %v4538_v57 = vor.u32 %v4537_v27, %v4534_v34 }
 0x34c   : > { %v8571_v17 = vadd.f32 %v3561_v50, %v2935_v46  ;;  %v4790_v50 = vpack.c.b16 %v4765_v39, %v4764_v24  ;;  %v5105_v39 = vrot.slane %v5103_v61, 4 }
 0x34d   : > { %v5201_v46 = vpack.c.b16 %v5177_v3, %v5176_v7  ;;  %v4553_v3 = vrot.slane %v4551_v35, 5  ;;  %v4539_v24 = vrot.slane %v4538_v57, 4 }
 0x34e   : > { %v5107_v7 = vsel %vm7388_vm11, %v5105_v39, %v5106_v16 }
 0x34f   : > { %v3566_v41 = vpop.f32.mrf.mxu2  ;;  %v4554_v52 = vsel %vm7465_vm15, %v4549_v44, %v4553_v3  ;;  %v5179_v27 = vunpack.c.l.b16 %v5107_v7 }
 0x350   : > { %v4767_v34 = vunpack.c.l.b16 %v4554_v52  ;;  %v4575_v52 = vshll.u32 %v4341_v45, 16 }
 0x351   : > { %v2898_v12 = vpop.f32.mrf.mxu1  ;;  %v3974_v2 = vpop.f32.mrf.mxu3 }
 0x352   : > { %v2936_v22 = vadd.f32 %v2898_v12, %v8211_v48  ;;  %v4565_v12 = vshll.u32 %v4340_v19, 16 }
 0x354   : > { %v3602_v23 = vadd.f32 %v3564_v9, %v2936_v22  ;;  %6540 = vmatmul.msk.bf16.gmra.mxu1 %vm1878_vm12, %v4790_v50  ;;  %6581 = vmatmul.msk.bf16.gmra.mxu2 %vm1878_vm12, %v5201_v46  ;;  %v6558_v9 = vrot.slane %v4989_v8, 9  ;;  %v4339_v22 = vld [vmem:[#allocation2 + $0x78] sm:$0xf]  ;;  %v4544_v46 = vsel %vm7465_vm15, %v4539_v24, %v4543_v14  ;;  %v4567_v35 = vrot.slane %v4565_v12, 5  ;;  %v4344_v12 = vld [vmem:[#allocation2 + $0x8c] sm:$0x1] }
 0x355   : > { %v4556_v40 = vshrl.u32 %v4339_v22, 16  ;;  %v4766_v8 = vunpack.c.l.b16 %v4544_v46 }
 0x356   : > { %v8580_v15 = vadd.f32 %v3974_v2, %v3602_v23  ;;  %v4569_v2 = vshrl.u32 %v4340_v19, 16  ;;  %v4559_v23 = vshll.u32 %v4339_v22, 16 }
 0x357   : > { %v3569_v31 = vpop.f32.mrf.mxu2  ;;  %v4791_v3 = vpack.c.b16 %v4767_v34, %v4766_v8 }
 0x358   : > { %v4571_v57 = vrot.slane %v4569_v2, 4  ;;  %v4561_v14 = vrot.slane %v4559_v23, 5 }
 0x359   : > { %v2900_v48 = vpop.f32.mrf.mxu1  ;;  %v8583_v25 = vpop.f32.mrf.mxu3 }
 0x35a   : > { %v2937_v62 = vadd.f32 %v2900_v48, %v8228_v53  ;;  %9068 = vst [vmem:[#allocation33_spill] sm:$0xff] %v8583_v25  ;;  %v5104_v53 = vsel %vm7388_vm11, %v6558_v9, %v5103_v61  ;;  %v4343_v48 = vld [vmem:[#allocation2 + $0x88] sm:$0xf]  ;;  %v4572_v24 = vor.u32 %v4571_v57, %v4567_v35 }
 0x35b   : > { %v5178_v39 = vunpack.c.l.b16 %v5104_v53  ;;  %v5110_v25 = vrot.slane %v4343_v48, 5  ;;  %v4990_v53 = vld [vmem:[#allocation2 + $0x84] sm:$0xe]  ;;  %v4589_v57 = vshll.u32 %v4343_v48, 16  ;;  %v4593_v8 = vshrl.u32 %v4343_v48, 16 }
 0x35c   : > { %v8589_v50 = vadd.f32 %v3566_v41, %v2937_v62  ;;  %v4558_v62 = vrot.slane %v4556_v40, 4  ;;  %v4573_v22 = vrot.slane %v4572_v24, 4  ;;  %v5113_v40 = vrot.slane %v4344_v12, 5 }
 0x35d   : > { %v5202_v16 = vpack.c.b16 %v5179_v27, %v5178_v39  ;;  %v5112_v46 = vrot.slane %v5110_v25, 4  ;;  %v4577_v27 = vrot.slane %v4575_v52, 5  ;;  %v4346_v52 = vld [vmem:[#allocation2 + $0x94] sm:$0xf] }
 0x35e   : > { %v4562_v2 = vor.u32 %v4561_v14, %v4558_v62 }
 0x35f   : > { %v3571_v44 = vpop.f32.mrf.mxu2  ;;  %v4578_v45 = vsel %vm7465_vm15, %v4573_v22, %v4577_v27 }
 0x360   : > { %v4563_v39 = vrot.slane %v4562_v2, 4  ;;  %v4769_v24 = vunpack.c.l.b16 %v4578_v45  ;;  %v4283_v2 = vadd.f32 %v8306_v28, %v8267_v0  ;;  %v8618_v28 = vld [vmem:[%s9015_s5] ss:$0 sm:$0xff] }
 0x361   : > { %v2903_v19 = vpop.f32.mrf.mxu1  ;;  %v3979_v9 = vpop.f32.mrf.mxu3 }
 0x362   : > { %v2938_v41 = vadd.f32 %v2903_v19, %v8238_v29  ;;  %v6559_v19 = vrot.slane %v4990_v53, 9 }
 0x364   : > { %v3604_v61 = vadd.f32 %v3569_v31, %v2938_v41  ;;  %6541 = vmatmul.msk.bf16.gmra.mxu1 %vm1878_vm12, %v4791_v3  ;;  %6582 = vmatmul.msk.bf16.gmra.mxu2 %vm1878_vm12, %v5202_v16  ;;  %v4342_v31 = vld [vmem:[#allocation2 + $0x84] sm:$0xf]  ;;  %v5114_v41 = vsel %vm7388_vm11, %v5112_v46, %v5113_v40  ;;  %v4568_v16 = vsel %vm7465_vm15, %v4563_v39, %v4567_v35  ;;  %v5117_v35 = vrot.slane %v4346_v52, 5 }
 0x365   : > { %v5111_v62 = vsel %vm7388_vm11, %v6559_v19, %v5110_v25  ;;  %v4583_v14 = vshll.u32 %v4342_v31, 16  ;;  %v5181_v48 = vunpack.c.l.b16 %v5114_v41  ;;  %v4768_v22 = vunpack.c.l.b16 %v4568_v16  ;;  %v4991_v41 = vld [vmem:[#allocation2 + $0x90] sm:$0xe] }
 0x366   : > { %v8598_v7 = vadd.f32 %v3979_v9, %v3604_v61  ;;  %v4591_v61 = vrot.slane %v4589_v57, 5  ;;  %v4595_v9 = vrot.slane %v4593_v8, 4  ;;  %v4347_v57 = vld [vmem:[#allocation2 + $0x98] sm:$0x1]  ;;  %v5119_v45 = vrot.slane %v5117_v35, 4 }
 0x367   : > { %v5279_v29 = vpop.f32.mrf.mxu2  ;;  %v4585_v27 = vrot.slane %v4583_v14, 5  ;;  %v5120_v16 = vrot.slane %v4347_v57, 5 }
 0x368   : > { %v4596_v39 = vor.u32 %v4595_v9, %v4591_v61 }
 0x369   : > { %v2905_v34 = vpop.f32.mrf.mxu1  ;;  %v5121_v9 = vsel %vm7388_vm11, %v5119_v45, %v5120_v16 }
 0x36a   : > { %v2939_v23 = vadd.f32 %v2905_v34, %v8255_v1  ;;  %v4580_v1 = vshrl.u32 %v4342_v31, 16  ;;  %v4599_v31 = vshll.u32 %v4344_v12, 16  ;;  %v4597_v19 = vrot.slane %v4596_v39, 4 }
 0x36b   : > { %v6560_v12 = vrot.slane %v4991_v41, 9 }
 0x36c   : > { %v8605_v3 = vadd.f32 %v3571_v44, %v2939_v23  ;;  %v5180_v44 = vunpack.c.l.b16 %v5111_v62  ;;  %v4582_v34 = vrot.slane %v4580_v1, 4  ;;  %v4792_v23 = vpack.c.b16 %v4769_v24, %v4768_v22  ;;  %v8628_v22 = vld [vmem:[%s9016_s6] ss:$0 sm:$0xff] }
 0x36d   : > { %v4284_v62 = vadd.f32 %v8323_v59, %v8281_v51  ;;  %v4601_v14 = vrot.slane %v4599_v31, 5  ;;  %v4345_v59 = vld [vmem:[#allocation2 + $0x90] sm:$0xf] }
 0x36e   : > { %v5203_v25 = vpack.c.b16 %v5181_v48, %v5180_v44  ;;  %v4586_v8 = vor.u32 %v4585_v27, %v4582_v34  ;;  %v4604_v39 = vshrl.u32 %v4345_v59, 16  ;;  %v4607_v31 = vshll.u32 %v4345_v59, 16 }
 0x36f   : > { %v5281_v46 = vpop.f32.mrf.mxu2  ;;  %v4602_v51 = vsel %vm7465_vm15, %v4597_v19, %v4601_v14 }
 0x370   : > { %v4587_v48 = vrot.slane %v4586_v8, 4 }
 0x371   : > { %v4869_v53 = vpop.f32.mrf.mxu1 }
 0x372   : > { %v4949_v40 = vadd.f32 %v4869_v53, %v4283_v2  ;;  %v4617_v53 = vshrl.u32 %v4346_v52, 16  ;;  %v4592_v27 = vsel %vm7465_vm15, %v4587_v48, %v4591_v61  ;;  %v4285_v61 = vadd.f32 %v8340_v5, %v8290_v18 }
 0x373   : > { %v4770_v19 = vunpack.c.l.b16 %v4592_v27 }
 0x374   : > { %6542 = vmatmul.msk.bf16.gmra.mxu1 %vm1878_vm12, %v4792_v23  ;;  %6583 = vmatmul.msk.bf16.gmra.mxu2 %vm1878_vm12, %v5203_v25  ;;  %v5359_v0 = vadd.f32 %v5279_v29, %v4949_v40  ;;  %v4613_v29 = vshll.u32 %v4346_v52, 16  ;;  %v5118_v40 = vsel %vm7388_vm11, %v6560_v12, %v5117_v35  ;;  %v4771_v23 = vunpack.c.l.b16 %v4602_v51  ;;  %v8638_v52 = vpop.f32.mrf.mxu0 }
 0x375   : > { %v5183_v25 = vunpack.c.l.b16 %v5121_v9  ;;  %v4619_v41 = vrot.slane %v4617_v53, 4  ;;  %v5182_v16 = vunpack.c.l.b16 %v5118_v40  ;;  %v4606_v12 = vrot.slane %v4604_v39, 4  ;;  %v4350_v40 = vld [vmem:[#allocation2 + $0xa4] sm:$0x1] }
 0x376   : > { %v5395_v2 = vmul.f32 %v8618_v28, %v5359_v0  ;;  %v4615_v0 = vrot.slane %v4613_v29, 5  ;;  %v4609_v9 = vrot.slane %v4607_v31, 5 }
 0x377   : > { %v5284_v1 = vpop.f32.mrf.mxu2  ;;  %v5204_v48 = vpack.c.b16 %v5183_v25, %v5182_v16  ;;  %v4286_v25 = vadd.f32 %v8362_v63, %v8304_v47 }
 0x378   : > { %v5431_v8 = vadd.f32 %v8628_v22, %v5395_v2  ;;  %v4620_v51 = vor.u32 %v4619_v41, %v4615_v0  ;;  %v4610_v18 = vor.u32 %v4609_v9, %v4606_v12  ;;  %v5127_v41 = vrot.slane %v4350_v40, 5 }
 0x379   : > { %v4871_v24 = vpop.f32.mrf.mxu1 }
 0x37a   : > { %v4950_v44 = vadd.f32 %v4871_v24, %v4284_v62  ;;  %v4349_v62 = vld [vmem:[#allocation2 + $0xa0] sm:$0xf]  ;;  %v4793_v24 = vpack.c.b16 %v4771_v23, %v4770_v19  ;;  %v5463_v2 = vmax.f32 %v5431_v8, 0.0  ;;  %v4621_v5 = vrot.slane %v4620_v51, 4  ;;  %v4992_v8 = vld [vmem:[#allocation2 + $0x9c] sm:$0xe] }
 0x37b   : > { %v5124_v59 = vrot.slane %v4349_v62, 5  ;;  %v4348_v19 = vld [vmem:[#allocation2 + $0x9c] sm:$0xf]  ;;  %v4637_v16 = vshll.u32 %v4349_v62, 16 }
 0x37c   : > { %v5360_v34 = vadd.f32 %v5281_v46, %v4950_v44  ;;  %v4628_v9 = vshrl.u32 %v4348_v19, 16 }
 0x37d   : > { %v5126_v23 = vrot.slane %v5124_v59, 4 }
 0x37e   : > { %v5396_v45 = vmul.f32 %v8618_v28, %v5360_v34  ;;  %v4623_v34 = vshll.u32 %v4347_v57, 16 }
 0x37f   : > { %v5286_v35 = vpop.f32.mrf.mxu2  ;;  %v5128_v47 = vsel %vm7388_vm11, %v5126_v23, %v5127_v41  ;;  %v4630_v41 = vrot.slane %v4628_v9, 4  ;;  %v4353_v9 = vld [vmem:[#allocation2 + $0xb0] sm:$0x1] }
 0x380   : > { %v5432_v46 = vadd.f32 %v8628_v22, %v5396_v45  ;;  %v4625_v31 = vrot.slane %v4623_v34, 5 }
 0x381   : > { %v4874_v14 = vpop.f32.mrf.mxu1 }
 0x382   : > { %v5464_v44 = vmax.f32 %v5432_v46, 0.0  ;;  %v4951_v29 = vadd.f32 %v4874_v14, %v4285_v61  ;;  %v4641_v46 = vshrl.u32 %v4349_v62, 16  ;;  %v8648_v61 = vpop.f32.mrf.mxu0  ;;  %v4611_v14 = vrot.slane %v4610_v18, 4 }
 0x384   : > { %v5495_v53 = vpack.c.bf16 %v5464_v44, %v5463_v2  ;;  %6543 = vmatmul.msk.bf16.gmra.mxu1 %vm1878_vm12, %v4793_v24  ;;  %6584 = vmatmul.msk.bf16.gmra.mxu2 %vm1878_vm12, %v5204_v48  ;;  %v5361_v27 = vadd.f32 %v5284_v1, %v4951_v29  ;;  %v4626_v24 = vsel %vm7465_vm15, %v4621_v5, %v4625_v31  ;;  %v6561_v48 = vrot.slane %v4992_v8, 9  ;;  %v4352_v31 = vld [vmem:[#allocation2 + $0xac] sm:$0xf] }
 0x385   : > { %v4616_v12 = vsel %vm7465_vm15, %v4611_v14, %v4615_v0  ;;  %v4631_v2 = vshll.u32 %v4348_v19, 16  ;;  %v4773_v62 = vunpack.c.l.b16 %v4626_v24  ;;  %v4639_v29 = vrot.slane %v4637_v16, 5 }
 0x386   : > { %6598 = vmatmul.msk.bf16.vlgmr.msra.gmra.mxu3 %vm1878_vm12, %v5495_v53  ;;  %v5397_v57 = vmul.f32 %v8618_v28, %v5361_v27  ;;  %v5125_v44 = vsel %vm7388_vm11, %v6561_v48, %v5124_v59  ;;  %v4643_v51 = vrot.slane %v4641_v46, 4  ;;  %v5185_v27 = vunpack.c.l.b16 %v5128_v47 }
 0x387   : > { %v5289_v39 = vpop.f32.mrf.mxu2  ;;  %v4772_v18 = vunpack.c.l.b16 %v4616_v12  ;;  %v4633_v59 = vrot.slane %v4631_v2, 5  ;;  %v5131_v14 = vrot.slane %v4352_v31, 5 }
 0x388   : > { %v5433_v53 = vadd.f32 %v8628_v22, %v5397_v57  ;;  %v4644_v19 = vor.u32 %v4643_v51, %v4639_v29 }
 0x389   : > { %v4876_v45 = vpop.f32.mrf.mxu1  ;;  %v5133_v2 = vrot.slane %v5131_v14, 4 }
 0x38a   : > { %v4952_v1 = vadd.f32 %v4876_v45, %v4286_v25  ;;  %v5184_v25 = vunpack.c.l.b16 %v5125_v44  ;;  %v4794_v45 = vpack.c.b16 %v4773_v62, %v4772_v18  ;;  %v5465_v16 = vmax.f32 %v5433_v53, 0.0  ;;  %v8664_v24 = vpop.f32.mrf.mxu0  ;;  %v4993_v53 = vld [vmem:[#allocation2 + $0xa8] sm:$0xe] }
 0x38b   : > { %v4645_v12 = vrot.slane %v4644_v19, 4  ;;  %v4288_v62 = vadd.f32 %v8398_v4, %v8334_v10  ;;  %v4351_v18 = vld [vmem:[#allocation2 + $0xa8] sm:$0xf] }
 0x38c   : > { %v5362_v63 = vadd.f32 %v5286_v35, %v4952_v1  ;;  %v9069_v35 = vld [vmem:[#allocation16_spill] sm:$0xff]  ;;  %v5205_v1 = vpack.c.b16 %v5185_v27, %v5184_v25  ;;  %v5134_v27 = vrot.slane %v4353_v9, 5 }
 0x38d   : > { %v4287_v23 = vadd.f32 %v8381_v54, %v9069_v35  ;;  %v4647_v54 = vshll.u32 %v4350_v40, 16  ;;  %v4665_v35 = vshrl.u32 %v4352_v31, 16 }
 0x38e   : > { %v5398_v34 = vmul.f32 %v8618_v28, %v5362_v63  ;;  %v4634_v63 = vor.u32 %v4633_v59, %v4630_v41  ;;  %v4652_v41 = vshrl.u32 %v4351_v18, 16  ;;  %v4655_v59 = vshll.u32 %v4351_v18, 16 }
 0x38f   : > { %v5291_v0 = vpop.f32.mrf.mxu2  ;;  %v4649_v51 = vrot.slane %v4647_v54, 5 }
 0x390   : > { %v5434_v5 = vadd.f32 %v8628_v22, %v5398_v34 }
 0x391   : > { %v4879_v8 = vpop.f32.mrf.mxu1  ;;  %v4650_v25 = vsel %vm7465_vm15, %v4645_v12, %v4649_v51 }
 0x392   : > { %v5466_v46 = vmax.f32 %v5434_v5, 0.0  ;;  %v4953_v57 = vadd.f32 %v4879_v8, %v4287_v23  ;;  %v4661_v5 = vshll.u32 %v4352_v31, 16  ;;  %v4635_v23 = vrot.slane %v4634_v63, 4  ;;  %v9070_v63 = vld [vmem:[#allocation17_spill] sm:$0xff] }
 0x393   : > { %v6562_v8 = vrot.slane %v4993_v53, 9  ;;  %v4775_v19 = vunpack.c.l.b16 %v4650_v25  ;;  %v4654_v53 = vrot.slane %v4652_v41, 4  ;;  %v4671_v25 = vshll.u32 %v4353_v9, 16  ;;  %v4354_v9 = vld [vmem:[#allocation2 + $0xb4] sm:$0xf] }
 0x394   : > { %6544 = vmatmul.msk.bf16.gmra.mxu1 %vm1878_vm12, %v4794_v45  ;;  %v5496_v48 = vpack.c.bf16 %v5466_v46, %v5465_v16  ;;  %6585 = vmatmul.msk.bf16.gmra.mxu2 %vm1878_vm12, %v5205_v1  ;;  %v5363_v47 = vadd.f32 %v5289_v39, %v4953_v57  ;;  %v5135_v45 = vsel %vm7388_vm11, %v5133_v2, %v5134_v27  ;;  %v4663_v16 = vrot.slane %v4661_v5, 5  ;;  %v8680_v57 = vpop.f32.mrf.mxu0 }
 0x395   : > { %v4640_v4 = vsel %vm7465_vm15, %v4635_v23, %v4639_v29  ;;  %v5132_v31 = vsel %vm7388_vm11, %v6562_v8, %v5131_v14  ;;  %v4667_v46 = vrot.slane %v4665_v35, 4  ;;  %v5187_v54 = vunpack.c.l.b16 %v5135_v45 }
 0x396   : > { %6599 = vmatmul.msk.bf16.gmra.mxu3 %vm1878_vm12, %v5496_v48  ;;  %v5399_v40 = vmul.f32 %v8618_v28, %v5363_v47  ;;  %v4774_v47 = vunpack.c.l.b16 %v4640_v4  ;;  %v4289_v29 = vadd.f32 %v8420_v30, %v9070_v63  ;;  %v5186_v2 = vunpack.c.l.b16 %v5132_v31 }
 0x397   : > { %v5294_v44 = vpop.f32.mrf.mxu2  ;;  %v4668_v27 = vor.u32 %v4667_v46, %v4663_v16  ;;  %v4673_v46 = vrot.slane %v4671_v25, 5 }
 0x398   : > { %v5435_v1 = vadd.f32 %v8628_v22, %v5399_v40  ;;  %v4795_v14 = vpack.c.b16 %v4775_v19, %v4774_v47  ;;  %v5206_v40 = vpack.c.b16 %v5187_v54, %v5186_v2 }
 0x399   : > { %v4881_v34 = vpop.f32.mrf.mxu1  ;;  %v4669_v45 = vrot.slane %v4668_v27, 4  ;;  %v4679_v27 = vshll.u32 %v4354_v9, 16 }
 0x39a   : > { %v4954_v39 = vadd.f32 %v4881_v34, %v4288_v62  ;;  %v4355_v62 = vld [vmem:[#allocation2 + $0xb8] sm:$0xf]  ;;  %v4657_v34 = vrot.slane %v4655_v59, 5  ;;  %v5467_v18 = vmax.f32 %v5435_v1, 0.0  ;;  %v9071_v59 = vld [vmem:[#allocation18_spill] sm:$0xff] }
 0x39b   : > { %v4290_v19 = vadd.f32 %v8433_v26, %v9071_v59  ;;  %v4994_v1 = vld [vmem:[#allocation2 + $0xb4] sm:$0xe]  ;;  %v4689_v47 = vshrl.u32 %v4355_v62, 16  ;;  %v4674_v2 = vsel %vm7465_vm15, %v4669_v45, %v4673_v46 }
 0x39c   : > { %v5364_v10 = vadd.f32 %v5291_v0, %v4954_v39  ;;  %v5138_v39 = vrot.slane %v4355_v62, 5  ;;  %v4658_v8 = vor.u32 %v4657_v34, %v4654_v53  ;;  %v8692_v41 = vpop.f32.mrf.mxu0  ;;  %v4676_v34 = vshrl.u32 %v4354_v9, 16 }
 0x39e   : > { %v5400_v48 = vmul.f32 %v8618_v28, %v5364_v10  ;;  %v8690_v10 = vld [vmem:[#allocation2 + $0xbc] sm:$0x1]  ;;  %v5140_v4 = vrot.slane %v5138_v39, 4  ;;  %v4678_v46 = vrot.slane %v4676_v34, 4 }
 0x39f   : > { %v5296_v12 = vpop.f32.mrf.mxu2  ;;  %v5141_v54 = vrot.slane %v8690_v10, 5 }
 0x3a0   : > { %v5436_v0 = vadd.f32 %v8628_v22, %v5400_v48 }
 0x3a1   : > { %v4884_v51 = vpop.f32.mrf.mxu1  ;;  %v5142_v26 = vsel %vm7388_vm11, %v5140_v4, %v5141_v54 }
 0x3a2   : > { %v5468_v5 = vmax.f32 %v5436_v0, 0.0  ;;  %v4955_v35 = vadd.f32 %v4884_v51, %v4289_v29  ;;  %v4659_v29 = vrot.slane %v4658_v8, 4  ;;  %v6563_v51 = vrot.slane %v4994_v1, 9 }
 0x3a3   : > { %v5189_v25 = vunpack.c.l.b16 %v5142_v26  ;;  %v4681_v1 = vrot.slane %v4679_v27, 5  ;;  %v4695_v26 = vshll.u32 %v8690_v10, 16 }
 0x3a4   : > { %6545 = vmatmul.msk.bf16.gmra.mxu1 %vm1878_vm12, %v4795_v14  ;;  %v5497_v23 = vpack.c.bf16 %v5468_v5, %v5467_v18  ;;  %6586 = vmatmul.msk.bf16.gmra.mxu2 %vm1878_vm12, %v5206_v40  ;;  %v5365_v30 = vadd.f32 %v5294_v44, %v4955_v35  ;;  %v4685_v44 = vshll.u32 %v4355_v62, 16  ;;  %v4664_v53 = vsel %vm7465_vm15, %v4659_v29, %v4663_v16  ;;  %v9073_v29 = vld [vmem:[#allocation21_spill] sm:$0xff] }
 0x3a5   : > { %v4777_v18 = vunpack.c.l.b16 %v4674_v2  ;;  %v5139_v62 = vsel %vm7388_vm11, %v6563_v51, %v5138_v39  ;;  %v4691_v35 = vrot.slane %v4689_v47, 4  ;;  %v9074_v2 = vld [vmem:[#allocation20_spill] sm:$0xff]  ;;  %v4682_v27 = vor.u32 %v4681_v1, %v4678_v46 }
 0x3a6   : > { %6600 = vmatmul.msk.bf16.gmra.mxu3 %vm1878_vm12, %v5497_v23  ;;  %v5401_v0 = vmul.f32 %v8618_v28, %v5365_v30  ;;  %v4687_v5 = vrot.slane %v4685_v44, 5  ;;  %v4776_v30 = vunpack.c.l.b16 %v4664_v53  ;;  %v5188_v4 = vunpack.c.l.b16 %v5139_v62  ;;  %v4995_v53 = vld [vmem:[#allocation2 + $0xc0] sm:$0xe] }
 0x3a7   : > { %v5299_v31 = vpop.f32.mrf.mxu2  ;;  %v3993_v51 = vadd.f32 %v9074_v2, %v9073_v29  ;;  %v4357_v62 = vld [vmem:[#allocation2 + $0xc0] sm:$0xf] }
 0x3a8   : > { %v5437_v40 = vadd.f32 %v8628_v22, %v5401_v0  ;;  %v4692_v39 = vor.u32 %v4691_v35, %v4687_v5  ;;  %v5207_v47 = vpack.c.b16 %v5189_v25, %v5188_v4  ;;  %v4358_v0 = vld [vmem:[#allocation2 + $0xc4] sm:$0xf]  ;;  %v6564_v35 = vrot.slane %v4995_v53, 9 }
 0x3a9   : > { %v4886_v48 = vpop.f32.mrf.mxu1  ;;  %v4292_v25 = vadd.f32 %v8648_v61, %v3993_v51  ;;  %v4703_v10 = vshll.u32 %v4357_v62, 16  ;;  %v4713_v61 = vshrl.u32 %v4358_v0, 16 }
 0x3aa   : > { %v4956_v63 = vadd.f32 %v4886_v48, %v4290_v19  ;;  %v4796_v19 = vpack.c.b16 %v4777_v18, %v4776_v30  ;;  %v8711_v48 = vpop.f32.mrf.mxu0  ;;  %v5469_v54 = vmax.f32 %v5437_v40, 0.0  ;;  %v4693_v18 = vrot.slane %v4692_v39, 4 }
 0x3ab   : > { %v4709_v39 = vshll.u32 %v4358_v0, 16  ;;  %v4705_v2 = vrot.slane %v4703_v10, 5 }
 0x3ac   : > { %v5366_v14 = vadd.f32 %v5296_v12, %v4956_v63  ;;  %v9072_v12 = vld [vmem:[#allocation19_spill] sm:$0xff]  ;;  %v5145_v63 = vrot.slane %v4358_v0, 5 }
 0x3ad   : > { %v4291_v45 = vadd.f32 %v8638_v52, %v9072_v12 }
 0x3ae   : > { %v5402_v23 = vmul.f32 %v8618_v28, %v5366_v14  ;;  %v8718_v14 = vld [vmem:[#allocation2 + $0xc8] sm:$0x1]  ;;  %v5147_v40 = vrot.slane %v5145_v63, 4  ;;  %v5146_v46 = vsel %vm7388_vm11, %v6564_v35, %v5145_v63 }
 0x3af   : > { %v5301_v16 = vpop.f32.mrf.mxu2 }
 0x3b0   : > { %v5438_v8 = vadd.f32 %v8628_v22, %v5402_v23  ;;  %v5148_v23 = vrot.slane %v8718_v14, 5 }
 0x3b1   : > { %v4889_v59 = vpop.f32.mrf.mxu1 }
 0x3b2   : > { %v5470_v9 = vmax.f32 %v5438_v8, 0.0  ;;  %v4957_v44 = vadd.f32 %v4889_v59, %v4291_v45  ;;  %v4697_v8 = vrot.slane %v4695_v26, 5  ;;  %v4700_v45 = vshrl.u32 %v4357_v62, 16 }
 0x3b3   : > { %v5149_v1 = vsel %vm7388_vm11, %v5147_v40, %v5148_v23  ;;  %v5190_v26 = vunpack.c.l.b16 %v5146_v46 }
 0x3b4   : > { %6546 = vmatmul.msk.bf16.gmra.mxu1 %vm1878_vm12, %v4796_v19  ;;  %v5498_v52 = vpack.c.bf16 %v5470_v9, %v5469_v54  ;;  %6587 = vmatmul.msk.bf16.gmra.mxu2 %vm1878_vm12, %v5207_v47  ;;  %v5367_v34 = vadd.f32 %v5299_v31, %v4957_v44  ;;  %v4683_v31 = vrot.slane %v4682_v27, 4  ;;  %v4698_v19 = vsel %vm7465_vm15, %v4693_v18, %v4697_v8  ;;  %v8730_v54 = vpop.f32.mrf.mxu0 }
 0x3b5   : > { %v4779_v47 = vunpack.c.l.b16 %v4698_v19  ;;  %v4702_v29 = vrot.slane %v4700_v45, 4  ;;  %v5191_v63 = vunpack.c.l.b16 %v5149_v1  ;;  %v4715_v27 = vrot.slane %v4713_v61, 4  ;;  %v4361_v45 = vld [vmem:[#allocation2 + $0xd0] sm:$0xf]  ;;  %v4996_v19 = vld [vmem:[#allocation2 + $0xcc] sm:$0xe] }
 0x3b6   : > { %6601 = vmatmul.msk.bf16.gmra.mxu3 %vm1878_vm12, %v5498_v52  ;;  %v5403_v4 = vmul.f32 %v8618_v28, %v5367_v34  ;;  %v4688_v44 = vsel %vm7465_vm15, %v4683_v31, %v4687_v5  ;;  %v4711_v34 = vrot.slane %v4709_v39, 5  ;;  %v6565_v1 = vrot.slane %v4996_v19, 9 }
 0x3b7   : > { %v5304_v30 = vpop.f32.mrf.mxu2  ;;  %v4778_v53 = vunpack.c.l.b16 %v4688_v44  ;;  %v4706_v35 = vor.u32 %v4705_v2, %v4702_v29  ;;  %v5208_v8 = vpack.c.b16 %v5191_v63, %v5190_v26  ;;  %v5152_v39 = vrot.slane %v4361_v45, 5  ;;  %v4360_v63 = vld [vmem:[#allocation2 + $0xcc] sm:$0xf] }
 0x3b8   : > { %v5439_v51 = vadd.f32 %v8628_v22, %v5403_v4  ;;  %v4716_v10 = vor.u32 %v4715_v27, %v4711_v34  ;;  %v4719_v4 = vshll.u32 %v8718_v14, 16 }
 0x3b9   : > { %v4891_v12 = vpop.f32.mrf.mxu1  ;;  %v4797_v5 = vpack.c.b16 %v4779_v47, %v4778_v53  ;;  %v4707_v46 = vrot.slane %v4706_v35, 4  ;;  %v5153_v2 = vsel %vm7388_vm11, %v6565_v1, %v5152_v39  ;;  %v4737_v53 = vshrl.u32 %v4361_v45, 16 }
 0x3ba   : > { %v4958_v59 = vadd.f32 %v4891_v12, %v4292_v25  ;;  %v5471_v40 = vmax.f32 %v5439_v51, 0.0  ;;  %v934_v12 = vld [vmem:[#allocation2 + $0xd4] sm:$0x1]  ;;  %v4717_v14 = vrot.slane %v4716_v10, 4  ;;  %v4721_v44 = vrot.slane %v4719_v4, 5 }
 0x3bb   : > { %v935_v31 = vsel %vm7316_vm4, 0, %v934_v12  ;;  %v5154_v51 = vrot.slane %v5152_v39, 4 }
 0x3bc   : > { %v5368_v9 = vadd.f32 %v5301_v16, %v4958_v59  ;;  %v4293_v16 = vadd.f32 %v8664_v24, %v8406_v6  ;;  %v3995_v6 = vadd.f32 %v8411_v13, %v8422_v38  ;;  %936 = vst [vmem:[#allocation2 + $0xd4] sm:$0x1] %v935_v31  ;;  %v8746_v61 = vpop.f32.mrf.mxu0  ;;  %v4712_v38 = vsel %vm7465_vm15, %v4707_v46, %v4711_v34 }
 0x3bd   : > { %v4722_v27 = vsel %vm7465_vm15, %v4717_v14, %v4721_v44  ;;  %v5192_v34 = vunpack.c.l.b16 %v5153_v2 }
 0x3be   : > { %v5404_v52 = vmul.f32 %v8618_v28, %v5368_v9  ;;  %v4294_v47 = vadd.f32 %v8680_v57, %v3995_v6  ;;  %v4724_v57 = vshrl.u32 %v4360_v63, 16  ;;  %v4781_v4 = vunpack.c.l.b16 %v4722_v27 }
 0x3bf   : > { %v5306_v18 = vpop.f32.mrf.mxu2 }
 0x3c0   : > { %v5440_v0 = vadd.f32 %v8628_v22, %v5404_v52 }
 0x3c1   : > { %v4894_v62 = vpop.f32.mrf.mxu1 }
 0x3c2   : > { %v5472_v23 = vmax.f32 %v5440_v0, 0.0  ;;  %v4959_v25 = vadd.f32 %v4894_v62, %v4293_v16  ;;  %v4727_v16 = vshll.u32 %v4360_v63, 16 }
 0x3c3   : > { %v4362_v0 = vld [vmem:[#allocation2 + $0xd4] sm:$0x1] }
 0x3c4   : > { %6547 = vmatmul.msk.bf16.gmra.mxu1 %vm1878_vm12, %v4797_v5  ;;  %v5499_v24 = vpack.c.bf16 %v5472_v23, %v5471_v40  ;;  %6588 = vmatmul.msk.bf16.gmra.mxu2 %vm1878_vm12, %v5208_v8  ;;  %v5369_v9 = vadd.f32 %v5304_v30, %v4959_v25  ;;  %v4733_v30 = vshll.u32 %v4361_v45, 16  ;;  %v4780_v5 = vunpack.c.l.b16 %v4712_v38  ;;  %v4243_v31 = vpop.f32.mrf.mxu0  ;;  %v9076_v38 = vld [vmem:[#allocation23_spill] sm:$0xff] }
 0x3c5   : > { %v5155_v35 = vrot.slane %v4362_v0, 5  ;;  %v4726_v40 = vrot.slane %v4724_v57, 4  ;;  %v4729_v23 = vrot.slane %v4727_v16, 5  ;;  %v4739_v8 = vrot.slane %v4737_v53, 4 }
 0x3c6   : > { %6602 = vmatmul.msk.bf16.gmra.mxu3 %vm1878_vm12, %v5499_v24  ;;  %v5405_v52 = vmul.f32 %v8618_v28, %v5369_v9  ;;  %v4735_v25 = vrot.slane %v4733_v30, 5  ;;  %v4743_v9 = vshll.u32 %v4362_v0, 16  ;;  %v3997_v2 = vadd.f32 %v9077_v33, %v9076_v38 }
 0x3c7   : > { %v5309_v29 = vpop.f32.mrf.mxu2  ;;  %v5156_v45 = vsel %vm7388_vm11, %v5154_v51, %v5155_v35  ;;  %v4730_v1 = vor.u32 %v4729_v23, %v4726_v40  ;;  %v9078_v23 = vld [vmem:[#allocation24_spill] sm:$0xff] }
 0x3c8   : > { %v5441_v12 = vadd.f32 %v8628_v22, %v5405_v52  ;;  %v5193_v59 = vunpack.c.l.b16 %v5156_v45  ;;  %v4740_v39 = vor.u32 %v4739_v8, %v4735_v25  ;;  %v4296_v63 = vadd.f32 %v8711_v48, %v3997_v2 }
 0x3c9   : > { %v4896_v13 = vpop.f32.mrf.mxu1  ;;  %v4731_v52 = vrot.slane %v4730_v1, 4  ;;  %v4297_v8 = vadd.f32 %v8730_v54, %v9078_v23  ;;  %v4299_v2 = vadd.f32 %v4243_v31, %v8472_v42 }
 0x3ca   : > { %v4960_v26 = vadd.f32 %v4896_v13, %v4294_v47  ;;  %v5209_v46 = vpack.c.b16 %v5193_v59, %v5192_v34  ;;  %v5473_v14 = vmax.f32 %v5441_v12, 0.0  ;;  %v4798_v13 = vpack.c.b16 %v4781_v4, %v4780_v5  ;;  %v9079_v59 = vld [vmem:[#allocation26_spill] sm:$0xff] }
 0x3cb   : > { %v4736_v27 = vsel %vm7465_vm15, %v4731_v52, %v4735_v25 }
 0x3cc   : > { %v5370_v62 = vadd.f32 %v5306_v18, %v4960_v26  ;;  %v4295_v18 = vadd.f32 %v8692_v41, %v8435_v37  ;;  %v4741_v37 = vrot.slane %v4740_v39, 4  ;;  %v4745_v41 = vrot.slane %v4743_v9, 5  ;;  %v4245_v57 = vpop.f32.mrf.mxu0 }
 0x3cd   : > { %v4782_v35 = vunpack.c.l.b16 %v4736_v27 }
 0x3ce   : > { %v5406_v10 = vmul.f32 %v8618_v28, %v5370_v62  ;;  %v4746_v0 = vsel %vm7465_vm15, %v4741_v37, %v4745_v41 }
 0x3cf   : > { %v5311_v6 = vpop.f32.mrf.mxu2  ;;  %v4783_v34 = vunpack.c.l.b16 %v4746_v0 }
 0x3d0   : > { %v5442_v19 = vadd.f32 %v8628_v22, %v5406_v10 }
 0x3d1   : > { %v4899_v24 = vpop.f32.mrf.mxu1  ;;  %v4799_v25 = vpack.c.b16 %v4783_v34, %v4782_v35 }
 0x3d2   : > { %v5474_v44 = vmax.f32 %v5442_v19, 0.0  ;;  %v4961_v47 = vadd.f32 %v4899_v24, %v4295_v18  ;;  %v9080_v19 = vld [vmem:[#allocation25_spill] sm:$0xff] }
 0x3d3   : > { %v3999_v18 = vadd.f32 %v9080_v19, %v9079_v59 }
 0x3d4   : > { %6548 = vmatmul.msk.bf16.gmra.mxu1 %vm1878_vm12, %v4798_v13  ;;  %v5500_v51 = vpack.c.bf16 %v5474_v44, %v5473_v14  ;;  %6589 = vmatmul.msk.bf16.gmra.mxu2 %vm1878_vm12, %v5209_v46  ;;  %v5371_v26 = vadd.f32 %v5309_v29, %v4961_v47 }
 0x3d5   : > { %v4298_v1 = vadd.f32 %v8746_v61, %v3999_v18 }
 0x3d6   : > { %6603 = vmatmul.msk.bf16.gmra.mxu3 %vm1878_vm12, %v5500_v51  ;;  %v5407_v16 = vmul.f32 %v8618_v28, %v5371_v26  ;;  %v9081_v26 = vld [vmem:[#allocation27_spill] sm:$0xff] }
 0x3d7   : > { %v5314_v30 = vpop.f32.mrf.mxu2 }
 0x3d8   : > { %v5443_v29 = vadd.f32 %v8628_v22, %v5407_v16 }
 0x3d9   : > { %v4901_v53 = vpop.f32.mrf.mxu1 }
 0x3da   : > { %v4962_v62 = vadd.f32 %v4901_v53, %v4296_v63  ;;  %v5475_v10 = vmax.f32 %v5443_v29, 0.0  ;;  %v4001_v63 = vadd.f32 %v9081_v26, %v8481_v49 }
 0x3dc   : > { %v5372_v5 = vadd.f32 %v5311_v6, %v4962_v62  ;;  %v4248_v6 = vpop.f32.mrf.mxu0  ;;  %v4300_v0 = vadd.f32 %v4245_v57, %v4001_v63 }
 0x3dd   : > { %v4301_v49 = vadd.f32 %v4248_v6, %v8490_v55  ;;  %v8806_v55 = vld [vmem:[%s9018_s8] ss:$0 sm:$0xff] }
 0x3de   : > { %v5408_v40 = vmul.f32 %v8618_v28, %v5372_v5 }
 0x3df   : > { %v5316_v12 = vpop.f32.mrf.mxu2 }
 0x3e0   : > { %v5444_v48 = vadd.f32 %v8628_v22, %v5408_v40 }
 0x3e1   : > { %v4904_v56 = vpop.f32.mrf.mxu1 }
 0x3e2   : > { %v5476_v4 = vmax.f32 %v5444_v48, 0.0  ;;  %v4963_v45 = vadd.f32 %v4904_v56, %v4297_v8  ;;  %v8798_v48 = vpop.f32.mrf.mxu3  ;;  %v9082_v56 = vld [vmem:[#allocation28_spill] sm:$0xff] }
 0x3e4   : > { %6549 = vmatmul.msk.bf16.gmra.mxu1 %vm1878_vm12, %v4799_v25  ;;  %v5501_v24 = vpack.c.bf16 %v5476_v4, %v5475_v10  ;;  %v5373_v46 = vadd.f32 %v5314_v30, %v4963_v45  ;;  %v4250_v47 = vpop.f32.mrf.mxu0  ;;  %v4003_v10 = vadd.f32 %v9082_v56, %v8499_v32 }
 0x3e6   : > { %6604 = vmatmul.msk.bf16.gmra.mxu3 %vm1878_vm12, %v5501_v24  ;;  %v5409_v9 = vmul.f32 %v8618_v28, %v5373_v46  ;;  %v4302_v59 = vadd.f32 %v4250_v47, %v4003_v10 }
 0x3e7   : > { %v5319_v39 = vpop.f32.mrf.mxu2 }
 0x3e8   : > { %v5445_v13 = vadd.f32 %v8628_v22, %v5409_v9  ;;  %v6714_v9 = vld [vmem:[%s7265_s20] sm:$0xff]  }
 0x3e9   : > { %v4906_v54 = vpop.f32.mrf.mxu1 }
 0x3ea   : > { %v4964_v14 = vadd.f32 %v4906_v54, %v4298_v1  ;;  %v5477_v37 = vmax.f32 %v5445_v13, 0.0  ;;  %v8813_v54 = vld [vmem:[%s9019_s9] ss:$0 sm:$0xff] }
 0x3ec   : > { %v5374_v44 = vadd.f32 %v5316_v12, %v4964_v14  ;;  %v4253_v27 = vpop.f32.mrf.mxu0 }
 0x3ee   : > { %v5410_v38 = vmul.f32 %v8618_v28, %v5374_v44 }
 0x3ef   : > { %v5321_v51 = vpop.f32.mrf.mxu2 }
 0x3f0   : > { %v5446_v33 = vadd.f32 %v8628_v22, %v5410_v38  ;;  %v6715_v38 = vunpack.c.l.bf16 %v6714_v9 }
 0x3f1   : > { %v4909_v52 = vpop.f32.mrf.mxu1 }
 0x3f2   : > { %v5478_v41 = vmax.f32 %v5446_v33, 0.0  ;;  %v4965_v61 = vadd.f32 %v4909_v52, %v4299_v2  ;;  %v4303_v33 = vadd.f32 %v4253_v27, %v8508_v43 }
 0x3f4   : > { %v5502_v30 = vpack.c.bf16 %v5478_v41, %v5477_v37  ;;  %v5375_v53 = vadd.f32 %v5319_v39, %v4965_v61  ;;  %v4255_v8 = vpop.f32.mrf.mxu0  ;;  %v6716_v37 = vunpack.c.h.bf16 %v6714_v9 }
 0x3f6   : > { %6605 = vmatmul.msk.bf16.gmra.mxu3 %vm1878_vm12, %v5502_v30  ;;  %v5411_v5 = vmul.f32 %v8618_v28, %v5375_v53  ;;  %v9083_v30 = vld [vmem:[#allocation29_spill] sm:$0xff] }
 0x3f7   : > { %v5324_v16 = vpop.f32.mrf.mxu2  ;;  %v4005_v53 = vadd.f32 %v9083_v30, %v8517_v21 }
 0x3f8   : > { %v5447_v31 = vadd.f32 %v8628_v22, %v5411_v5 }
 0x3f9   : > { %v4911_v62 = vpop.f32.mrf.mxu1 }
 0x3fa   : > { %v4966_v35 = vadd.f32 %v4911_v62, %v4300_v0  ;;  %v5479_v57 = vmax.f32 %v5447_v31, 0.0  ;;  %v4304_v31 = vadd.f32 %v4255_v8, %v4005_v53 }
 0x3fc   : > { %v5376_v42 = vadd.f32 %v5321_v51, %v4966_v35  ;;  %v4258_v1 = vpop.f32.mrf.mxu0 }
 0x3fe   : > { %v5412_v34 = vmul.f32 %v8618_v28, %v5376_v42 }
 0x3ff   : > { %v5326_v40 = vpop.f32.mrf.mxu2 }
 0x400   : > { %v5448_v29 = vadd.f32 %v8628_v22, %v5412_v34 }
 0x401   : > { %v4914_v23 = vpop.f32.mrf.mxu1 }
 0x402   : > { %v5480_v25 = vmax.f32 %v5448_v29, 0.0  ;;  %v4967_v12 = vadd.f32 %v4914_v23, %v4301_v49 }
 0x404   : > { %v5503_v4 = vpack.c.bf16 %v5480_v25, %v5479_v57  ;;  %v5377_v45 = vadd.f32 %v5324_v16, %v4967_v12  ;;  %v4260_v5 = vpop.f32.mrf.mxu0  ;;  %v6857_v12 = vld [vmem:[%s7265_s20 + $0x8] sm:$0xff]  }
 0x406   : > { %6606 = vmatmul.msk.bf16.gmra.mxu3 %vm1878_vm12, %v5503_v4  ;;  %v5413_v24 = vmul.f32 %v8618_v28, %v5377_v45 }
 0x407   : > { %v5329_v19 = vpop.f32.mrf.mxu2 }
 0x408   : > { %v5449_v14 = vadd.f32 %v8628_v22, %v5413_v24 }
 0x409   : > { %v4916_v18 = vpop.f32.mrf.mxu1  ;;  %v5584_v6 = vpop.f32.mrf.mxu3 }
 0x40a   : > { %v4968_v46 = vadd.f32 %v4916_v18, %v4302_v59  ;;  %v5668_v32 = vmul.f32 %v8806_v55, %v5584_v6  ;;  %v5481_v41 = vmax.f32 %v5449_v14, 0.0  ;;  %v6719_v59 = vunpack.c.l.bf16 %v6857_v12 }
 0x40c   : > { %v5378_v39 = vadd.f32 %v5326_v40, %v4968_v46  ;;  %v5704_v13 = vadd.f32 %v8813_v54, %v5668_v32  ;;  %v4263_v10 = vpop.f32.mrf.mxu0  ;;  %v6720_v46 = vunpack.c.h.bf16 %v6857_v12  ;;  %v9085_v12 = vld [vmem:[#allocation31_spill] sm:$0xff] }
 0x40e   : > { %v5414_v44 = vmul.f32 %v8618_v28, %v5378_v39  ;;  %v5800_v0 = vadd.f32 %v6715_v38, %v5704_v13 }
 0x40f   : > { %v5331_v2 = vpop.f32.mrf.mxu2 }
 0x410   : > { %v5450_v47 = vadd.f32 %v8628_v22, %v5414_v44  ;;  %v5832_v27 = vmax.f32 %v5800_v0, 0.0  ;;  %v9084_v44 = vld [vmem:[#allocation30_spill] sm:$0xff] }
 0x411   : > { %v4919_v51 = vpop.f32.mrf.mxu1  ;;  %v5586_v52 = vpop.f32.mrf.mxu3 }
 0x412   : > { %v5482_v61 = vmax.f32 %v5450_v47, 0.0  ;;  %v4969_v26 = vadd.f32 %v4919_v51, %v4303_v33  ;;  %v5669_v63 = vmul.f32 %v8806_v55, %v5586_v52  ;;  %v4007_v47 = vadd.f32 %v9084_v44, %v8535_v58  ;;  %v6859_v44 = vld [vmem:[%s7265_s20 + $0x18] sm:$0xff]  }
 0x414   : > { %v5705_v16 = vadd.f32 %v8813_v54, %v5669_v63  ;;  %v5504_v62 = vpack.c.bf16 %v5482_v61, %v5481_v41  ;;  %v5379_v35 = vadd.f32 %v5329_v19, %v4969_v26  ;;  %v4305_v19 = vadd.f32 %v4258_v1, %v8526_v20  ;;  %v4265_v26 = vpop.f32.mrf.mxu0 }
 0x415   : > { %v4306_v52 = vadd.f32 %v4260_v5, %v4007_v47 }
 0x416   : > { %v5801_v43 = vadd.f32 %v6716_v37, %v5705_v16  ;;  %6607 = vmatmul.msk.bf16.gmra.mxu3 %vm1878_vm12, %v5504_v62  ;;  %v5415_v40 = vmul.f32 %v8618_v28, %v5379_v35  ;;  %v6858_v16 = vld [vmem:[%s7265_s20 + $0x10] sm:$0xff]  }
 0x417   : > { %v5334_v34 = vpop.f32.mrf.mxu2 }
 0x418   : > { %v5833_v42 = vmax.f32 %v5801_v43, 0.0  ;;  %v5451_v56 = vadd.f32 %v8628_v22, %v5415_v40 }
 0x419   : > { %v4921_v29 = vpop.f32.mrf.mxu1  ;;  %v5589_v49 = vpop.f32.mrf.mxu3 }
 0x41a   : > { %v6780_v21 = vpack.c.bf16 %v5833_v42, %v5832_v27  ;;  %v4970_v23 = vadd.f32 %v4921_v29, %v4304_v31  ;;  %v5670_v25 = vmul.f32 %v8806_v55, %v5589_v49  ;;  %v5483_v39 = vmax.f32 %v5451_v56, 0.0 }
 0x41b   : > { %v6723_v27 = vunpack.c.l.bf16 %v6858_v16  ;;  %v4307_v42 = vadd.f32 %v4263_v10, %v8544_v11  ;;  %v6724_v49 = vunpack.c.h.bf16 %v6858_v16  ;;  %v4009_v56 = vadd.f32 %v9085_v12, %v8553_v36 }
 0x41c   : > { %6781 = vst [vmem:[%s8829_s19] sm:$0xff] %v6780_v21   ;;  %v5380_v57 = vadd.f32 %v5331_v2, %v4970_v23  ;;  %v5706_v45 = vadd.f32 %v8813_v54, %v5670_v25  ;;  %v4268_v25 = vpop.f32.mrf.mxu0 }
 0x41e   : > { %v5416_v8 = vmul.f32 %v8618_v28, %v5380_v57  ;;  %v5802_v13 = vadd.f32 %v6719_v59, %v5706_v45 }
 0x41f   : > { %v5336_v18 = vpop.f32.mrf.mxu2 }
 0x420   : > { %v5452_v4 = vadd.f32 %v8628_v22, %v5416_v8  ;;  %v5834_v1 = vmax.f32 %v5802_v13, 0.0 }
 0x421   : > { %v4924_v6 = vpop.f32.mrf.mxu1  ;;  %v5591_v24 = vpop.f32.mrf.mxu3 }
 0x422   : > { %v5484_v32 = vmax.f32 %v5452_v4, 0.0  ;;  %v4971_v9 = vadd.f32 %v4924_v6, %v4305_v19  ;;  %v5671_v14 = vmul.f32 %v8806_v55, %v5591_v24 }
 0x424   : > { %v5707_v38 = vadd.f32 %v8813_v54, %v5671_v14  ;;  %v5505_v33 = vpack.c.bf16 %v5484_v32, %v5483_v39  ;;  %v5381_v2 = vadd.f32 %v5334_v34, %v4971_v9  ;;  %v4270_v47 = vpop.f32.mrf.mxu0 }
 0x426   : > { %v5803_v20 = vadd.f32 %v6720_v46, %v5707_v38  ;;  %6608 = vmatmul.msk.bf16.gmra.mxu3 %vm1878_vm12, %v5505_v33  ;;  %v5417_v63 = vmul.f32 %v8618_v28, %v5381_v2  ;;  %v8866_v38 = vld [vmem:[%s9015_s5] ss:$0 sm:$0xff] }
 0x427   : > { %v5339_v37 = vpop.f32.mrf.mxu2 }
 0x428   : > { %v5835_v51 = vmax.f32 %v5803_v20, 0.0  ;;  %v5453_v62 = vadd.f32 %v8628_v22, %v5417_v63  ;;  %v6727_v20 = vunpack.c.l.bf16 %v6859_v44 }
 0x429   : > { %v4926_v41 = vpop.f32.mrf.mxu1  ;;  %v5594_v61 = vpop.f32.mrf.mxu3 }
 0x42a   : > { %v6785_v58 = vpack.c.bf16 %v5835_v51, %v5834_v1  ;;  %v4972_v30 = vadd.f32 %v4926_v41, %v4306_v52  ;;  %v5672_v0 = vmul.f32 %v8806_v55, %v5594_v61  ;;  %v5485_v40 = vmax.f32 %v5453_v62, 0.0 }
 0x42b   : > { %v4309_v1 = vadd.f32 %v4268_v25, %v8562_v60 }
 0x42c   : > { %6872 = vst [vmem:[%s8829_s19 + $0x8] sm:$0xff] %v6785_v58   ;;  %v5382_v53 = vadd.f32 %v5336_v18, %v4972_v30  ;;  %v5708_v5 = vadd.f32 %v8813_v54, %v5672_v0  ;;  %v4308_v18 = vadd.f32 %v4265_v26, %v4009_v56  ;;  %v9086_v30 = vld [vmem:[#allocation32_spill] sm:$0xff] }
 0x42e   : > { %v5418_v35 = vmul.f32 %v8618_v28, %v5382_v53  ;;  %v5804_v8 = vadd.f32 %v6723_v27, %v5708_v5  ;;  %v4011_v53 = vadd.f32 %v9086_v30, %v8571_v17 }
 0x42f   : > { %v5341_v31 = vpop.f32.mrf.mxu2 }
 0x430   : > { %v5454_v43 = vadd.f32 %v8628_v22, %v5418_v35  ;;  %v5836_v59 = vmax.f32 %v5804_v8, 0.0  ;;  %v4273_v35 = vpop.f32.mrf.mxu0  ;;  %v4310_v27 = vadd.f32 %v4270_v47, %v4011_v53 }
 0x431   : > { %v4929_v34 = vpop.f32.mrf.mxu1  ;;  %v5596_v29 = vpop.f32.mrf.mxu3 }
 0x432   : > { %v5486_v21 = vmax.f32 %v5454_v43, 0.0  ;;  %v4973_v23 = vadd.f32 %v4929_v34, %v4307_v42  ;;  %v5673_v57 = vmul.f32 %v8806_v55, %v5596_v29 }
 0x434   : > { %v5709_v4 = vadd.f32 %v8813_v54, %v5673_v57  ;;  %v5506_v45 = vpack.c.bf16 %v5486_v21, %v5485_v40  ;;  %v5383_v11 = vadd.f32 %v5339_v37, %v4973_v23  ;;  %v6728_v37 = vunpack.c.h.bf16 %v6859_v44  ;;  %v6860_v23 = vld [vmem:[%s7265_s20 + $0x20] sm:$0xff]   ;;  %v8884_v57 = vld [vmem:[%s9016_s6] ss:$0 sm:$0xff] }
 0x436   : > { %v5805_v10 = vadd.f32 %v6724_v49, %v5709_v4  ;;  %6609 = vmatmul.msk.bf16.gmra.mxu3 %vm1878_vm12, %v5506_v45  ;;  %v5419_v39 = vmul.f32 %v8618_v28, %v5383_v11  ;;  %v6731_v4 = vunpack.c.l.bf16 %v6860_v23  ;;  %v4311_v45 = vadd.f32 %v4273_v35, %v8580_v15 }
 0x437   : > { %v5344_v6 = vpop.f32.mrf.mxu2 }
 0x438   : > { %v5837_v19 = vmax.f32 %v5805_v10, 0.0  ;;  %v5455_v13 = vadd.f32 %v8628_v22, %v5419_v39  ;;  %v9087_v39 = vld [vmem:[#allocation33_spill] sm:$0xff] }
 0x439   : > { %v4931_v24 = vpop.f32.mrf.mxu1  ;;  %v5599_v46 = vpop.f32.mrf.mxu3 }
 0x43a   : > { %v6790_v32 = vpack.c.bf16 %v5837_v19, %v5836_v59  ;;  %v4974_v36 = vadd.f32 %v4931_v24, %v4308_v18  ;;  %v5674_v14 = vmul.f32 %v8806_v55, %v5599_v46  ;;  %v5487_v41 = vmax.f32 %v5455_v13, 0.0  ;;  %v4275_v46 = vpop.f32.mrf.mxu0 }
 0x43b   : > { %v6732_v59 = vunpack.c.h.bf16 %v6860_v23 }
 0x43c   : > { %6873 = vst [vmem:[%s8829_s19 + $0x10] sm:$0xff] %v6790_v32   ;;  %v5384_v9 = vadd.f32 %v5341_v31, %v4974_v36  ;;  %v5710_v28 = vadd.f32 %v8813_v54, %v5674_v14  ;;  %v4013_v32 = vadd.f32 %v9087_v39, %v8589_v50 }
 0x43e   : > { %v5420_v33 = vmul.f32 %v8866_v38, %v5384_v9  ;;  %v5806_v0 = vadd.f32 %v6727_v20, %v5710_v28 }
 0x43f   : > { %v5346_v58 = vpop.f32.mrf.mxu2 }
 0x440   : > { %v5456_v2 = vadd.f32 %v8628_v22, %v5420_v33  ;;  %v5838_v43 = vmax.f32 %v5806_v0, 0.0 }
 0x441   : > { %v4934_v51 = vpop.f32.mrf.mxu1  ;;  %v5601_v52 = vpop.f32.mrf.mxu3 }
 0x442   : > { %v5488_v61 = vmax.f32 %v5456_v2, 0.0  ;;  %v4975_v26 = vadd.f32 %v4934_v51, %v4309_v1  ;;  %v5675_v63 = vmul.f32 %v8806_v55, %v5601_v52  ;;  %v4312_v2 = vadd.f32 %v4275_v46, %v4013_v32  ;;  %v4278_v52 = vpop.f32.mrf.mxu0 }
 0x444   : > { %v5711_v22 = vadd.f32 %v8813_v54, %v5675_v63  ;;  %v5507_v16 = vpack.c.bf16 %v5488_v61, %v5487_v41  ;;  %v5385_v62 = vadd.f32 %v5344_v6, %v4975_v26  ;;  %v6861_v61 = vld [vmem:[%s7265_s20 + $0x28] sm:$0xff]  }
 0x445   : > { %v6735_v0 = vunpack.c.l.bf16 %v6861_v61 }
 0x446   : > { %v5807_v60 = vadd.f32 %v6728_v37, %v5711_v22  ;;  %6610 = vmatmul.msk.bf16.gmra.mxu3 %vm1878_vm12, %v5507_v16  ;;  %v5421_v34 = vmul.f32 %v8866_v38, %v5385_v62 }
 0x447   : > { %v5349_v21 = vpop.f32.mrf.mxu2 }
 0x448   : > { %v5839_v5 = vmax.f32 %v5807_v60, 0.0  ;;  %v5457_v25 = vadd.f32 %v8884_v57, %v5421_v34  ;;  %v6736_v60 = vunpack.c.h.bf16 %v6861_v61 }
 0x449   : > { %v4936_v42 = vpop.f32.mrf.mxu1  ;;  %v5604_v31 = vpop.f32.mrf.mxu3 }
 0x44a   : > { %v6795_v29 = vpack.c.bf16 %v5839_v5, %v5838_v43  ;;  %v4976_v17 = vadd.f32 %v4936_v42, %v4310_v27  ;;  %v5676_v40 = vmul.f32 %v8806_v55, %v5604_v31  ;;  %v5489_v19 = vmax.f32 %v5457_v25, 0.0 }
 0x44b   : > { %v4015_v42 = vadd.f32 %v8798_v48, %v8605_v3 }
 0x44c   : > { %6874 = vst [vmem:[%s8829_s19 + $0x18] sm:$0xff] %v6795_v29   ;;  %v5386_v49 = vadd.f32 %v5346_v58, %v4976_v17  ;;  %v5712_v8 = vadd.f32 %v8813_v54, %v5676_v40  ;;  %v4313_v58 = vadd.f32 %v4278_v52, %v8598_v7  ;;  %v4280_v29 = vpop.f32.mrf.mxu0 }
 0x44d   : > { %v4314_v40 = vadd.f32 %v4280_v29, %v4015_v42  ;;  %v6865_v29 = vld [vmem:[%s7265_s20 + $0x48] sm:$0xff]  }
 0x44e   : > { %v5422_v12 = vmul.f32 %v8866_v38, %v5386_v49  ;;  %v5808_v36 = vadd.f32 %v6731_v4, %v5712_v8 }
 0x44f   : > { %v5351_v47 = vpop.f32.mrf.mxu2 }
 0x450   : > { %v5458_v56 = vadd.f32 %v8884_v57, %v5422_v12  ;;  %v5840_v13 = vmax.f32 %v5808_v36, 0.0 }
 0x451   : > { %v4939_v11 = vpop.f32.mrf.mxu1  ;;  %v5606_v10 = vpop.f32.mrf.mxu3 }
 0x452   : > { %v5490_v18 = vmax.f32 %v5458_v56, 0.0  ;;  %v4977_v6 = vadd.f32 %v4939_v11, %v4311_v45  ;;  %v5677_v24 = vmul.f32 %v8806_v55, %v5606_v10  ;;  %v6862_v11 = vld [vmem:[%s7265_s20 + $0x30] sm:$0xff]  }
 0x453   : > { %v6740_v36 = vunpack.c.h.bf16 %v6862_v11 }
 0x454   : > { %v5713_v9 = vadd.f32 %v8813_v54, %v5677_v24  ;;  %v5508_v14 = vpack.c.bf16 %v5490_v18, %v5489_v19  ;;  %v5387_v44 = vadd.f32 %v5349_v21, %v4977_v6  ;;  %v6739_v6 = vunpack.c.l.bf16 %v6862_v11  ;;  %v6866_v11 = vld [vmem:[%s7265_s20 + $0x50] sm:$0xff]  }
 0x456   : > { %v5809_v15 = vadd.f32 %v6732_v59, %v5713_v9  ;;  %6611 = vmatmul.msk.bf16.gmra.mxu3 %vm1878_vm12, %v5508_v14  ;;  %v5423_v1 = vmul.f32 %v8866_v38, %v5387_v44 }
 0x457   : > { %v5354_v22 = vpop.f32.mrf.mxu2 }
 0x458   : > { %v5841_v33 = vmax.f32 %v5809_v15, 0.0  ;;  %v5459_v26 = vadd.f32 %v8884_v57, %v5423_v1 }
 0x459   : > { %v4941_v28 = vpop.f32.mrf.mxu1  ;;  %v5609_v20 = vpop.f32.mrf.mxu3 }
 0x45a   : > { %v6800_v51 = vpack.c.bf16 %v5841_v33, %v5840_v13  ;;  %v4978_v50 = vadd.f32 %v4941_v28, %v4312_v2  ;;  %v5678_v41 = vmul.f32 %v8806_v55, %v5609_v20  ;;  %v5491_v35 = vmax.f32 %v5459_v26, 0.0  ;;  %v6863_v2 = vld [vmem:[%s7265_s20 + $0x38] sm:$0xff]  }
 0x45b   : > { %v6743_v20 = vunpack.c.l.bf16 %v6863_v2 }
 0x45c   : > { %6875 = vst [vmem:[%s8829_s19 + $0x20] sm:$0xff] %v6800_v51   ;;  %v5388_v37 = vadd.f32 %v5351_v47, %v4978_v50  ;;  %v5714_v53 = vadd.f32 %v8813_v54, %v5678_v41  ;;  %v6744_v50 = vunpack.c.h.bf16 %v6863_v2 }
 0x45e   : > { %v5424_v63 = vmul.f32 %v8866_v38, %v5388_v37  ;;  %v5810_v31 = vadd.f32 %v6735_v0, %v5714_v53  ;;  %v6864_v53 = vld [vmem:[%s7265_s20 + $0x40] sm:$0xff]  }
 0x45f   : > { %v5356_v48 = vpop.f32.mrf.mxu2 }
 0x460   : > { %v5460_v30 = vadd.f32 %v8884_v57, %v5424_v63  ;;  %v5842_v21 = vmax.f32 %v5810_v31, 0.0 }
 0x461   : > { %v4944_v16 = vpop.f32.mrf.mxu1  ;;  %v5611_v62 = vpop.f32.mrf.mxu3 }
 0x462   : > { %v5492_v43 = vmax.f32 %v5460_v30, 0.0  ;;  %v4979_v5 = vadd.f32 %v4944_v16, %v4313_v58  ;;  %v5679_v27 = vmul.f32 %v8806_v55, %v5611_v62 }
 0x464   : > { %v5715_v7 = vadd.f32 %v8813_v54, %v5679_v27  ;;  %v5509_v34 = vpack.c.bf16 %v5492_v43, %v5491_v35  ;;  %v5389_v17 = vadd.f32 %v5354_v22, %v4979_v5  ;;  %v6747_v22 = vunpack.c.l.bf16 %v6864_v53 }
 0x466   : > { %v5811_v49 = vadd.f32 %v6736_v60, %v5715_v7  ;;  %6612 = vmatmul.msk.bf16.gmra.mxu3 %vm1878_vm12, %v5509_v34  ;;  %v5425_v56 = vmul.f32 %v8866_v38, %v5389_v17  ;;  %v6748_v60 = vunpack.c.h.bf16 %v6864_v53 }
 0x468   : > { %v5843_v23 = vmax.f32 %v5811_v49, 0.0  ;;  %v5461_v10 = vadd.f32 %v8884_v57, %v5425_v56  ;;  %v6751_v49 = vunpack.c.l.bf16 %v6865_v29 }
 0x469   : > { %v4946_v25 = vpop.f32.mrf.mxu1  ;;  %v5614_v12 = vpop.f32.mrf.mxu3 }
 0x46a   : > { %v6805_v8 = vpack.c.bf16 %v5843_v23, %v5842_v21  ;;  %v4980_v3 = vadd.f32 %v4946_v25, %v4314_v40  ;;  %v5680_v45 = vmul.f32 %v8806_v55, %v5614_v12  ;;  %v5493_v46 = vmax.f32 %v5461_v10, 0.0 }
 0x46b   : > { %v6752_v23 = vunpack.c.h.bf16 %v6865_v29 }
 0x46c   : > { %6876 = vst [vmem:[%s8829_s19 + $0x28] sm:$0xff] %v6805_v8   ;;  %v5390_v4 = vadd.f32 %v5356_v48, %v4980_v3  ;;  %v5716_v18 = vadd.f32 %v8813_v54, %v5680_v45 }
 0x46e   : > { %v5426_v59 = vmul.f32 %v8866_v38, %v5390_v4  ;;  %v5812_v9 = vadd.f32 %v6739_v6, %v5716_v18  ;;  %v6756_v6 = vunpack.c.h.bf16 %v6866_v11 }
 0x470   : > { %v5462_v19 = vadd.f32 %v8884_v57, %v5426_v59  ;;  %v5844_v38 = vmax.f32 %v5812_v9, 0.0  ;;  %v6755_v59 = vunpack.c.l.bf16 %v6866_v11 }
 0x471   : > { %v5616_v24 = vpop.f32.mrf.mxu3 }
 0x472   : > { %v5494_v39 = vmax.f32 %v5462_v19, 0.0  ;;  %v5681_v32 = vmul.f32 %v8806_v55, %v5616_v24 }
 0x474   : > { %v5717_v14 = vadd.f32 %v8813_v54, %v5681_v32  ;;  %v5510_v44 = vpack.c.bf16 %v5494_v39, %v5493_v46 }
 0x476   : > { %v5813_v15 = vadd.f32 %v6740_v36, %v5717_v14  ;;  %6613 = vmatmul.msk.bf16.gmra.mxu3 %vm1878_vm12, %v5510_v44 }
 0x478   : > { %v5845_v57 = vmax.f32 %v5813_v15, 0.0  ;;  %v6867_v15 = vld [vmem:[%s7265_s20 + $0x58] sm:$0xff]  }
 0x479   : > { %v5619_v47 = vpop.f32.mrf.mxu3 }
 0x47a   : > { %v6810_v13 = vpack.c.bf16 %v5845_v57, %v5844_v38  ;;  %v5682_v33 = vmul.f32 %v8806_v55, %v5619_v47  ;;  %v6759_v57 = vunpack.c.l.bf16 %v6867_v15 }
 0x47c   : > { %6877 = vst [vmem:[%s8829_s19 + $0x30] sm:$0xff] %v6810_v13   ;;  %v5718_v28 = vadd.f32 %v8813_v54, %v5682_v33  ;;  %v6760_v33 = vunpack.c.h.bf16 %v6867_v15 }
 0x47e   : > { %v5814_v52 = vadd.f32 %v6743_v20, %v5718_v28 }
 0x480   : > { %v5846_v61 = vmax.f32 %v5814_v52, 0.0 }
 0x481   : > { %v5621_v1 = vpop.f32.mrf.mxu3 }
 0x482   : > { %v5683_v51 = vmul.f32 %v8806_v55, %v5621_v1 }
 0x484   : > { %v5719_v37 = vadd.f32 %v8813_v54, %v5683_v51 }
 0x486   : > { %v5815_v41 = vadd.f32 %v6744_v50, %v5719_v37 }
 0x488   : > { %v5847_v26 = vmax.f32 %v5815_v41, 0.0  ;;  %v6868_v41 = vld [vmem:[%s7265_s20 + $0x60] sm:$0xff]  }
 0x489   : > { %v5624_v63 = vpop.f32.mrf.mxu3 }
 0x48a   : > { %v6815_v58 = vpack.c.bf16 %v5847_v26, %v5846_v61  ;;  %v5684_v30 = vmul.f32 %v8806_v55, %v5624_v63  ;;  %v6763_v26 = vunpack.c.l.bf16 %v6868_v41 }
 0x48c   : > { %6878 = vst [vmem:[%s8829_s19 + $0x38] sm:$0xff] %v6815_v58   ;;  %v5720_v0 = vadd.f32 %v8813_v54, %v5684_v30  ;;  %v6764_v30 = vunpack.c.h.bf16 %v6868_v41 }
 0x48e   : > { %v5816_v35 = vadd.f32 %v6747_v22, %v5720_v0 }
 0x490   : > { %v5848_v27 = vmax.f32 %v5816_v35, 0.0 }
 0x491   : > { %v5626_v16 = vpop.f32.mrf.mxu3 }
 0x492   : > { %v5685_v62 = vmul.f32 %v8806_v55, %v5626_v16 }
 0x494   : > { %v5721_v43 = vadd.f32 %v8813_v54, %v5685_v62 }
 0x496   : > { %v5817_v5 = vadd.f32 %v6748_v60, %v5721_v43 }
 0x498   : > { %v5849_v42 = vmax.f32 %v5817_v5, 0.0  ;;  %v6869_v5 = vld [vmem:[%s7265_s20 + $0x68] sm:$0xff]  }
 0x499   : > { %v5629_v31 = vpop.f32.mrf.mxu3 }
 0x49a   : > { %v6820_v7 = vpack.c.bf16 %v5849_v42, %v5848_v27  ;;  %v5686_v34 = vmul.f32 %v8806_v55, %v5629_v31  ;;  %v6767_v42 = vunpack.c.l.bf16 %v6869_v5 }
 0x49c   : > { %6879 = vst [vmem:[%s8829_s19 + $0x40] sm:$0xff] %v6820_v7   ;;  %v5722_v17 = vadd.f32 %v8813_v54, %v5686_v34  ;;  %v6768_v34 = vunpack.c.h.bf16 %v6869_v5 }
 0x49e   : > { %v5818_v25 = vadd.f32 %v6751_v49, %v5722_v17 }
 0x4a0   : > { %v5850_v8 = vmax.f32 %v5818_v25, 0.0 }
 0x4a1   : > { %v5631_v40 = vpop.f32.mrf.mxu3 }
 0x4a2   : > { %v5687_v21 = vmul.f32 %v8806_v55, %v5631_v40 }
 0x4a4   : > { %v5723_v12 = vadd.f32 %v8813_v54, %v5687_v21 }
 0x4a6   : > { %v5819_v56 = vadd.f32 %v6752_v23, %v5723_v12 }
 0x4a8   : > { %v5851_v3 = vmax.f32 %v5819_v56, 0.0  ;;  %v6870_v56 = vld [vmem:[%s7265_s20 + $0x70] sm:$0xff]  }
 0x4a9   : > { %v5634_v48 = vpop.f32.mrf.mxu3 }
 0x4aa   : > { %v6825_v4 = vpack.c.bf16 %v5851_v3, %v5850_v8  ;;  %v5688_v45 = vmul.f32 %v8806_v55, %v5634_v48  ;;  %v6771_v3 = vunpack.c.l.bf16 %v6870_v56 }
 0x4ac   : > { %6880 = vst [vmem:[%s8829_s19 + $0x48] sm:$0xff] %v6825_v4   ;;  %v5724_v10 = vadd.f32 %v8813_v54, %v5688_v45  ;;  %v6772_v45 = vunpack.c.h.bf16 %v6870_v56 }
 0x4ae   : > { %v5820_v24 = vadd.f32 %v6755_v59, %v5724_v10 }
 0x4b0   : > { %v5852_v32 = vmax.f32 %v5820_v24, 0.0 }
 0x4b1   : > { %v5636_v19 = vpop.f32.mrf.mxu3 }
 0x4b2   : > { %v5689_v18 = vmul.f32 %v8806_v55, %v5636_v19 }
 0x4b4   : > { %v5725_v46 = vadd.f32 %v8813_v54, %v5689_v18 }
 0x4b6   : > { %v5821_v39 = vadd.f32 %v6756_v6, %v5725_v46 }
 0x4b8   : > { %v5853_v36 = vmax.f32 %v5821_v39, 0.0  ;;  %v6871_v39 = vld [vmem:[%s7265_s20 + $0x78] sm:$0xff]   ;;  %s5941_s20 = sshll.u32 %s8829_s19, 4  ;;  %s5942_s20 = int_to_ptr.vmem [resolvable:$true] %s5941_s20 }
 0x4b9   : > { %v5639_v9 = vpop.f32.mrf.mxu3 }
 0x4ba   : > { %v6830_v14 = vpack.c.bf16 %v5853_v36, %v5852_v32  ;;  %v5690_v44 = vmul.f32 %v8806_v55, %v5639_v9  ;;  %v6775_v36 = vunpack.c.l.bf16 %v6871_v39 }
 0x4bc   : > { %6881 = vst [vmem:[%s8829_s19 + $0x50] sm:$0xff] %v6830_v14   ;;  %v5726_v38 = vadd.f32 %v8813_v54, %v5690_v44  ;;  %v6776_v44 = vunpack.c.h.bf16 %v6871_v39 }
 0x4be   : > { %v5822_v2 = vadd.f32 %v6759_v57, %v5726_v38 }
 0x4c0   : > { %v5854_v1 = vmax.f32 %v5822_v2, 0.0 }
 0x4c1   : > { %v5641_v47 = vpop.f32.mrf.mxu3 }
 0x4c2   : > { %v5691_v13 = vmul.f32 %v8806_v55, %v5641_v47 }
 0x4c4   : > { %v5727_v28 = vadd.f32 %v8813_v54, %v5691_v13 }
 0x4c6   : > { %v5823_v20 = vadd.f32 %v6760_v33, %v5727_v28 }
 0x4c8   : > { %v5855_v51 = vmax.f32 %v5823_v20, 0.0 }
 0x4c9   : > { %v5644_v50 = vpop.f32.mrf.mxu3 }
 0x4ca   : > { %v6835_v52 = vpack.c.bf16 %v5855_v51, %v5854_v1  ;;  %v5692_v37 = vmul.f32 %v8806_v55, %v5644_v50 }
 0x4cc   : > { %6882 = vst [vmem:[%s8829_s19 + $0x58] sm:$0xff] %v6835_v52   ;;  %v5728_v61 = vadd.f32 %v8813_v54, %v5692_v37 }
 0x4ce   : > { %v5824_v53 = vadd.f32 %v6763_v26, %v5728_v61 }
 0x4d0   : > { %v5856_v16 = vmax.f32 %v5824_v53, 0.0 }
 0x4d1   : > { %v5646_v63 = vpop.f32.mrf.mxu3 }
 0x4d2   : > { %v5693_v58 = vmul.f32 %v8806_v55, %v5646_v63 }
 0x4d4   : > { %v5729_v0 = vadd.f32 %v8813_v54, %v5693_v58 }
 0x4d6   : > { %v5825_v22 = vadd.f32 %v6764_v30, %v5729_v0 }
 0x4d8   : > { %v5857_v62 = vmax.f32 %v5825_v22, 0.0 }
 0x4d9   : > { %v5649_v60 = vpop.f32.mrf.mxu3 }
 0x4da   : > { %v6840_v35 = vpack.c.bf16 %v5857_v62, %v5856_v16  ;;  %v5694_v43 = vmul.f32 %v8806_v55, %v5649_v60 }
 0x4dc   : > { %6883 = vst [vmem:[%s8829_s19 + $0x60] sm:$0xff] %v6840_v35   ;;  %v5730_v27 = vadd.f32 %v8813_v54, %v5694_v43 }
 0x4de   : > { %v5826_v29 = vadd.f32 %v6767_v42, %v5730_v27 }
 0x4e0   : > { %v5858_v40 = vmax.f32 %v5826_v29, 0.0 }
 0x4e1   : > { %v5651_v31 = vpop.f32.mrf.mxu3 }
 0x4e2   : > { %v5695_v7 = vmul.f32 %v8806_v55, %v5651_v31 }
 0x4e4   : > { %v5731_v17 = vadd.f32 %v8813_v54, %v5695_v7 }
 0x4e6   : > { %v5827_v49 = vadd.f32 %v6768_v34, %v5731_v17 }
 0x4e8   : > { %v5859_v21 = vmax.f32 %v5827_v49, 0.0 }
 0x4e9   : > { %v5654_v23 = vpop.f32.mrf.mxu3 }
 0x4ea   : > { %v6845_v25 = vpack.c.bf16 %v5859_v21, %v5858_v40  ;;  %v5696_v12 = vmul.f32 %v8806_v55, %v5654_v23 }
 0x4ec   : > { %6884 = vst [vmem:[%s8829_s19 + $0x68] sm:$0xff] %v6845_v25   ;;  %v5732_v8 = vadd.f32 %v8813_v54, %v5696_v12 }
 0x4ee   : > { %v5828_v11 = vadd.f32 %v6771_v3, %v5732_v8 }
 0x4f0   : > { %v5860_v19 = vmax.f32 %v5828_v11, 0.0 }
 0x4f1   : > { %v5656_v48 = vpop.f32.mrf.mxu3 }
 0x4f2   : > { %v5697_v4 = vmul.f32 %v8806_v55, %v5656_v48 }
 0x4f4   : > { %v5733_v10 = vadd.f32 %v8813_v54, %v5697_v4 }
 0x4f6   : > { %v5829_v59 = vadd.f32 %v6772_v45, %v5733_v10 }
 0x4f8   : > { %v5861_v18 = vmax.f32 %v5829_v59, 0.0 }
 0x4f9   : > { %v5659_v6 = vpop.f32.mrf.mxu3 }
 0x4fa   : > { %v6850_v24 = vpack.c.bf16 %v5861_v18, %v5860_v19  ;;  %v5698_v46 = vmul.f32 %v8806_v55, %v5659_v6 }
 0x4fc   : > { %6885 = vst [vmem:[%s8829_s19 + $0x70] sm:$0xff] %v6850_v24   ;;  %v5734_v32 = vadd.f32 %v8813_v54, %v5698_v46 }
 0x4fe   : > { %v5830_v15 = vadd.f32 %v6775_v36, %v5734_v32 }
 0x500   : > { %v5862_v47 = vmax.f32 %v5830_v15, 0.0 }
 0x501   : > { %v5661_v9 = vpop.f32.mrf.mxu3 }
 0x502   : > { %v5699_v14 = vmul.f32 %v8806_v55, %v5661_v9 }
 0x504   : > { %v5735_v38 = vadd.f32 %v8813_v54, %v5699_v14 }
 0x506   : > { %v5831_v57 = vadd.f32 %v6776_v44, %v5735_v38 }
 0x508   : > { %v5863_v13 = vmax.f32 %v5831_v57, 0.0 }
 0x50a   : > { %v6855_v33 = vpack.c.bf16 %v5863_v13, %v5862_v47 }
 0x50c   : > { %6886 = vst [vmem:[%s8829_s19 + $0x78] sm:$0xff] %v6855_v33  }
 0x50d   : > { %7054 = shalt.err (!%p7051_p10)
}
 0x50e   : > { %s7103_s4 = smov 64   ;;  %s7104_s19 = smov 4  }
 0x50f   : > { %6899 = dma.vmem_to_hbm [thread:$0]  (%p7229_p3), %s5942_s20, 2048, %s5944_s24, %s5929_s17, %s7103_s4, %s7103_s4, %s7104_s19  }
 0x510 PF: > { %s5958_s21 = sand.u32 1, %s7085_s13   ;;  %p9089_p12 = scmp.ge.s32.totalorder %s7097_s16, 2 }
 0x511   : > { %s5959_s30 = scalar_lea.sflag [#allocation5], %s5958_s21 }
 0x512   : > { %p6910_p13 = pnand %p9089_p12, %p7195_p6 }
 0x514   : > { %p6911_p0 = pneg %p6910_p13 }
 0x516   : > { %7080 = dma.done.wait (%p6911_p0), %s5959_s30, 2048  }
 0x517   : > { %7082 = vsyncadd (%p6911_p0), %s5959_s30, 4294965248  ;;  %s9090_s12 = sld [smem:[#allocation12_spill]]  ;;  %p24_p5 = scmp.ge.s32.totalorder %s7213_s27, 4  }
 0x518   : > { %s9091_s15 = sld [smem:[#allocation14_spill]]  ;;  %s9092_s13 = smov %s7089_s14 }
 0x519   : > { %s9094_s16 = smov %s7213_s27  ;;  %26 = sbr.rel (!%p24_p5) target bundleno = 8 (0x8), region = 120 }
 0x51d   : > { %s9093_s14 = smov %s9090_s12 }
 0x51e   :  { %5965 = vsyncpa [#allocation4], 1 }
 0x51f   :  { %5967 = vsyncpa [#allocation4 + $0x1], 1 }
 0x520   :  { %5968 = vsyncpa [#allocation7], 1 }
 0x521   :  { %5969 = vsyncpa [#allocation5], 1 }
 0x522   :  { %5971 = vsyncpa [#allocation5 + $0x1], 1 }

</bundles_post_ra>
